<compile_context>
chip_gen: v5e
topology: v5e:2x2
jax: 0.10.0
libtpu: 0.0.40
codegen_flags: <defaults>
</compile_context>

<pallas_src>
import math
import jax
import jax.numpy as jnp
from jax.experimental import pallas as pl
from jax.experimental.pallas import tpu as pltpu

# ---- small BERT-like config ----
B, S, H = 2, 8, 32          # batch, seq, hidden
NH, HD = 4, 8               # num heads, head dim (NH * HD == H)
NHP = 8                     # head axis padded to a full sublane group; padded heads are zero
I = 64                      # intermediate (ffn) size
L = 2                       # num_hidden_layers
EPS = 1e-12                 # layer_norm_eps

VEC_ROWS, VEC_LANES = 16, 128   # packed small-parameter slab per layer (two vregs)


def _layernorm(x, g, b):
    mu = jnp.mean(x, axis=-1, keepdims=True)
    xc = x - mu
    var = jnp.mean(xc * xc, axis=-1, keepdims=True)
    return xc * jax.lax.rsqrt(var + EPS) * g + b


def _gelu(x):
    # Exact-erf GELU (PyTorch nn.GELU default) via the Abramowitz-Stegun 7.1.26 erf polynomial.
    # The divide goes to the EUP (approx reciprocal) + one Newton step to recover accuracy.
    z = x * (1.0 / math.sqrt(2.0))
    a = jnp.abs(z)
    denom = 1.0 + 0.3275911 * a
    t = pl.reciprocal(denom, approx=True)
    t = t * (2.0 - denom * t)                      # one Newton step: ~f32 accuracy
    poly = t * (0.254829592 + t * (-0.284496736 + t * (1.421413741
                + t * (-1.453152027 + t * 1.061405429))))
    erf_a = 1.0 - poly * jnp.exp(-a * a)
    erf_z = jnp.where(z >= 0.0, erf_a, -erf_a)
    return 0.5 * x * (1.0 + erf_z)


def encoder_stack_kernel(x_ref, mask_ref, sel_ref, selt_ref,
                         wqkv_ref, wo_ref, w1_ref, w2_ref, vec_ref, out_ref):
    """Single grid step; the L encoder layers are unrolled inside the kernel."""
    x = x_ref[...]                      # (B*S, H) f32 running hidden state
    mask = mask_ref[...]                # (B*S, S, NHP) additive mask (pre-broadcast over heads)
    sel = sel_ref[...]                  # (H, NHP)  0/1 head-membership matrix
    selt = selt_ref[...]                # (NHP, H)  its transpose

    for l in range(L):                  # static unrolled layer loop (grid collapsed)
        vec = vec_ref[l]                # (VEC_ROWS, VEC_LANES) packed small params
        bq, bk, bv = vec[0:1, 0:H], vec[1:2, 0:H], vec[2:3, 0:H]
        bo = vec[3:4, 0:H]
        ln1g, ln1b = vec[4:5, 0:H], vec[5:6, 0:H]
        b1 = vec[6:7, 0:I]
        b2 = vec[7:8, 0:H]
        ln2g, ln2b = vec[8:9, 0:H], vec[9:10, 0:H]

        # ---- Q/K/V projections: three 2D MXU matmuls (bf16 operands, f32 accum) ----
        xb = x.astype(jnp.bfloat16)
        q = jnp.dot(xb, wqkv_ref[3 * l + 0], preferred_element_type=jnp.float32) + bq  # scaled
        k = jnp.dot(xb, wqkv_ref[3 * l + 1], preferred_element_type=jnp.float32) + bk
        v = jnp.dot(xb, wqkv_ref[3 * l + 2], preferred_element_type=jnp.float32) + bv

        q3 = q.reshape(B, S, H)
        k3 = k.reshape(B, S, H)
        v3 = v.reshape(B, S, H)

        # ---- scores for all heads at once (no per-head loop, no lane slicing) ----
        # prod[b,i,j,c] = q[b,i,c]*k[b,j,c]; one matmul vs `sel` sums c within each head group.
        prod = q3[:, :, None, :] * k3[:, None, :, :]                 # (B, S, S, H)   VPU
        s = jnp.dot(prod.reshape(B * S * S, H), sel,
                    preferred_element_type=jnp.float32)              # (B*S*S, NHP)  one MXU push
        s = s.reshape(B * S, S, NHP) + mask                          # mask added once

        # softmax over the key axis, unrolled over S=8 (plain VPU max/add on full-lane slices
        # instead of a cross-sublane multi-reduction)
        m = s[:, 0:1, :]
        for j in range(1, S):
            m = jnp.maximum(m, s[:, j:j + 1, :])
        p = jnp.exp(s - m)                                           # (B*S, S, NHP)
        den = p[:, 0:1, :]
        for j in range(1, S):
            den = den + p[:, j:j + 1, :]
        p = p * pl.reciprocal(den, approx=True)

        # ---- context: expand head weights back onto H lanes, weight V, sum over keys ----
        pe = jnp.dot(p.reshape(B * S * S, NHP), selt,
                     preferred_element_type=jnp.float32)             # (B*S*S, H)   one MXU push
        pv = pe.reshape(B, S, S, H) * v3[:, None, :, :]              # (B, S, S, H)  VPU
        ctx = pv[:, :, 0:1, :]
        for j in range(1, S):
            ctx = ctx + pv[:, :, j:j + 1, :]
        ctx = ctx.reshape(B * S, H)                                  # heads concatenated on lanes

        attn = jnp.dot(ctx.astype(jnp.bfloat16), wo_ref[l],
                       preferred_element_type=jnp.float32) + bo      # single Wo matmul
        att_out = _layernorm(attn + x, ln1g, ln1b)                   # post-norm residual

        # ---- feed forward ----
        h1 = _gelu(jnp.dot(att_out.astype(jnp.bfloat16), w1_ref[l],
                           preferred_element_type=jnp.float32) + b1)
        ffn = jnp.dot(h1.astype(jnp.bfloat16), w2_ref[l],
                      preferred_element_type=jnp.float32) + b2

        # TODO(synk): nn.Dropout(hidden_dropout_prob) is identity in eval mode; no RNG dropout.
        x = _layernorm(att_out + ffn, ln2g, ln2b)

    out_ref[...] = x.astype(out_ref.dtype)


def _pack_layer(params_l):
    """Stack Wq/Wk/Wv on a leading axis, fold the 1/sqrt(HD) scale, pack small vectors."""
    (wq, bq, wk, bk, wv, bv, wo, bo, ln1g, ln1b, w1, b1, w2, b2, ln2g, ln2b) = params_l
    scale = 1.0 / math.sqrt(HD)
    wqkv = jnp.stack([wq * scale, wk, wv])                           # (3, H, H)
    vec = jnp.zeros((VEC_ROWS, VEC_LANES), jnp.float32)
    vec = vec.at[0, :H].set(bq * scale)
    vec = vec.at[1, :H].set(bk)
    vec = vec.at[2, :H].set(bv)
    vec = vec.at[3, :H].set(bo)
    vec = vec.at[4, :H].set(ln1g)
    vec = vec.at[5, :H].set(ln1b)
    vec = vec.at[6, :I].set(b1)
    vec = vec.at[7, :H].set(b2)
    vec = vec.at[8, :H].set(ln2g)
    vec = vec.at[9, :H].set(ln2b)
    return wqkv, wo, w1, w2, vec


@jax.jit
def _encoder_forward(x_flat, mask, sel, selt, wqkv, wo, w1, w2, vec):
    # At these toy dims everything fits VMEM comfortably, so a single grid step is used.
    # At real BERT dims one would re-introduce a tiled grid (parallel token axis for v7x's
    # second core, an FFN reduction axis) and raise vmem_limit_bytes.
    return pl.pallas_call(
        encoder_stack_kernel,
        out_shape=jax.ShapeDtypeStruct((B * S, H), jnp.float32),
        grid=(1,),
        in_specs=[
            pl.BlockSpec((B * S, H), lambda i: (0, 0)),                     # hidden state
            pl.BlockSpec((B * S, S, NHP), lambda i: (0, 0, 0)),             # additive mask
            pl.BlockSpec((H, NHP), lambda i: (0, 0)),                       # head selection
            pl.BlockSpec((NHP, H), lambda i: (0, 0)),                       # head expansion
            pl.BlockSpec((3 * L, H, H), lambda i: (0, 0, 0)),               # Wq/Wk/Wv stacked
            pl.BlockSpec((L, H, H), lambda i: (0, 0, 0)),                   # Wo
            pl.BlockSpec((L, H, I), lambda i: (0, 0, 0)),                   # W1
            pl.BlockSpec((L, I, H), lambda i: (0, 0, 0)),                   # W2
            pl.BlockSpec((L, VEC_ROWS, VEC_LANES), lambda i: (0, 0, 0)),    # packed vectors
        ],
        out_specs=pl.BlockSpec((B * S, H), lambda i: (0, 0)),
        input_output_aliases={0: 0},                                        # donate state buffer
        compiler_params=pltpu.CompilerParams(dimension_semantics=("arbitrary",)),
    )(x_flat, mask, sel, selt, wqkv, wo, w1, w2, vec)


def transformer_encoders(hidden_states, attention_mask, layer_params):
    """hidden_states: (B, S, H); attention_mask: (B, 1, 1, S) additive mask."""
    packed = [_pack_layer(p) for p in layer_params]
    wqkv = jnp.concatenate([p[0] for p in packed], axis=0).astype(jnp.bfloat16)  # (3L, H, H)
    wo = jnp.stack([p[1] for p in packed]).astype(jnp.bfloat16)                  # (L, H, H)
    w1 = jnp.stack([p[2] for p in packed]).astype(jnp.bfloat16)                  # (L, H, I)
    w2 = jnp.stack([p[3] for p in packed]).astype(jnp.bfloat16)                  # (L, I, H)
    vec = jnp.stack([p[4] for p in packed])                                      # (L, 16, 128) f32

    x_flat = hidden_states.reshape(B * S, H).astype(jnp.float32)

    # additive mask per key position, broadcast over queries and (padded) heads: (B*S, S, NHP)
    am = attention_mask.reshape(B, 1, S, 1).astype(jnp.float32)
    mask = jnp.broadcast_to(am, (B, S, S, NHP)).reshape(B * S, S, NHP)

    # constant 0/1 head-membership matrices (heads NH..NHP-1 are all-zero padding)
    cols = jnp.arange(H)[:, None]
    heads = jnp.arange(NHP)[None, :]
    sel = (cols // HD == heads).astype(jnp.float32)     # (H, NHP)
    selt = sel.T                                        # (NHP, H)

    out_flat = _encoder_forward(x_flat, mask, sel, selt, wqkv, wo, w1, w2, vec)
    return out_flat.reshape(B, S, H)


def init_layer_params(key):
    std = 0.02
    ks = jax.random.split(key, 6)
    wq = jax.random.normal(ks[0], (H, H), jnp.float32) * std
    wk = jax.random.normal(ks[1], (H, H), jnp.float32) * std
    wv = jax.random.normal(ks[2], (H, H), jnp.float32) * std
    wo = jax.random.normal(ks[3], (H, H), jnp.float32) * std
    w1 = jax.random.normal(ks[4], (H, I), jnp.float32) * std
    w2 = jax.random.normal(ks[5], (I, H), jnp.float32) * std
    zH = jnp.zeros((H,), jnp.float32)
    oH = jnp.ones((H,), jnp.float32)
    zI = jnp.zeros((I,), jnp.float32)
    return (wq, zH, wk, zH, wv, zH, wo, zH,   # Wq,bq,Wk,bk,Wv,bv,Wo,bo
            oH, zH,                           # attention LayerNorm gamma/beta
            w1, zI, w2, zH,                   # W1,b1,W2,b2
            oH, zH)                           # final LayerNorm gamma/beta


if __name__ == "__main__":
    key = jax.random.PRNGKey(0)
    keys = jax.random.split(key, L + 1)
    k_x, k_layers = keys[0], keys[1:]

    hidden_states = jax.random.normal(k_x, (B, S, H), jnp.float32)

    # Additive BERT mask: batch 0 attends to all tokens; batch 1 masks the last 2 positions.
    valid = jnp.ones((B, S), jnp.float32).at[1, -2:].set(0.0)
    attention_mask = (1.0 - valid)[:, None, None, :] * -10000.0     # (B, 1, 1, S)

    layer_params = [init_layer_params(k_layers[i]) for i in range(L)]

    out = transformer_encoders(hidden_states, attention_mask, layer_params)
    out = jax.block_until_ready(out)

    assert out.shape == (B, S, H)
    assert bool(jnp.all(jnp.isfinite(out)))
    print("KERNEL_OK")
</pallas_src>

<mosaic_0001>
module attributes {stable_mosaic.version = 11 : i64} {
  func.func @encoder_stack_kernel(%arg0: i32, %arg1: memref<16x32xf32, #tpu.memory_space<vmem>>, %arg2: memref<16x8x8xf32, #tpu.memory_space<vmem>>, %arg3: memref<32x8xf32, #tpu.memory_space<vmem>>, %arg4: memref<8x32xf32, #tpu.memory_space<vmem>>, %arg5: memref<6x32x32xbf16, #tpu.memory_space<vmem>>, %arg6: memref<2x32x32xbf16, #tpu.memory_space<vmem>>, %arg7: memref<2x32x64xbf16, #tpu.memory_space<vmem>>, %arg8: memref<2x64x32xbf16, #tpu.memory_space<vmem>>, %arg9: memref<2x16x128xf32, #tpu.memory_space<vmem>>, %arg10: memref<16x32xf32, #tpu.memory_space<vmem>>) attributes {dimension_semantics = [#tpu.dimension_semantics<arbitrary>], iteration_bounds = array<i64: 1>, scalar_prefetch = 0 : i64, scratch_operands = 0 : i64, tpu.core_type = #tpu.core_type<tc>, window_params = [{pipeline_mode = #tpu.pipeline_mode<synchronous>, transform_indices = @transform_0, window_bounds = array<i64: 16, 32>}, {pipeline_mode = #tpu.pipeline_mode<synchronous>, transform_indices = @transform_1, window_bounds = array<i64: 16, 8, 8>}, {pipeline_mode = #tpu.pipeline_mode<synchronous>, transform_indices = @transform_2, window_bounds = array<i64: 32, 8>}, {pipeline_mode = #tpu.pipeline_mode<synchronous>, transform_indices = @transform_3, window_bounds = array<i64: 8, 32>}, {pipeline_mode = #tpu.pipeline_mode<synchronous>, transform_indices = @transform_4, window_bounds = array<i64: 6, 32, 32>}, {pipeline_mode = #tpu.pipeline_mode<synchronous>, transform_indices = @transform_5, window_bounds = array<i64: 2, 32, 32>}, {pipeline_mode = #tpu.pipeline_mode<synchronous>, transform_indices = @transform_6, window_bounds = array<i64: 2, 32, 64>}, {pipeline_mode = #tpu.pipeline_mode<synchronous>, transform_indices = @transform_7, window_bounds = array<i64: 2, 64, 32>}, {pipeline_mode = #tpu.pipeline_mode<synchronous>, transform_indices = @transform_8, window_bounds = array<i64: 2, 16, 128>}, {pipeline_mode = #tpu.pipeline_mode<synchronous>, transform_indices = @transform_9, window_bounds = array<i64: 16, 32>}]} {
    %c0 = arith.constant 0 : index
    %c0_0 = arith.constant 0 : index
    %0 = vector.load %arg1[%c0, %c0_0] : memref<16x32xf32, #tpu.memory_space<vmem>>, vector<16x32xf32>
    %c0_1 = arith.constant 0 : index
    %c0_2 = arith.constant 0 : index
    %c0_3 = arith.constant 0 : index
    %1 = vector.load %arg2[%c0_1, %c0_2, %c0_3] : memref<16x8x8xf32, #tpu.memory_space<vmem>>, vector<16x8x8xf32>
    %c0_4 = arith.constant 0 : index
    %c0_5 = arith.constant 0 : index
    %2 = vector.load %arg3[%c0_4, %c0_5] : memref<32x8xf32, #tpu.memory_space<vmem>>, vector<32x8xf32>
    %c0_6 = arith.constant 0 : index
    %c0_7 = arith.constant 0 : index
    %3 = vector.load %arg4[%c0_6, %c0_7] : memref<8x32xf32, #tpu.memory_space<vmem>>, vector<8x32xf32>
    %c0_8 = arith.constant 0 : index
    %c0_9 = arith.constant 0 : index
    %c0_10 = arith.constant 0 : index
    %4 = vector.load %arg9[%c0_8, %c0_9, %c0_10] : memref<2x16x128xf32, #tpu.memory_space<vmem>>, vector<1x16x128xf32>
    %5 = vector.shape_cast %4 : vector<1x16x128xf32> to vector<16x128xf32>
    %6 = vector.extract_strided_slice %5 {offsets = [0, 0], sizes = [1, 32], strides = [1, 1]} : vector<16x128xf32> to vector<1x32xf32>
    %7 = vector.extract_strided_slice %5 {offsets = [1, 0], sizes = [1, 32], strides = [1, 1]} : vector<16x128xf32> to vector<1x32xf32>
    %8 = vector.extract_strided_slice %5 {offsets = [2, 0], sizes = [1, 32], strides = [1, 1]} : vector<16x128xf32> to vector<1x32xf32>
    %9 = vector.extract_strided_slice %5 {offsets = [3, 0], sizes = [1, 32], strides = [1, 1]} : vector<16x128xf32> to vector<1x32xf32>
    %10 = vector.extract_strided_slice %5 {offsets = [4, 0], sizes = [1, 32], strides = [1, 1]} : vector<16x128xf32> to vector<1x32xf32>
    %11 = vector.extract_strided_slice %5 {offsets = [5, 0], sizes = [1, 32], strides = [1, 1]} : vector<16x128xf32> to vector<1x32xf32>
    %12 = vector.extract_strided_slice %5 {offsets = [6, 0], sizes = [1, 64], strides = [1, 1]} : vector<16x128xf32> to vector<1x64xf32>
    %13 = vector.extract_strided_slice %5 {offsets = [7, 0], sizes = [1, 32], strides = [1, 1]} : vector<16x128xf32> to vector<1x32xf32>
    %14 = vector.extract_strided_slice %5 {offsets = [8, 0], sizes = [1, 32], strides = [1, 1]} : vector<16x128xf32> to vector<1x32xf32>
    %15 = vector.extract_strided_slice %5 {offsets = [9, 0], sizes = [1, 32], strides = [1, 1]} : vector<16x128xf32> to vector<1x32xf32>
    %16 = arith.truncf %0 : vector<16x32xf32> to vector<16x32xbf16>
    %c0_11 = arith.constant 0 : index
    %c0_12 = arith.constant 0 : index
    %c0_13 = arith.constant 0 : index
    %17 = vector.load %arg5[%c0_11, %c0_12, %c0_13] : memref<6x32x32xbf16, #tpu.memory_space<vmem>>, vector<1x32x32xbf16>
    %18 = vector.shape_cast %17 : vector<1x32x32xbf16> to vector<32x32xbf16>
    %cst = arith.constant dense<0.000000e+00> : vector<16x32xf32>
    %19 = tpu.matmul %16, %18, %cst {dimension_numbers = #tpu.dot_dimension_numbers<[1], [0], [0], [1], [0, 0, 1, 1], [], []>} : vector<16x32xbf16>, vector<32x32xbf16>, vector<16x32xf32> -> vector<16x32xf32>
    %20 = vector.broadcast %6 : vector<1x32xf32> to vector<16x32xf32>
    %21 = arith.addf %19, %20 : vector<16x32xf32>
    %c1 = arith.constant 1 : index
    %c0_14 = arith.constant 0 : index
    %c0_15 = arith.constant 0 : index
    %22 = vector.load %arg5[%c1, %c0_14, %c0_15] : memref<6x32x32xbf16, #tpu.memory_space<vmem>>, vector<1x32x32xbf16>
    %23 = vector.shape_cast %22 : vector<1x32x32xbf16> to vector<32x32xbf16>
    %cst_16 = arith.constant dense<0.000000e+00> : vector<16x32xf32>
    %24 = tpu.matmul %16, %23, %cst_16 {dimension_numbers = #tpu.dot_dimension_numbers<[1], [0], [0], [1], [0, 0, 1, 1], [], []>} : vector<16x32xbf16>, vector<32x32xbf16>, vector<16x32xf32> -> vector<16x32xf32>
    %25 = vector.broadcast %7 : vector<1x32xf32> to vector<16x32xf32>
    %26 = arith.addf %24, %25 : vector<16x32xf32>
    %c2 = arith.constant 2 : index
    %c0_17 = arith.constant 0 : index
    %c0_18 = arith.constant 0 : index
    %27 = vector.load %arg5[%c2, %c0_17, %c0_18] : memref<6x32x32xbf16, #tpu.memory_space<vmem>>, vector<1x32x32xbf16>
    %28 = vector.shape_cast %27 : vector<1x32x32xbf16> to vector<32x32xbf16>
    %cst_19 = arith.constant dense<0.000000e+00> : vector<16x32xf32>
    %29 = tpu.matmul %16, %28, %cst_19 {dimension_numbers = #tpu.dot_dimension_numbers<[1], [0], [0], [1], [0, 0, 1, 1], [], []>} : vector<16x32xbf16>, vector<32x32xbf16>, vector<16x32xf32> -> vector<16x32xf32>
    %30 = vector.broadcast %8 : vector<1x32xf32> to vector<16x32xf32>
    %31 = arith.addf %29, %30 : vector<16x32xf32>
    %32 = vector.shape_cast %21 : vector<16x32xf32> to vector<2x8x32xf32>
    %33 = vector.shape_cast %26 : vector<16x32xf32> to vector<2x8x32xf32>
    %34 = vector.shape_cast %31 : vector<16x32xf32> to vector<2x8x32xf32>
    %35 = vector.shape_cast %32 : vector<2x8x32xf32> to vector<2x8x1x32xf32>
    %36 = vector.shape_cast %33 : vector<2x8x32xf32> to vector<2x1x8x32xf32>
    %37 = vector.broadcast %35 : vector<2x8x1x32xf32> to vector<2x8x8x32xf32>
    %38 = vector.broadcast %36 : vector<2x1x8x32xf32> to vector<2x8x8x32xf32>
    %39 = arith.mulf %37, %38 : vector<2x8x8x32xf32>
    %40 = vector.shape_cast %39 : vector<2x8x8x32xf32> to vector<128x32xf32>
    %cst_20 = arith.constant dense<0.000000e+00> : vector<128x8xf32>
    %41 = tpu.matmul %40, %2, %cst_20 {dimension_numbers = #tpu.dot_dimension_numbers<[1], [0], [0], [1], [0, 0, 1, 1], [], []>} : vector<128x32xf32>, vector<32x8xf32>, vector<128x8xf32> -> vector<128x8xf32>
    %42 = vector.shape_cast %41 : vector<128x8xf32> to vector<16x8x8xf32>
    %43 = arith.addf %42, %1 : vector<16x8x8xf32>
    %44 = vector.extract_strided_slice %43 {offsets = [0, 0, 0], sizes = [16, 1, 8], strides = [1, 1, 1]} : vector<16x8x8xf32> to vector<16x1x8xf32>
    %45 = vector.extract_strided_slice %43 {offsets = [0, 1, 0], sizes = [16, 1, 8], strides = [1, 1, 1]} : vector<16x8x8xf32> to vector<16x1x8xf32>
    %46 = arith.maximumf %44, %45 : vector<16x1x8xf32>
    %47 = vector.extract_strided_slice %43 {offsets = [0, 2, 0], sizes = [16, 1, 8], strides = [1, 1, 1]} : vector<16x8x8xf32> to vector<16x1x8xf32>
    %48 = arith.maximumf %46, %47 : vector<16x1x8xf32>
    %49 = vector.extract_strided_slice %43 {offsets = [0, 3, 0], sizes = [16, 1, 8], strides = [1, 1, 1]} : vector<16x8x8xf32> to vector<16x1x8xf32>
    %50 = arith.maximumf %48, %49 : vector<16x1x8xf32>
    %51 = vector.extract_strided_slice %43 {offsets = [0, 4, 0], sizes = [16, 1, 8], strides = [1, 1, 1]} : vector<16x8x8xf32> to vector<16x1x8xf32>
    %52 = arith.maximumf %50, %51 : vector<16x1x8xf32>
    %53 = vector.extract_strided_slice %43 {offsets = [0, 5, 0], sizes = [16, 1, 8], strides = [1, 1, 1]} : vector<16x8x8xf32> to vector<16x1x8xf32>
    %54 = arith.maximumf %52, %53 : vector<16x1x8xf32>
    %55 = vector.extract_strided_slice %43 {offsets = [0, 6, 0], sizes = [16, 1, 8], strides = [1, 1, 1]} : vector<16x8x8xf32> to vector<16x1x8xf32>
    %56 = arith.maximumf %54, %55 : vector<16x1x8xf32>
    %57 = vector.extract_strided_slice %43 {offsets = [0, 7, 0], sizes = [16, 1, 8], strides = [1, 1, 1]} : vector<16x8x8xf32> to vector<16x1x8xf32>
    %58 = arith.maximumf %56, %57 : vector<16x1x8xf32>
    %59 = vector.broadcast %58 : vector<16x1x8xf32> to vector<16x8x8xf32>
    %60 = arith.subf %43, %59 : vector<16x8x8xf32>
    %61 = math.exp %60 : vector<16x8x8xf32>
    %62 = vector.extract_strided_slice %61 {offsets = [0, 0, 0], sizes = [16, 1, 8], strides = [1, 1, 1]} : vector<16x8x8xf32> to vector<16x1x8xf32>
    %63 = vector.extract_strided_slice %61 {offsets = [0, 1, 0], sizes = [16, 1, 8], strides = [1, 1, 1]} : vector<16x8x8xf32> to vector<16x1x8xf32>
    %64 = arith.addf %62, %63 : vector<16x1x8xf32>
    %65 = vector.extract_strided_slice %61 {offsets = [0, 2, 0], sizes = [16, 1, 8], strides = [1, 1, 1]} : vector<16x8x8xf32> to vector<16x1x8xf32>
    %66 = arith.addf %64, %65 : vector<16x1x8xf32>
    %67 = vector.extract_strided_slice %61 {offsets = [0, 3, 0], sizes = [16, 1, 8], strides = [1, 1, 1]} : vector<16x8x8xf32> to vector<16x1x8xf32>
    %68 = arith.addf %66, %67 : vector<16x1x8xf32>
    %69 = vector.extract_strided_slice %61 {offsets = [0, 4, 0], sizes = [16, 1, 8], strides = [1, 1, 1]} : vector<16x8x8xf32> to vector<16x1x8xf32>
    %70 = arith.addf %68, %69 : vector<16x1x8xf32>
    %71 = vector.extract_strided_slice %61 {offsets = [0, 5, 0], sizes = [16, 1, 8], strides = [1, 1, 1]} : vector<16x8x8xf32> to vector<16x1x8xf32>
    %72 = arith.addf %70, %71 : vector<16x1x8xf32>
    %73 = vector.extract_strided_slice %61 {offsets = [0, 6, 0], sizes = [16, 1, 8], strides = [1, 1, 1]} : vector<16x8x8xf32> to vector<16x1x8xf32>
    %74 = arith.addf %72, %73 : vector<16x1x8xf32>
    %75 = vector.extract_strided_slice %61 {offsets = [0, 7, 0], sizes = [16, 1, 8], strides = [1, 1, 1]} : vector<16x8x8xf32> to vector<16x1x8xf32>
    %76 = arith.addf %74, %75 : vector<16x1x8xf32>
    %77 = tpu.reciprocal %76 {approx = true} : vector<16x1x8xf32> -> vector<16x1x8xf32>
    %78 = vector.broadcast %77 : vector<16x1x8xf32> to vector<16x8x8xf32>
    %79 = arith.mulf %61, %78 : vector<16x8x8xf32>
    %80 = vector.shape_cast %79 : vector<16x8x8xf32> to vector<128x8xf32>
    %cst_21 = arith.constant dense<0.000000e+00> : vector<128x32xf32>
    %81 = tpu.matmul %80, %3, %cst_21 {dimension_numbers = #tpu.dot_dimension_numbers<[1], [0], [0], [1], [0, 0, 1, 1], [], []>} : vector<128x8xf32>, vector<8x32xf32>, vector<128x32xf32> -> vector<128x32xf32>
    %82 = vector.shape_cast %81 : vector<128x32xf32> to vector<2x8x8x32xf32>
    %83 = vector.shape_cast %34 : vector<2x8x32xf32> to vector<2x1x8x32xf32>
    %84 = vector.broadcast %83 : vector<2x1x8x32xf32> to vector<2x8x8x32xf32>
    %85 = arith.mulf %82, %84 : vector<2x8x8x32xf32>
    %86 = vector.extract_strided_slice %85 {offsets = [0, 0, 0, 0], sizes = [2, 8, 1, 32], strides = [1, 1, 1, 1]} : vector<2x8x8x32xf32> to vector<2x8x1x32xf32>
    %87 = vector.extract_strided_slice %85 {offsets = [0, 0, 1, 0], sizes = [2, 8, 1, 32], strides = [1, 1, 1, 1]} : vector<2x8x8x32xf32> to vector<2x8x1x32xf32>
    %88 = arith.addf %86, %87 : vector<2x8x1x32xf32>
    %89 = vector.extract_strided_slice %85 {offsets = [0, 0, 2, 0], sizes = [2, 8, 1, 32], strides = [1, 1, 1, 1]} : vector<2x8x8x32xf32> to vector<2x8x1x32xf32>
    %90 = arith.addf %88, %89 : vector<2x8x1x32xf32>
    %91 = vector.extract_strided_slice %85 {offsets = [0, 0, 3, 0], sizes = [2, 8, 1, 32], strides = [1, 1, 1, 1]} : vector<2x8x8x32xf32> to vector<2x8x1x32xf32>
    %92 = arith.addf %90, %91 : vector<2x8x1x32xf32>
    %93 = vector.extract_strided_slice %85 {offsets = [0, 0, 4, 0], sizes = [2, 8, 1, 32], strides = [1, 1, 1, 1]} : vector<2x8x8x32xf32> to vector<2x8x1x32xf32>
    %94 = arith.addf %92, %93 : vector<2x8x1x32xf32>
    %95 = vector.extract_strided_slice %85 {offsets = [0, 0, 5, 0], sizes = [2, 8, 1, 32], strides = [1, 1, 1, 1]} : vector<2x8x8x32xf32> to vector<2x8x1x32xf32>
    %96 = arith.addf %94, %95 : vector<2x8x1x32xf32>
    %97 = vector.extract_strided_slice %85 {offsets = [0, 0, 6, 0], sizes = [2, 8, 1, 32], strides = [1, 1, 1, 1]} : vector<2x8x8x32xf32> to vector<2x8x1x32xf32>
    %98 = arith.addf %96, %97 : vector<2x8x1x32xf32>
    %99 = vector.extract_strided_slice %85 {offsets = [0, 0, 7, 0], sizes = [2, 8, 1, 32], strides = [1, 1, 1, 1]} : vector<2x8x8x32xf32> to vector<2x8x1x32xf32>
    %100 = arith.addf %98, %99 : vector<2x8x1x32xf32>
    %101 = vector.shape_cast %100 : vector<2x8x1x32xf32> to vector<16x32xf32>
    %102 = arith.truncf %101 : vector<16x32xf32> to vector<16x32xbf16>
    %c0_22 = arith.constant 0 : index
    %c0_23 = arith.constant 0 : index
    %c0_24 = arith.constant 0 : index
    %103 = vector.load %arg6[%c0_22, %c0_23, %c0_24] : memref<2x32x32xbf16, #tpu.memory_space<vmem>>, vector<1x32x32xbf16>
    %104 = vector.shape_cast %103 : vector<1x32x32xbf16> to vector<32x32xbf16>
    %cst_25 = arith.constant dense<0.000000e+00> : vector<16x32xf32>
    %105 = tpu.matmul %102, %104, %cst_25 {dimension_numbers = #tpu.dot_dimension_numbers<[1], [0], [0], [1], [0, 0, 1, 1], [], []>} : vector<16x32xbf16>, vector<32x32xbf16>, vector<16x32xf32> -> vector<16x32xf32>
    %106 = vector.broadcast %9 : vector<1x32xf32> to vector<16x32xf32>
    %107 = arith.addf %105, %106 : vector<16x32xf32>
    %108 = arith.addf %107, %0 : vector<16x32xf32>
    %cst_26 = arith.constant dense<0.000000e+00> : vector<16xf32>
    %109 = vector.multi_reduction <add>, %108, %cst_26 [1] : vector<16x32xf32> to vector<16xf32>
    %110 = vector.shape_cast %109 : vector<16xf32> to vector<16x1xf32>
    %cst_27 = arith.constant 3.200000e+01 : f32
    %111 = vector.broadcast %cst_27 : f32 to vector<16x1xf32>
    %112 = arith.divf %110, %111 : vector<16x1xf32>
    %113 = vector.broadcast %112 : vector<16x1xf32> to vector<16x32xf32>
    %114 = arith.subf %108, %113 : vector<16x32xf32>
    %115 = arith.mulf %114, %114 : vector<16x32xf32>
    %cst_28 = arith.constant dense<0.000000e+00> : vector<16xf32>
    %116 = vector.multi_reduction <add>, %115, %cst_28 [1] : vector<16x32xf32> to vector<16xf32>
    %117 = vector.shape_cast %116 : vector<16xf32> to vector<16x1xf32>
    %cst_29 = arith.constant 3.200000e+01 : f32
    %118 = vector.broadcast %cst_29 : f32 to vector<16x1xf32>
    %119 = arith.divf %117, %118 : vector<16x1xf32>
    %cst_30 = arith.constant 9.99999996E-13 : f32
    %120 = vector.broadcast %cst_30 : f32 to vector<16x1xf32>
    %121 = arith.addf %119, %120 : vector<16x1xf32>
    %122 = math.rsqrt %121 : vector<16x1xf32>
    %123 = vector.broadcast %122 : vector<16x1xf32> to vector<16x32xf32>
    %124 = arith.mulf %114, %123 : vector<16x32xf32>
    %125 = vector.broadcast %10 : vector<1x32xf32> to vector<16x32xf32>
    %126 = arith.mulf %124, %125 : vector<16x32xf32>
    %127 = vector.broadcast %11 : vector<1x32xf32> to vector<16x32xf32>
    %128 = arith.addf %126, %127 : vector<16x32xf32>
    %129 = arith.truncf %128 : vector<16x32xf32> to vector<16x32xbf16>
    %c0_31 = arith.constant 0 : index
    %c0_32 = arith.constant 0 : index
    %c0_33 = arith.constant 0 : index
    %130 = vector.load %arg7[%c0_31, %c0_32, %c0_33] : memref<2x32x64xbf16, #tpu.memory_space<vmem>>, vector<1x32x64xbf16>
    %131 = vector.shape_cast %130 : vector<1x32x64xbf16> to vector<32x64xbf16>
    %cst_34 = arith.constant dense<0.000000e+00> : vector<16x64xf32>
    %132 = tpu.matmul %129, %131, %cst_34 {dimension_numbers = #tpu.dot_dimension_numbers<[1], [0], [0], [1], [0, 0, 1, 1], [], []>} : vector<16x32xbf16>, vector<32x64xbf16>, vector<16x64xf32> -> vector<16x64xf32>
    %133 = vector.broadcast %12 : vector<1x64xf32> to vector<16x64xf32>
    %134 = arith.addf %132, %133 : vector<16x64xf32>
    %cst_35 = arith.constant 0.707106769 : f32
    %135 = vector.broadcast %cst_35 : f32 to vector<16x64xf32>
    %136 = arith.mulf %134, %135 : vector<16x64xf32>
    %137 = math.absf %136 : vector<16x64xf32>
    %cst_36 = arith.constant 0.327591091 : f32
    %138 = vector.broadcast %cst_36 : f32 to vector<16x64xf32>
    %139 = arith.mulf %138, %137 : vector<16x64xf32>
    %cst_37 = arith.constant 1.000000e+00 : f32
    %140 = vector.broadcast %cst_37 : f32 to vector<16x64xf32>
    %141 = arith.addf %140, %139 : vector<16x64xf32>
    %142 = tpu.reciprocal %141 {approx = true} : vector<16x64xf32> -> vector<16x64xf32>
    %143 = arith.mulf %141, %142 : vector<16x64xf32>
    %cst_38 = arith.constant 2.000000e+00 : f32
    %144 = vector.broadcast %cst_38 : f32 to vector<16x64xf32>
    %145 = arith.subf %144, %143 : vector<16x64xf32>
    %146 = arith.mulf %142, %145 : vector<16x64xf32>
    %cst_39 = arith.constant 1.06140542 : f32
    %147 = vector.broadcast %cst_39 : f32 to vector<16x64xf32>
    %148 = arith.mulf %146, %147 : vector<16x64xf32>
    %cst_40 = arith.constant -1.45315206 : f32
    %149 = vector.broadcast %cst_40 : f32 to vector<16x64xf32>
    %150 = arith.addf %149, %148 : vector<16x64xf32>
    %151 = arith.mulf %146, %150 : vector<16x64xf32>
    %cst_41 = arith.constant 1.42141378 : f32
    %152 = vector.broadcast %cst_41 : f32 to vector<16x64xf32>
    %153 = arith.addf %152, %151 : vector<16x64xf32>
    %154 = arith.mulf %146, %153 : vector<16x64xf32>
    %cst_42 = arith.constant -0.284496725 : f32
    %155 = vector.broadcast %cst_42 : f32 to vector<16x64xf32>
    %156 = arith.addf %155, %154 : vector<16x64xf32>
    %157 = arith.mulf %146, %156 : vector<16x64xf32>
    %cst_43 = arith.constant 0.254829586 : f32
    %158 = vector.broadcast %cst_43 : f32 to vector<16x64xf32>
    %159 = arith.addf %158, %157 : vector<16x64xf32>
    %160 = arith.mulf %146, %159 : vector<16x64xf32>
    %cst_44 = arith.constant 0.000000e+00 : f32
    %161 = vector.broadcast %cst_44 : f32 to vector<16x64xf32>
    %162 = arith.subf %161, %137 : vector<16x64xf32>
    %163 = arith.mulf %162, %137 : vector<16x64xf32>
    %164 = math.exp %163 : vector<16x64xf32>
    %165 = arith.mulf %160, %164 : vector<16x64xf32>
    %cst_45 = arith.constant 1.000000e+00 : f32
    %166 = vector.broadcast %cst_45 : f32 to vector<16x64xf32>
    %167 = arith.subf %166, %165 : vector<16x64xf32>
    %cst_46 = arith.constant 0.000000e+00 : f32
    %168 = vector.broadcast %cst_46 : f32 to vector<16x64xf32>
    %169 = arith.cmpf oge, %136, %168 : vector<16x64xf32>
    %cst_47 = arith.constant 0.000000e+00 : f32
    %170 = vector.broadcast %cst_47 : f32 to vector<16x64xf32>
    %171 = arith.subf %170, %167 : vector<16x64xf32>
    %172 = arith.select %169, %167, %171 : vector<16x64xi1>, vector<16x64xf32>
    %cst_48 = arith.constant 5.000000e-01 : f32
    %173 = vector.broadcast %cst_48 : f32 to vector<16x64xf32>
    %174 = arith.mulf %173, %134 : vector<16x64xf32>
    %cst_49 = arith.constant 1.000000e+00 : f32
    %175 = vector.broadcast %cst_49 : f32 to vector<16x64xf32>
    %176 = arith.addf %175, %172 : vector<16x64xf32>
    %177 = arith.mulf %174, %176 : vector<16x64xf32>
    %178 = arith.truncf %177 : vector<16x64xf32> to vector<16x64xbf16>
    %c0_50 = arith.constant 0 : index
    %c0_51 = arith.constant 0 : index
    %c0_52 = arith.constant 0 : index
    %179 = vector.load %arg8[%c0_50, %c0_51, %c0_52] : memref<2x64x32xbf16, #tpu.memory_space<vmem>>, vector<1x64x32xbf16>
    %180 = vector.shape_cast %179 : vector<1x64x32xbf16> to vector<64x32xbf16>
    %cst_53 = arith.constant dense<0.000000e+00> : vector<16x32xf32>
    %181 = tpu.matmul %178, %180, %cst_53 {dimension_numbers = #tpu.dot_dimension_numbers<[1], [0], [0], [1], [0, 0, 1, 1], [], []>} : vector<16x64xbf16>, vector<64x32xbf16>, vector<16x32xf32> -> vector<16x32xf32>
    %182 = vector.broadcast %13 : vector<1x32xf32> to vector<16x32xf32>
    %183 = arith.addf %181, %182 : vector<16x32xf32>
    %184 = arith.addf %128, %183 : vector<16x32xf32>
    %cst_54 = arith.constant dense<0.000000e+00> : vector<16xf32>
    %185 = vector.multi_reduction <add>, %184, %cst_54 [1] : vector<16x32xf32> to vector<16xf32>
    %186 = vector.shape_cast %185 : vector<16xf32> to vector<16x1xf32>
    %cst_55 = arith.constant 3.200000e+01 : f32
    %187 = vector.broadcast %cst_55 : f32 to vector<16x1xf32>
    %188 = arith.divf %186, %187 : vector<16x1xf32>
    %189 = vector.broadcast %188 : vector<16x1xf32> to vector<16x32xf32>
    %190 = arith.subf %184, %189 : vector<16x32xf32>
    %191 = arith.mulf %190, %190 : vector<16x32xf32>
    %cst_56 = arith.constant dense<0.000000e+00> : vector<16xf32>
    %192 = vector.multi_reduction <add>, %191, %cst_56 [1] : vector<16x32xf32> to vector<16xf32>
    %193 = vector.shape_cast %192 : vector<16xf32> to vector<16x1xf32>
    %cst_57 = arith.constant 3.200000e+01 : f32
    %194 = vector.broadcast %cst_57 : f32 to vector<16x1xf32>
    %195 = arith.divf %193, %194 : vector<16x1xf32>
    %cst_58 = arith.constant 9.99999996E-13 : f32
    %196 = vector.broadcast %cst_58 : f32 to vector<16x1xf32>
    %197 = arith.addf %195, %196 : vector<16x1xf32>
    %198 = math.rsqrt %197 : vector<16x1xf32>
    %199 = vector.broadcast %198 : vector<16x1xf32> to vector<16x32xf32>
    %200 = arith.mulf %190, %199 : vector<16x32xf32>
    %201 = vector.broadcast %14 : vector<1x32xf32> to vector<16x32xf32>
    %202 = arith.mulf %200, %201 : vector<16x32xf32>
    %203 = vector.broadcast %15 : vector<1x32xf32> to vector<16x32xf32>
    %204 = arith.addf %202, %203 : vector<16x32xf32>
    %c1_59 = arith.constant 1 : index
    %c0_60 = arith.constant 0 : index
    %c0_61 = arith.constant 0 : index
    %205 = vector.load %arg9[%c1_59, %c0_60, %c0_61] : memref<2x16x128xf32, #tpu.memory_space<vmem>>, vector<1x16x128xf32>
    %206 = vector.shape_cast %205 : vector<1x16x128xf32> to vector<16x128xf32>
    %207 = vector.extract_strided_slice %206 {offsets = [0, 0], sizes = [1, 32], strides = [1, 1]} : vector<16x128xf32> to vector<1x32xf32>
    %208 = vector.extract_strided_slice %206 {offsets = [1, 0], sizes = [1, 32], strides = [1, 1]} : vector<16x128xf32> to vector<1x32xf32>
    %209 = vector.extract_strided_slice %206 {offsets = [2, 0], sizes = [1, 32], strides = [1, 1]} : vector<16x128xf32> to vector<1x32xf32>
    %210 = vector.extract_strided_slice %206 {offsets = [3, 0], sizes = [1, 32], strides = [1, 1]} : vector<16x128xf32> to vector<1x32xf32>
    %211 = vector.extract_strided_slice %206 {offsets = [4, 0], sizes = [1, 32], strides = [1, 1]} : vector<16x128xf32> to vector<1x32xf32>
    %212 = vector.extract_strided_slice %206 {offsets = [5, 0], sizes = [1, 32], strides = [1, 1]} : vector<16x128xf32> to vector<1x32xf32>
    %213 = vector.extract_strided_slice %206 {offsets = [6, 0], sizes = [1, 64], strides = [1, 1]} : vector<16x128xf32> to vector<1x64xf32>
    %214 = vector.extract_strided_slice %206 {offsets = [7, 0], sizes = [1, 32], strides = [1, 1]} : vector<16x128xf32> to vector<1x32xf32>
    %215 = vector.extract_strided_slice %206 {offsets = [8, 0], sizes = [1, 32], strides = [1, 1]} : vector<16x128xf32> to vector<1x32xf32>
    %216 = vector.extract_strided_slice %206 {offsets = [9, 0], sizes = [1, 32], strides = [1, 1]} : vector<16x128xf32> to vector<1x32xf32>
    %217 = arith.truncf %204 : vector<16x32xf32> to vector<16x32xbf16>
    %c3 = arith.constant 3 : index
    %c0_62 = arith.constant 0 : index
    %c0_63 = arith.constant 0 : index
    %218 = vector.load %arg5[%c3, %c0_62, %c0_63] : memref<6x32x32xbf16, #tpu.memory_space<vmem>>, vector<1x32x32xbf16>
    %219 = vector.shape_cast %218 : vector<1x32x32xbf16> to vector<32x32xbf16>
    %cst_64 = arith.constant dense<0.000000e+00> : vector<16x32xf32>
    %220 = tpu.matmul %217, %219, %cst_64 {dimension_numbers = #tpu.dot_dimension_numbers<[1], [0], [0], [1], [0, 0, 1, 1], [], []>} : vector<16x32xbf16>, vector<32x32xbf16>, vector<16x32xf32> -> vector<16x32xf32>
    %221 = vector.broadcast %207 : vector<1x32xf32> to vector<16x32xf32>
    %222 = arith.addf %220, %221 : vector<16x32xf32>
    %c4 = arith.constant 4 : index
    %c0_65 = arith.constant 0 : index
    %c0_66 = arith.constant 0 : index
    %223 = vector.load %arg5[%c4, %c0_65, %c0_66] : memref<6x32x32xbf16, #tpu.memory_space<vmem>>, vector<1x32x32xbf16>
    %224 = vector.shape_cast %223 : vector<1x32x32xbf16> to vector<32x32xbf16>
    %cst_67 = arith.constant dense<0.000000e+00> : vector<16x32xf32>
    %225 = tpu.matmul %217, %224, %cst_67 {dimension_numbers = #tpu.dot_dimension_numbers<[1], [0], [0], [1], [0, 0, 1, 1], [], []>} : vector<16x32xbf16>, vector<32x32xbf16>, vector<16x32xf32> -> vector<16x32xf32>
    %226 = vector.broadcast %208 : vector<1x32xf32> to vector<16x32xf32>
    %227 = arith.addf %225, %226 : vector<16x32xf32>
    %c5 = arith.constant 5 : index
    %c0_68 = arith.constant 0 : index
    %c0_69 = arith.constant 0 : index
    %228 = vector.load %arg5[%c5, %c0_68, %c0_69] : memref<6x32x32xbf16, #tpu.memory_space<vmem>>, vector<1x32x32xbf16>
    %229 = vector.shape_cast %228 : vector<1x32x32xbf16> to vector<32x32xbf16>
    %cst_70 = arith.constant dense<0.000000e+00> : vector<16x32xf32>
    %230 = tpu.matmul %217, %229, %cst_70 {dimension_numbers = #tpu.dot_dimension_numbers<[1], [0], [0], [1], [0, 0, 1, 1], [], []>} : vector<16x32xbf16>, vector<32x32xbf16>, vector<16x32xf32> -> vector<16x32xf32>
    %231 = vector.broadcast %209 : vector<1x32xf32> to vector<16x32xf32>
    %232 = arith.addf %230, %231 : vector<16x32xf32>
    %233 = vector.shape_cast %222 : vector<16x32xf32> to vector<2x8x32xf32>
    %234 = vector.shape_cast %227 : vector<16x32xf32> to vector<2x8x32xf32>
    %235 = vector.shape_cast %232 : vector<16x32xf32> to vector<2x8x32xf32>
    %236 = vector.shape_cast %233 : vector<2x8x32xf32> to vector<2x8x1x32xf32>
    %237 = vector.shape_cast %234 : vector<2x8x32xf32> to vector<2x1x8x32xf32>
    %238 = vector.broadcast %236 : vector<2x8x1x32xf32> to vector<2x8x8x32xf32>
    %239 = vector.broadcast %237 : vector<2x1x8x32xf32> to vector<2x8x8x32xf32>
    %240 = arith.mulf %238, %239 : vector<2x8x8x32xf32>
    %241 = vector.shape_cast %240 : vector<2x8x8x32xf32> to vector<128x32xf32>
    %cst_71 = arith.constant dense<0.000000e+00> : vector<128x8xf32>
    %242 = tpu.matmul %241, %2, %cst_71 {dimension_numbers = #tpu.dot_dimension_numbers<[1], [0], [0], [1], [0, 0, 1, 1], [], []>} : vector<128x32xf32>, vector<32x8xf32>, vector<128x8xf32> -> vector<128x8xf32>
    %243 = vector.shape_cast %242 : vector<128x8xf32> to vector<16x8x8xf32>
    %244 = arith.addf %243, %1 : vector<16x8x8xf32>
    %245 = vector.extract_strided_slice %244 {offsets = [0, 0, 0], sizes = [16, 1, 8], strides = [1, 1, 1]} : vector<16x8x8xf32> to vector<16x1x8xf32>
    %246 = vector.extract_strided_slice %244 {offsets = [0, 1, 0], sizes = [16, 1, 8], strides = [1, 1, 1]} : vector<16x8x8xf32> to vector<16x1x8xf32>
    %247 = arith.maximumf %245, %246 : vector<16x1x8xf32>
    %248 = vector.extract_strided_slice %244 {offsets = [0, 2, 0], sizes = [16, 1, 8], strides = [1, 1, 1]} : vector<16x8x8xf32> to vector<16x1x8xf32>
    %249 = arith.maximumf %247, %248 : vector<16x1x8xf32>
    %250 = vector.extract_strided_slice %244 {offsets = [0, 3, 0], sizes = [16, 1, 8], strides = [1, 1, 1]} : vector<16x8x8xf32> to vector<16x1x8xf32>
    %251 = arith.maximumf %249, %250 : vector<16x1x8xf32>
    %252 = vector.extract_strided_slice %244 {offsets = [0, 4, 0], sizes = [16, 1, 8], strides = [1, 1, 1]} : vector<16x8x8xf32> to vector<16x1x8xf32>
    %253 = arith.maximumf %251, %252 : vector<16x1x8xf32>
    %254 = vector.extract_strided_slice %244 {offsets = [0, 5, 0], sizes = [16, 1, 8], strides = [1, 1, 1]} : vector<16x8x8xf32> to vector<16x1x8xf32>
    %255 = arith.maximumf %253, %254 : vector<16x1x8xf32>
    %256 = vector.extract_strided_slice %244 {offsets = [0, 6, 0], sizes = [16, 1, 8], strides = [1, 1, 1]} : vector<16x8x8xf32> to vector<16x1x8xf32>
    %257 = arith.maximumf %255, %256 : vector<16x1x8xf32>
    %258 = vector.extract_strided_slice %244 {offsets = [0, 7, 0], sizes = [16, 1, 8], strides = [1, 1, 1]} : vector<16x8x8xf32> to vector<16x1x8xf32>
    %259 = arith.maximumf %257, %258 : vector<16x1x8xf32>
    %260 = vector.broadcast %259 : vector<16x1x8xf32> to vector<16x8x8xf32>
    %261 = arith.subf %244, %260 : vector<16x8x8xf32>
    %262 = math.exp %261 : vector<16x8x8xf32>
    %263 = vector.extract_strided_slice %262 {offsets = [0, 0, 0], sizes = [16, 1, 8], strides = [1, 1, 1]} : vector<16x8x8xf32> to vector<16x1x8xf32>
    %264 = vector.extract_strided_slice %262 {offsets = [0, 1, 0], sizes = [16, 1, 8], strides = [1, 1, 1]} : vector<16x8x8xf32> to vector<16x1x8xf32>
    %265 = arith.addf %263, %264 : vector<16x1x8xf32>
    %266 = vector.extract_strided_slice %262 {offsets = [0, 2, 0], sizes = [16, 1, 8], strides = [1, 1, 1]} : vector<16x8x8xf32> to vector<16x1x8xf32>
    %267 = arith.addf %265, %266 : vector<16x1x8xf32>
    %268 = vector.extract_strided_slice %262 {offsets = [0, 3, 0], sizes = [16, 1, 8], strides = [1, 1, 1]} : vector<16x8x8xf32> to vector<16x1x8xf32>
    %269 = arith.addf %267, %268 : vector<16x1x8xf32>
    %270 = vector.extract_strided_slice %262 {offsets = [0, 4, 0], sizes = [16, 1, 8], strides = [1, 1, 1]} : vector<16x8x8xf32> to vector<16x1x8xf32>
    %271 = arith.addf %269, %270 : vector<16x1x8xf32>
    %272 = vector.extract_strided_slice %262 {offsets = [0, 5, 0], sizes = [16, 1, 8], strides = [1, 1, 1]} : vector<16x8x8xf32> to vector<16x1x8xf32>
    %273 = arith.addf %271, %272 : vector<16x1x8xf32>
    %274 = vector.extract_strided_slice %262 {offsets = [0, 6, 0], sizes = [16, 1, 8], strides = [1, 1, 1]} : vector<16x8x8xf32> to vector<16x1x8xf32>
    %275 = arith.addf %273, %274 : vector<16x1x8xf32>
    %276 = vector.extract_strided_slice %262 {offsets = [0, 7, 0], sizes = [16, 1, 8], strides = [1, 1, 1]} : vector<16x8x8xf32> to vector<16x1x8xf32>
    %277 = arith.addf %275, %276 : vector<16x1x8xf32>
    %278 = tpu.reciprocal %277 {approx = true} : vector<16x1x8xf32> -> vector<16x1x8xf32>
    %279 = vector.broadcast %278 : vector<16x1x8xf32> to vector<16x8x8xf32>
    %280 = arith.mulf %262, %279 : vector<16x8x8xf32>
    %281 = vector.shape_cast %280 : vector<16x8x8xf32> to vector<128x8xf32>
    %cst_72 = arith.constant dense<0.000000e+00> : vector<128x32xf32>
    %282 = tpu.matmul %281, %3, %cst_72 {dimension_numbers = #tpu.dot_dimension_numbers<[1], [0], [0], [1], [0, 0, 1, 1], [], []>} : vector<128x8xf32>, vector<8x32xf32>, vector<128x32xf32> -> vector<128x32xf32>
    %283 = vector.shape_cast %282 : vector<128x32xf32> to vector<2x8x8x32xf32>
    %284 = vector.shape_cast %235 : vector<2x8x32xf32> to vector<2x1x8x32xf32>
    %285 = vector.broadcast %284 : vector<2x1x8x32xf32> to vector<2x8x8x32xf32>
    %286 = arith.mulf %283, %285 : vector<2x8x8x32xf32>
    %287 = vector.extract_strided_slice %286 {offsets = [0, 0, 0, 0], sizes = [2, 8, 1, 32], strides = [1, 1, 1, 1]} : vector<2x8x8x32xf32> to vector<2x8x1x32xf32>
    %288 = vector.extract_strided_slice %286 {offsets = [0, 0, 1, 0], sizes = [2, 8, 1, 32], strides = [1, 1, 1, 1]} : vector<2x8x8x32xf32> to vector<2x8x1x32xf32>
    %289 = arith.addf %287, %288 : vector<2x8x1x32xf32>
    %290 = vector.extract_strided_slice %286 {offsets = [0, 0, 2, 0], sizes = [2, 8, 1, 32], strides = [1, 1, 1, 1]} : vector<2x8x8x32xf32> to vector<2x8x1x32xf32>
    %291 = arith.addf %289, %290 : vector<2x8x1x32xf32>
    %292 = vector.extract_strided_slice %286 {offsets = [0, 0, 3, 0], sizes = [2, 8, 1, 32], strides = [1, 1, 1, 1]} : vector<2x8x8x32xf32> to vector<2x8x1x32xf32>
    %293 = arith.addf %291, %292 : vector<2x8x1x32xf32>
    %294 = vector.extract_strided_slice %286 {offsets = [0, 0, 4, 0], sizes = [2, 8, 1, 32], strides = [1, 1, 1, 1]} : vector<2x8x8x32xf32> to vector<2x8x1x32xf32>
    %295 = arith.addf %293, %294 : vector<2x8x1x32xf32>
    %296 = vector.extract_strided_slice %286 {offsets = [0, 0, 5, 0], sizes = [2, 8, 1, 32], strides = [1, 1, 1, 1]} : vector<2x8x8x32xf32> to vector<2x8x1x32xf32>
    %297 = arith.addf %295, %296 : vector<2x8x1x32xf32>
    %298 = vector.extract_strided_slice %286 {offsets = [0, 0, 6, 0], sizes = [2, 8, 1, 32], strides = [1, 1, 1, 1]} : vector<2x8x8x32xf32> to vector<2x8x1x32xf32>
    %299 = arith.addf %297, %298 : vector<2x8x1x32xf32>
    %300 = vector.extract_strided_slice %286 {offsets = [0, 0, 7, 0], sizes = [2, 8, 1, 32], strides = [1, 1, 1, 1]} : vector<2x8x8x32xf32> to vector<2x8x1x32xf32>
    %301 = arith.addf %299, %300 : vector<2x8x1x32xf32>
    %302 = vector.shape_cast %301 : vector<2x8x1x32xf32> to vector<16x32xf32>
    %303 = arith.truncf %302 : vector<16x32xf32> to vector<16x32xbf16>
    %c1_73 = arith.constant 1 : index
    %c0_74 = arith.constant 0 : index
    %c0_75 = arith.constant 0 : index
    %304 = vector.load %arg6[%c1_73, %c0_74, %c0_75] : memref<2x32x32xbf16, #tpu.memory_space<vmem>>, vector<1x32x32xbf16>
    %305 = vector.shape_cast %304 : vector<1x32x32xbf16> to vector<32x32xbf16>
    %cst_76 = arith.constant dense<0.000000e+00> : vector<16x32xf32>
    %306 = tpu.matmul %303, %305, %cst_76 {dimension_numbers = #tpu.dot_dimension_numbers<[1], [0], [0], [1], [0, 0, 1, 1], [], []>} : vector<16x32xbf16>, vector<32x32xbf16>, vector<16x32xf32> -> vector<16x32xf32>
    %307 = vector.broadcast %210 : vector<1x32xf32> to vector<16x32xf32>
    %308 = arith.addf %306, %307 : vector<16x32xf32>
    %309 = arith.addf %308, %204 : vector<16x32xf32>
    %cst_77 = arith.constant dense<0.000000e+00> : vector<16xf32>
    %310 = vector.multi_reduction <add>, %309, %cst_77 [1] : vector<16x32xf32> to vector<16xf32>
    %311 = vector.shape_cast %310 : vector<16xf32> to vector<16x1xf32>
    %cst_78 = arith.constant 3.200000e+01 : f32
    %312 = vector.broadcast %cst_78 : f32 to vector<16x1xf32>
    %313 = arith.divf %311, %312 : vector<16x1xf32>
    %314 = vector.broadcast %313 : vector<16x1xf32> to vector<16x32xf32>
    %315 = arith.subf %309, %314 : vector<16x32xf32>
    %316 = arith.mulf %315, %315 : vector<16x32xf32>
    %cst_79 = arith.constant dense<0.000000e+00> : vector<16xf32>
    %317 = vector.multi_reduction <add>, %316, %cst_79 [1] : vector<16x32xf32> to vector<16xf32>
    %318 = vector.shape_cast %317 : vector<16xf32> to vector<16x1xf32>
    %cst_80 = arith.constant 3.200000e+01 : f32
    %319 = vector.broadcast %cst_80 : f32 to vector<16x1xf32>
    %320 = arith.divf %318, %319 : vector<16x1xf32>
    %cst_81 = arith.constant 9.99999996E-13 : f32
    %321 = vector.broadcast %cst_81 : f32 to vector<16x1xf32>
    %322 = arith.addf %320, %321 : vector<16x1xf32>
    %323 = math.rsqrt %322 : vector<16x1xf32>
    %324 = vector.broadcast %323 : vector<16x1xf32> to vector<16x32xf32>
    %325 = arith.mulf %315, %324 : vector<16x32xf32>
    %326 = vector.broadcast %211 : vector<1x32xf32> to vector<16x32xf32>
    %327 = arith.mulf %325, %326 : vector<16x32xf32>
    %328 = vector.broadcast %212 : vector<1x32xf32> to vector<16x32xf32>
    %329 = arith.addf %327, %328 : vector<16x32xf32>
    %330 = arith.truncf %329 : vector<16x32xf32> to vector<16x32xbf16>
    %c1_82 = arith.constant 1 : index
    %c0_83 = arith.constant 0 : index
    %c0_84 = arith.constant 0 : index
    %331 = vector.load %arg7[%c1_82, %c0_83, %c0_84] : memref<2x32x64xbf16, #tpu.memory_space<vmem>>, vector<1x32x64xbf16>
    %332 = vector.shape_cast %331 : vector<1x32x64xbf16> to vector<32x64xbf16>
    %cst_85 = arith.constant dense<0.000000e+00> : vector<16x64xf32>
    %333 = tpu.matmul %330, %332, %cst_85 {dimension_numbers = #tpu.dot_dimension_numbers<[1], [0], [0], [1], [0, 0, 1, 1], [], []>} : vector<16x32xbf16>, vector<32x64xbf16>, vector<16x64xf32> -> vector<16x64xf32>
    %334 = vector.broadcast %213 : vector<1x64xf32> to vector<16x64xf32>
    %335 = arith.addf %333, %334 : vector<16x64xf32>
    %cst_86 = arith.constant 0.707106769 : f32
    %336 = vector.broadcast %cst_86 : f32 to vector<16x64xf32>
    %337 = arith.mulf %335, %336 : vector<16x64xf32>
    %338 = math.absf %337 : vector<16x64xf32>
    %cst_87 = arith.constant 0.327591091 : f32
    %339 = vector.broadcast %cst_87 : f32 to vector<16x64xf32>
    %340 = arith.mulf %339, %338 : vector<16x64xf32>
    %cst_88 = arith.constant 1.000000e+00 : f32
    %341 = vector.broadcast %cst_88 : f32 to vector<16x64xf32>
    %342 = arith.addf %341, %340 : vector<16x64xf32>
    %343 = tpu.reciprocal %342 {approx = true} : vector<16x64xf32> -> vector<16x64xf32>
    %344 = arith.mulf %342, %343 : vector<16x64xf32>
    %cst_89 = arith.constant 2.000000e+00 : f32
    %345 = vector.broadcast %cst_89 : f32 to vector<16x64xf32>
    %346 = arith.subf %345, %344 : vector<16x64xf32>
    %347 = arith.mulf %343, %346 : vector<16x64xf32>
    %cst_90 = arith.constant 1.06140542 : f32
    %348 = vector.broadcast %cst_90 : f32 to vector<16x64xf32>
    %349 = arith.mulf %347, %348 : vector<16x64xf32>
    %cst_91 = arith.constant -1.45315206 : f32
    %350 = vector.broadcast %cst_91 : f32 to vector<16x64xf32>
    %351 = arith.addf %350, %349 : vector<16x64xf32>
    %352 = arith.mulf %347, %351 : vector<16x64xf32>
    %cst_92 = arith.constant 1.42141378 : f32
    %353 = vector.broadcast %cst_92 : f32 to vector<16x64xf32>
    %354 = arith.addf %353, %352 : vector<16x64xf32>
    %355 = arith.mulf %347, %354 : vector<16x64xf32>
    %cst_93 = arith.constant -0.284496725 : f32
    %356 = vector.broadcast %cst_93 : f32 to vector<16x64xf32>
    %357 = arith.addf %356, %355 : vector<16x64xf32>
    %358 = arith.mulf %347, %357 : vector<16x64xf32>
    %cst_94 = arith.constant 0.254829586 : f32
    %359 = vector.broadcast %cst_94 : f32 to vector<16x64xf32>
    %360 = arith.addf %359, %358 : vector<16x64xf32>
    %361 = arith.mulf %347, %360 : vector<16x64xf32>
    %cst_95 = arith.constant 0.000000e+00 : f32
    %362 = vector.broadcast %cst_95 : f32 to vector<16x64xf32>
    %363 = arith.subf %362, %338 : vector<16x64xf32>
    %364 = arith.mulf %363, %338 : vector<16x64xf32>
    %365 = math.exp %364 : vector<16x64xf32>
    %366 = arith.mulf %361, %365 : vector<16x64xf32>
    %cst_96 = arith.constant 1.000000e+00 : f32
    %367 = vector.broadcast %cst_96 : f32 to vector<16x64xf32>
    %368 = arith.subf %367, %366 : vector<16x64xf32>
    %cst_97 = arith.constant 0.000000e+00 : f32
    %369 = vector.broadcast %cst_97 : f32 to vector<16x64xf32>
    %370 = arith.cmpf oge, %337, %369 : vector<16x64xf32>
    %cst_98 = arith.constant 0.000000e+00 : f32
    %371 = vector.broadcast %cst_98 : f32 to vector<16x64xf32>
    %372 = arith.subf %371, %368 : vector<16x64xf32>
    %373 = arith.select %370, %368, %372 : vector<16x64xi1>, vector<16x64xf32>
    %cst_99 = arith.constant 5.000000e-01 : f32
    %374 = vector.broadcast %cst_99 : f32 to vector<16x64xf32>
    %375 = arith.mulf %374, %335 : vector<16x64xf32>
    %cst_100 = arith.constant 1.000000e+00 : f32
    %376 = vector.broadcast %cst_100 : f32 to vector<16x64xf32>
    %377 = arith.addf %376, %373 : vector<16x64xf32>
    %378 = arith.mulf %375, %377 : vector<16x64xf32>
    %379 = arith.truncf %378 : vector<16x64xf32> to vector<16x64xbf16>
    %c1_101 = arith.constant 1 : index
    %c0_102 = arith.constant 0 : index
    %c0_103 = arith.constant 0 : index
    %380 = vector.load %arg8[%c1_101, %c0_102, %c0_103] : memref<2x64x32xbf16, #tpu.memory_space<vmem>>, vector<1x64x32xbf16>
    %381 = vector.shape_cast %380 : vector<1x64x32xbf16> to vector<64x32xbf16>
    %cst_104 = arith.constant dense<0.000000e+00> : vector<16x32xf32>
    %382 = tpu.matmul %379, %381, %cst_104 {dimension_numbers = #tpu.dot_dimension_numbers<[1], [0], [0], [1], [0, 0, 1, 1], [], []>} : vector<16x64xbf16>, vector<64x32xbf16>, vector<16x32xf32> -> vector<16x32xf32>
    %383 = vector.broadcast %214 : vector<1x32xf32> to vector<16x32xf32>
    %384 = arith.addf %382, %383 : vector<16x32xf32>
    %385 = arith.addf %329, %384 : vector<16x32xf32>
    %cst_105 = arith.constant dense<0.000000e+00> : vector<16xf32>
    %386 = vector.multi_reduction <add>, %385, %cst_105 [1] : vector<16x32xf32> to vector<16xf32>
    %387 = vector.shape_cast %386 : vector<16xf32> to vector<16x1xf32>
    %cst_106 = arith.constant 3.200000e+01 : f32
    %388 = vector.broadcast %cst_106 : f32 to vector<16x1xf32>
    %389 = arith.divf %387, %388 : vector<16x1xf32>
    %390 = vector.broadcast %389 : vector<16x1xf32> to vector<16x32xf32>
    %391 = arith.subf %385, %390 : vector<16x32xf32>
    %392 = arith.mulf %391, %391 : vector<16x32xf32>
    %cst_107 = arith.constant dense<0.000000e+00> : vector<16xf32>
    %393 = vector.multi_reduction <add>, %392, %cst_107 [1] : vector<16x32xf32> to vector<16xf32>
    %394 = vector.shape_cast %393 : vector<16xf32> to vector<16x1xf32>
    %cst_108 = arith.constant 3.200000e+01 : f32
    %395 = vector.broadcast %cst_108 : f32 to vector<16x1xf32>
    %396 = arith.divf %394, %395 : vector<16x1xf32>
    %cst_109 = arith.constant 9.99999996E-13 : f32
    %397 = vector.broadcast %cst_109 : f32 to vector<16x1xf32>
    %398 = arith.addf %396, %397 : vector<16x1xf32>
    %399 = math.rsqrt %398 : vector<16x1xf32>
    %400 = vector.broadcast %399 : vector<16x1xf32> to vector<16x32xf32>
    %401 = arith.mulf %391, %400 : vector<16x32xf32>
    %402 = vector.broadcast %215 : vector<1x32xf32> to vector<16x32xf32>
    %403 = arith.mulf %401, %402 : vector<16x32xf32>
    %404 = vector.broadcast %216 : vector<1x32xf32> to vector<16x32xf32>
    %405 = arith.addf %403, %404 : vector<16x32xf32>
    %c0_110 = arith.constant 0 : index
    %c0_111 = arith.constant 0 : index
    %406 = vector.load %arg10[%c0_110, %c0_111] : memref<16x32xf32, #tpu.memory_space<vmem>>, vector<16x32xf32>
    tpu.vector_store %arg10[%c0_110, %c0_111], %405 {strides = array<i32>} : memref<16x32xf32, #tpu.memory_space<vmem>>, vector<16x32xf32>,
    return
  }
  func.func @transform_0(%arg0: i32) -> (i32, i32) {
    %c0_i32 = arith.constant 0 : i32
    %c0_i32_0 = arith.constant 0 : i32
    %c0_i32_1 = arith.constant 0 : i32
    return %c0_i32, %c0_i32_0 : i32, i32
  }
  func.func @transform_1(%arg0: i32) -> (i32, i32, i32) {
    %c0_i32 = arith.constant 0 : i32
    %c0_i32_0 = arith.constant 0 : i32
    %c0_i32_1 = arith.constant 0 : i32
    %c0_i32_2 = arith.constant 0 : i32
    return %c0_i32, %c0_i32_0, %c0_i32_1 : i32, i32, i32
  }
  func.func @transform_2(%arg0: i32) -> (i32, i32) {
    %c0_i32 = arith.constant 0 : i32
    %c0_i32_0 = arith.constant 0 : i32
    %c0_i32_1 = arith.constant 0 : i32
    return %c0_i32, %c0_i32_0 : i32, i32
  }
  func.func @transform_3(%arg0: i32) -> (i32, i32) {
    %c0_i32 = arith.constant 0 : i32
    %c0_i32_0 = arith.constant 0 : i32
    %c0_i32_1 = arith.constant 0 : i32
    return %c0_i32, %c0_i32_0 : i32, i32
  }
  func.func @transform_4(%arg0: i32) -> (i32, i32, i32) {
    %c0_i32 = arith.constant 0 : i32
    %c0_i32_0 = arith.constant 0 : i32
    %c0_i32_1 = arith.constant 0 : i32
    %c0_i32_2 = arith.constant 0 : i32
    return %c0_i32, %c0_i32_0, %c0_i32_1 : i32, i32, i32
  }
  func.func @transform_5(%arg0: i32) -> (i32, i32, i32) {
    %c0_i32 = arith.constant 0 : i32
    %c0_i32_0 = arith.constant 0 : i32
    %c0_i32_1 = arith.constant 0 : i32
    %c0_i32_2 = arith.constant 0 : i32
    return %c0_i32, %c0_i32_0, %c0_i32_1 : i32, i32, i32
  }
  func.func @transform_6(%arg0: i32) -> (i32, i32, i32) {
    %c0_i32 = arith.constant 0 : i32
    %c0_i32_0 = arith.constant 0 : i32
    %c0_i32_1 = arith.constant 0 : i32
    %c0_i32_2 = arith.constant 0 : i32
    return %c0_i32, %c0_i32_0, %c0_i32_1 : i32, i32, i32
  }
  func.func @transform_7(%arg0: i32) -> (i32, i32, i32) {
    %c0_i32 = arith.constant 0 : i32
    %c0_i32_0 = arith.constant 0 : i32
    %c0_i32_1 = arith.constant 0 : i32
    %c0_i32_2 = arith.constant 0 : i32
    return %c0_i32, %c0_i32_0, %c0_i32_1 : i32, i32, i32
  }
  func.func @transform_8(%arg0: i32) -> (i32, i32, i32) {
    %c0_i32 = arith.constant 0 : i32
    %c0_i32_0 = arith.constant 0 : i32
    %c0_i32_1 = arith.constant 0 : i32
    %c0_i32_2 = arith.constant 0 : i32
    return %c0_i32, %c0_i32_0, %c0_i32_1 : i32, i32, i32
  }
  func.func @transform_9(%arg0: i32) -> (i32, i32) {
    %c0_i32 = arith.constant 0 : i32
    %c0_i32_0 = arith.constant 0 : i32
    %c0_i32_1 = arith.constant 0 : i32
    return %c0_i32, %c0_i32_0 : i32, i32
  }
}

</mosaic_0001>

<bundles_post_ra>
// kernel: _encoder_forward.1
= control target key start
LH: loop header
LB: loop body
LE: loop exit
PB: predicated region body
PF: predicated region fallthrough
CT: control target
= control target key end

     0   :  { %14 = vsyncpa [#allocation3], 0  ;;  %s5854_s0 = inlined_call_operand.hbm [shape: f32[16,32], index: 0, kind: input, shape index: {}, may-alias: {0,9}]   ;;  %s5855_s1 = inlined_call_operand.vmem [shape: f32[16,8,8], index: 1, kind: input, shape index: {}]   ;;  %s5856_s2 = inlined_call_operand.vmem [shape: f32[32,8], index: 2, kind: input, shape index: {}]   ;;  %s5857_s3 = inlined_call_operand.vmem [shape: f32[8,32], index: 3, kind: input, shape index: {}]   ;;  %s5858_s4 = inlined_call_operand.vmem [shape: bf16[6,32,32], index: 4, kind: input, shape index: {}]   ;;  %s5859_s5 = inlined_call_operand.vmem [shape: bf16[2,32,32], index: 5, kind: input, shape index: {}]   ;;  %s5860_s6 = inlined_call_operand.vmem [shape: bf16[2,32,64], index: 6, kind: input, shape index: {}]   ;;  %s5861_s7 = inlined_call_operand.vmem [shape: bf16[2,64,32], index: 7, kind: input, shape index: {}]   ;;  %s5862_s8 = inlined_call_operand.vmem [shape: f32[2,16,128], index: 8, kind: input, shape index: {}]   ;;  %s5863_s9 = inlined_call_operand.hbm [shape: f32[16,32], index: 9, kind: output, shape index: {}, may-alias: {0,9}]  }
   0x1   :  { %15 = vsyncpa [#allocation4], 0  ;;  %s20_s11 = sshll.u32 %s5854_s0, 4  ;;  %s4514_s12 = smov [#allocation2]   ;;  %s21_s11 = int_to_ptr.hbm [resolvable:$true] %s20_s11 }
   0x2   :  { %s22_s13 = sshll.u32 %s4514_s12, 4  ;;  %s4515_s14 = smov 128   ;;  %s23_s13 = int_to_ptr.vmem [resolvable:$true] %s22_s13 }
   0x3   :  { %s4516_s15 = smov 8  }
   0x4   :  { %28 = dma.hbm_to_vmem [thread:$0]  %s21_s11, 256, %s23_s13, [#allocation3], %s4515_s14, %s4515_s14, %s4516_s15  }
   0x5   :  { %4510 = dma.done.wait [#allocation3], 256  }
   0x6   :  { %4511 = vsyncadd [#allocation3], 4294967040  ;;  %v4243_v0 = vld [vmem:[%s5858_s4 + $0x8] sm:$0xff]  ;;  %v4242_v1 = vld [vmem:[%s5858_s4] sm:$0xff]  ;;  %vm93_vm0 = vcmask 261120   ;;  %vm1184_vm1 = vcmask 64512  }
   0x7   :  { %103 = vmatpush.bf16.msra.mxu0 %v4243_v0  ;;  %v50_v2 = vld [vmem:[#allocation2] sm:$0xff]  ;;  %v51_v3 = vld [vmem:[#allocation2 + $0x8] sm:$0xff]  ;;  %v4245_v5 = vld [vmem:[%s5858_s4 + $0x18] sm:$0xff]  ;;  %vm1720_vm2 = vcmask 1041409   ;;  %vm1723_vm3 = vcmask 1042434   ;;  %vm1726_vm4 = vcmask 1043459  }
   0x8   :  { %v4247_v4 = vld [vmem:[%s5858_s4 + $0x28] sm:$0xff]  ;;  %v4246_v6 = vld [vmem:[%s5858_s4 + $0x20] sm:$0xff]  ;;  %v75_v7 = vpack.c.bf16 %v51_v3, %v50_v2  ;;  %v4244_v8 = vld [vmem:[%s5858_s4 + $0x10] sm:$0xff]  ;;  %vm1729_vm5 = vcmask 1044484   ;;  %vm1732_vm6 = vcmask 1045509   ;;  %vm1735_vm7 = vcmask 1046534  }
   0x9   :  { %167 = vmatpush.bf16.msra.mxu3 %v4247_v4  ;;  %v71_v9 = vld [vmem:[%s5856_s2 + $0x18] sm:$0xff]  ;;  %v70_v10 = vld [vmem:[%s5856_s2 + $0x10] sm:$0xff]  ;;  %v69_v11 = vld [vmem:[%s5856_s2 + $0x8] sm:$0xff]  ;;  %vm1738_vm8 = vcmask 1047559   ;;  %s4003_s18 = sshll.u32 %s5863_s9, 4  ;;  %s4004_s18 = int_to_ptr.hbm [resolvable:$true] %s4003_s18 }
   0xa   :  { %v68_v12 = vld [vmem:[%s5856_s2] sm:$0xff] }
   0xb   :  { %104 = vmatpush.bf16.msra.mxu0 %v4242_v1  ;;  %v73_v14 = vld [vmem:[%s5862_s8] sm:$0xff] }
   0xc   :  { %v80_v15 = vperm.slane %v73_v14, 0  ;;  %v116_v19 = vperm.slane %v73_v14, 1  ;;  %v53_v14 = vld [vmem:[%s5855_s1 + $0x8] sm:$0xff] }
   0xd   :  { %168 = vmatpush.bf16.msra.mxu3 %v4246_v6 }
   0xe   :  { %4024 = vmatmul.msk.bf16.vlgmr.msra.gmra.mxu0 %vm93_vm0, %v75_v7 }
   0xf   :  { %135 = vmatpush.bf16.msrb.mxu0 %v4245_v5 }
  0x10   :  { %4050 = vmatmul.msk.bf16.vlgmr.msra.gmra.mxu3 %vm93_vm0, %v75_v7 }
  0x11   :  { %299 = vmatpush.msrb.mxu3 %v71_v9 }
  0x13   :  { %136 = vmatpush.bf16.msrb.mxu0 %v4244_v8  ;;  %300 = vmatpush.msrb.mxu3 %v70_v10  ;;  %v52_v8 = vld [vmem:[%s5855_s1] sm:$0xff] }
  0x15   :  { %301 = vmatpush.msrb.mxu3 %v69_v11 }
  0x17   :  { %302 = vmatpush.msrb.mxu3 %v68_v12 }
  0x1e   :  { %4037 = vmatmul.msk.bf16.vlgmr.msrb.gmra.mxu0 %vm93_vm0, %v75_v7 }
  0x8b   :  { %v106_v13 = vpop.f32.mrf.mxu0 }
  0x8c   :  { %v107_v18 = vadd.f32 %v106_v13, %v80_v15 }
  0x8e   :  { %v191_v22 = vperm.slane %v107_v18, 0  ;;  %v177_v24 = vrot.slane %v107_v18, 1  ;;  %v178_v52 = vrot.slane %v107_v18, 2  ;;  %v179_v55 = vrot.slane %v107_v18, 3 }
  0x8f   :  { %v180_v58 = vrot.slane %v107_v18, 4  ;;  %v181_v61 = vrot.slane %v107_v18, 5  ;;  %v182_v0 = vrot.slane %v107_v18, 6  ;;  %v183_v3 = vrot.slane %v107_v18, 7 }
  0x90   :  { %v192_v33 = vperm.slane %v177_v24, 0  ;;  %v193_v53 = vperm.slane %v178_v52, 0  ;;  %v194_v56 = vperm.slane %v179_v55, 0 }
  0x91   :  { %v195_v59 = vperm.slane %v180_v58, 0  ;;  %v196_v62 = vperm.slane %v181_v61, 0  ;;  %v197_v1 = vperm.slane %v182_v0, 0  ;;  %v198_v4 = vperm.slane %v183_v3, 0 }
  0x93   :  { %v108_v16 = vpop.f32.mrf.mxu0  ;;  %v4626_v6 = vpop.f32.mrf.mxu3 }
  0x94   :  { %v109_v17 = vadd.f32 %v108_v16, %v80_v15 }
  0x96   :  { %v184_v25 = vrot.slane %v109_v17, 1  ;;  %v185_v26 = vrot.slane %v109_v17, 2  ;;  %v186_v27 = vrot.slane %v109_v17, 3  ;;  %v187_v28 = vrot.slane %v109_v17, 4 }
  0x97   :  { %v188_v29 = vrot.slane %v109_v17, 5  ;;  %v189_v30 = vrot.slane %v109_v17, 6  ;;  %v190_v31 = vrot.slane %v109_v17, 7  ;;  %v199_v34 = vperm.slane %v109_v17, 0 }
  0x98   :  { %v200_v35 = vperm.slane %v184_v25, 0  ;;  %v201_v37 = vperm.slane %v185_v26, 0  ;;  %v202_v38 = vperm.slane %v186_v27, 0  ;;  %v203_v39 = vperm.slane %v187_v28, 0  ;;  %v54_v28 = vld [vmem:[%s5855_s1 + $0x10] sm:$0xff] }
  0x99   :  { %v204_v41 = vperm.slane %v188_v29, 0  ;;  %v205_v42 = vperm.slane %v189_v30, 0  ;;  %v206_v43 = vperm.slane %v190_v31, 0 }
  0x9b   :  { %v138_v20 = vpop.f32.mrf.mxu0  ;;  %v4629_v7 = vpop.f32.mrf.mxu3 }
  0x9c   :  { %v139_v21 = vadd.f32 %v138_v20, %v116_v19 }
  0x9e   :  { %v223_v23 = vmul.f32 %v191_v22, %v139_v21  ;;  %v224_v40 = vmul.f32 %v192_v33, %v139_v21  ;;  %v225_v54 = vmul.f32 %v193_v53, %v139_v21  ;;  %v226_v57 = vmul.f32 %v194_v56, %v139_v21 }
  0x9f   :  { %v227_v60 = vmul.f32 %v195_v59, %v139_v21  ;;  %v228_v63 = vmul.f32 %v196_v62, %v139_v21  ;;  %v229_v2 = vmul.f32 %v197_v1, %v139_v21  ;;  %v230_v5 = vmul.f32 %v198_v4, %v139_v21  ;;  %v72_v62 = vld [vmem:[%s5857_s3] sm:$0xff] }
  0xa0   :  { %4051 = vmatmul.msk.f32.vlgmr.msrb.gmra.mxu3 %vm93_vm0, %v223_v23  ;;  %1248 = vmatpush.msra.mxu0 %v72_v62 }
  0xa3   :  { %v140_v32 = vpop.f32.mrf.mxu0 }
  0xa4   :  { %v141_v36 = vadd.f32 %v140_v32, %v116_v19 }
  0xa6   :  { %v231_v44 = vmul.f32 %v199_v34, %v141_v36  ;;  %v232_v45 = vmul.f32 %v200_v35, %v141_v36  ;;  %v233_v46 = vmul.f32 %v201_v37, %v141_v36  ;;  %v234_v47 = vmul.f32 %v202_v38, %v141_v36 }
  0xa7   :  { %v235_v48 = vmul.f32 %v203_v39, %v141_v36  ;;  %v236_v49 = vmul.f32 %v204_v41, %v141_v36  ;;  %v237_v50 = vmul.f32 %v205_v42, %v141_v36  ;;  %v238_v51 = vmul.f32 %v206_v43, %v141_v36 }
  0xa8   :  { %4052 = vmatmul.msk.f32.gmra.mxu3 %vm93_vm0, %v224_v40 }
  0xb0   :  { %4053 = vmatmul.msk.f32.gmra.mxu3 %vm93_vm0, %v225_v54 }
  0xb8   :  { %4054 = vmatmul.msk.f32.gmra.mxu3 %vm93_vm0, %v226_v57 }
  0xc0   :  { %4055 = vmatmul.msk.f32.gmra.mxu3 %vm93_vm0, %v227_v60 }
  0xc8   :  { %4056 = vmatmul.msk.f32.gmra.mxu3 %vm93_vm0, %v228_v63 }
  0xd0   :  { %4057 = vmatmul.msk.f32.gmra.mxu3 %vm93_vm0, %v229_v2 }
  0xd8   :  { %4058 = vmatmul.msk.f32.gmra.mxu3 %vm93_vm0, %v230_v5  ;;  %v56_v5 = vld [vmem:[%s5855_s1 + $0x20] sm:$0xff] }
  0xe0   :  { %4059 = vmatmul.msk.f32.gmra.mxu3 %vm93_vm0, %v231_v44 }
  0xe8   :  { %4060 = vmatmul.msk.f32.gmra.mxu3 %vm93_vm0, %v232_v45 }
  0xf0   :  { %4061 = vmatmul.msk.f32.gmra.mxu3 %vm93_vm0, %v233_v46 }
  0xf8   :  { %4062 = vmatmul.msk.f32.gmra.mxu3 %vm93_vm0, %v234_v47 }
 0x100   :  { %4063 = vmatmul.msk.f32.gmra.mxu3 %vm93_vm0, %v235_v48  ;;  %v55_v48 = vld [vmem:[%s5855_s1 + $0x18] sm:$0xff] }
 0x108   :  { %4064 = vmatmul.msk.f32.gmra.mxu3 %vm93_vm0, %v236_v49 }
 0x110   :  { %4065 = vmatmul.msk.f32.gmra.mxu3 %vm93_vm0, %v237_v50 }
 0x118   :  { %4066 = vmatmul.msk.f32.gmra.mxu3 %vm93_vm0, %v238_v51 }
 0x123   :  { %v304_v9 = vpop.f32.mrf.mxu3 }
 0x124   :  { %v352_v10 = vadd.f32 %v304_v9, %v52_v8 }
 0x126   :  { %v384_v11 = vrot.slane %v352_v10, 1  ;;  %v432_v13 = vrot.slane %v352_v10, 2  ;;  %v480_v16 = vrot.slane %v352_v10, 3  ;;  %v528_v19 = vrot.slane %v352_v10, 4 }
 0x127   :  { %v576_v22 = vrot.slane %v352_v10, 5  ;;  %v624_v25 = vrot.slane %v352_v10, 6  ;;  %v672_v30 = vrot.slane %v352_v10, 7 }
 0x128   :  { %v416_v12 = vmax.f32 %v352_v10, %v384_v11 }
 0x12a   :  { %v464_v15 = vmax.f32 %v416_v12, %v432_v13 }
 0x12b   :  { %v307_v17 = vpop.f32.mrf.mxu3 }
 0x12c   :  { %v512_v18 = vmax.f32 %v464_v15, %v480_v16  ;;  %v353_v20 = vadd.f32 %v307_v17, %v53_v14 }
 0x12e   :  { %v560_v21 = vmax.f32 %v512_v18, %v528_v19  ;;  %v385_v23 = vrot.slane %v353_v20, 1  ;;  %v433_v27 = vrot.slane %v353_v20, 2  ;;  %v481_v32 = vrot.slane %v353_v20, 3 }
 0x12f   :  { %v529_v36 = vrot.slane %v353_v20, 4  ;;  %v577_v40 = vrot.slane %v353_v20, 5  ;;  %v625_v42 = vrot.slane %v353_v20, 6  ;;  %v673_v47 = vrot.slane %v353_v20, 7 }
 0x130   :  { %v608_v24 = vmax.f32 %v560_v21, %v576_v22  ;;  %v417_v26 = vmax.f32 %v353_v20, %v385_v23 }
 0x132   :  { %v656_v29 = vmax.f32 %v608_v24, %v624_v25  ;;  %v465_v31 = vmax.f32 %v417_v26, %v433_v27 }
 0x133   :  { %v310_v33 = vpop.f32.mrf.mxu3 }
 0x134   :  { %v704_v34 = vmax.f32 %v656_v29, %v672_v30  ;;  %v513_v35 = vmax.f32 %v465_v31, %v481_v32  ;;  %v354_v37 = vadd.f32 %v310_v33, %v54_v28  ;;  %v57_v31 = vld [vmem:[%s5855_s1 + $0x28] sm:$0xff] }
 0x136   :  { %v720_v38 = vperm.slane %v704_v34, 0  ;;  %v561_v39 = vmax.f32 %v513_v35, %v529_v36  ;;  %v386_v41 = vrot.slane %v354_v37, 1  ;;  %v434_v46 = vrot.slane %v354_v37, 2 }
 0x137   :  { %v482_v52 = vrot.slane %v354_v37, 3  ;;  %v530_v53 = vrot.slane %v354_v37, 4  ;;  %v578_v60 = vrot.slane %v354_v37, 5  ;;  %v626_v63 = vrot.slane %v354_v37, 6 }
 0x138   :  { %v736_v43 = vsub.f32 %v352_v10, %v720_v38  ;;  %v609_v44 = vmax.f32 %v561_v39, %v577_v40  ;;  %v418_v45 = vmax.f32 %v354_v37, %v386_v41  ;;  %v674_v4 = vrot.slane %v354_v37, 7 }
 0x13a   :  { %v752_v49 = vmul.f32 1.442695, %v736_v43  ;;  %v657_v50 = vmax.f32 %v609_v44, %v625_v42  ;;  %v466_v51 = vmax.f32 %v418_v45, %v434_v46 }
 0x13b   :  { %v313_v54 = vpop.f32.mrf.mxu3 }
 0x13c   :  { %4275 = vpow2.f32 %v752_v49  ;;  %v705_v55 = vmax.f32 %v657_v50, %v673_v47  ;;  %v514_v56 = vmax.f32 %v466_v51, %v482_v52  ;;  %v4643_v57 = vadd.f32 %v313_v54, %v55_v48 }
 0x13e   :  { %v721_v58 = vperm.slane %v705_v55, 0  ;;  %v562_v59 = vmax.f32 %v514_v56, %v530_v53  ;;  %v387_v61 = vrot.slane %v4643_v57, 1  ;;  %v435_v3 = vrot.slane %v4643_v57, 2 }
 0x13f   :  { %v483_v12 = vrot.slane %v4643_v57, 3  ;;  %v531_v13 = vrot.slane %v4643_v57, 4  ;;  %v579_v22 = vrot.slane %v4643_v57, 5  ;;  %v627_v24 = vrot.slane %v4643_v57, 6 }
 0x140   :  { %v737_v0 = vsub.f32 %v353_v20, %v721_v58  ;;  %v610_v1 = vmax.f32 %v562_v59, %v578_v60  ;;  %v419_v2 = vmax.f32 %v4643_v57, %v387_v61  ;;  %v675_v25 = vrot.slane %v4643_v57, 7 }
 0x142   :  { %v4654_v8 = vpop.eup %4275  ;;  %v754_v9 = vmul.f32 1.442695, %v737_v0  ;;  %v658_v10 = vmax.f32 %v610_v1, %v626_v63  ;;  %v467_v11 = vmax.f32 %v419_v2, %v435_v3  ;;  %v58_v3 = vld [vmem:[%s5855_s1 + $0x30] sm:$0xff] }
 0x143   :  { %v316_v14 = vpop.f32.mrf.mxu3  ;;  %v800_v15 = vrot.slane %v4654_v8, 1  ;;  %v848_v26 = vrot.slane %v4654_v8, 2  ;;  %v896_v33 = vrot.slane %v4654_v8, 3  ;;  %v944_v34 = vrot.slane %v4654_v8, 4 }
 0x144   :  { %4277 = vpow2.f32 %v754_v9  ;;  %v706_v16 = vmax.f32 %v658_v10, %v674_v4  ;;  %v515_v17 = vmax.f32 %v467_v11, %v483_v12  ;;  %v4659_v18 = vadd.f32 %v316_v14, %v56_v5 }
 0x145   :  { %v832_v19 = vadd.f32 %v4654_v8, %v800_v15  ;;  %v992_v35 = vrot.slane %v4654_v8, 5  ;;  %v1040_v44 = vrot.slane %v4654_v8, 6  ;;  %v1088_v51 = vrot.slane %v4654_v8, 7 }
 0x146   :  { %v722_v20 = vperm.slane %v706_v16, 0  ;;  %v563_v21 = vmax.f32 %v515_v17, %v531_v13  ;;  %v388_v23 = vrot.slane %v4659_v18, 1  ;;  %v436_v30 = vrot.slane %v4659_v18, 2 }
 0x147   :  { %v880_v32 = vadd.f32 %v848_v26, %v832_v19  ;;  %v484_v40 = vrot.slane %v4659_v18, 3  ;;  %v532_v41 = vrot.slane %v4659_v18, 4  ;;  %v580_v49 = vrot.slane %v4659_v18, 5 }
 0x148   :  { %v738_v27 = vsub.f32 %v354_v37, %v722_v20  ;;  %v611_v28 = vmax.f32 %v563_v21, %v579_v22  ;;  %v420_v29 = vmax.f32 %v4659_v18, %v388_v23  ;;  %v628_v55 = vrot.slane %v4659_v18, 6 }
 0x149   :  { %v928_v43 = vadd.f32 %v896_v33, %v880_v32  ;;  %v676_v58 = vrot.slane %v4659_v18, 7 }
 0x14a   :  { %v4675_v36 = vpop.eup %4277  ;;  %v756_v38 = vmul.f32 1.442695, %v738_v27  ;;  %v659_v37 = vmax.f32 %v611_v28, %v627_v24  ;;  %v468_v39 = vmax.f32 %v420_v29, %v436_v30 }
 0x14b   :  { %v319_v42 = vpop.f32.mrf.mxu3  ;;  %v801_v45 = vrot.slane %v4675_v36, 1  ;;  %v976_v50 = vadd.f32 %v944_v34, %v928_v43  ;;  %v849_v59 = vrot.slane %v4675_v36, 2  ;;  %v897_v60 = vrot.slane %v4675_v36, 3 }
 0x14c   :  { %4279 = vpow2.f32 %v756_v38  ;;  %v707_v46 = vmax.f32 %v659_v37, %v675_v25  ;;  %v516_v47 = vmax.f32 %v468_v39, %v484_v40  ;;  %v4681_v48 = vadd.f32 %v319_v42, %v57_v31 }
 0x14d   :  { %v833_v52 = vadd.f32 %v4675_v36, %v801_v45  ;;  %v945_v61 = vrot.slane %v4675_v36, 4  ;;  %v1024_v4 = vadd.f32 %v992_v35, %v976_v50  ;;  %v993_v9 = vrot.slane %v4675_v36, 5 }
 0x14e   :  { %v723_v53 = vperm.slane %v707_v46, 0  ;;  %v564_v54 = vmax.f32 %v516_v47, %v532_v41  ;;  %v389_v56 = vrot.slane %v4681_v48, 1  ;;  %v437_v1 = vrot.slane %v4681_v48, 2  ;;  %v59_v41 = vld [vmem:[%s5855_s1 + $0x38] sm:$0xff] }
 0x14f   :  { %v485_v2 = vrot.slane %v4681_v48, 3  ;;  %v881_v5 = vadd.f32 %v849_v59, %v833_v52  ;;  %v533_v13 = vrot.slane %v4681_v48, 4  ;;  %v581_v14 = vrot.slane %v4681_v48, 5 }
 0x150   :  { %v739_v62 = vsub.f32 %v4643_v57, %v723_v53  ;;  %v612_v63 = vmax.f32 %v564_v54, %v580_v49  ;;  %v421_v0 = vmax.f32 %v4681_v48, %v389_v56  ;;  %v1072_v16 = vadd.f32 %v1040_v44, %v1024_v4 }
 0x151   :  { %v929_v17 = vadd.f32 %v897_v60, %v881_v5  ;;  %v629_v23 = vrot.slane %v4681_v48, 6  ;;  %v677_v29 = vrot.slane %v4681_v48, 7  ;;  %v1041_v31 = vrot.slane %v4675_v36, 6 }
 0x152   :  { %v4700_v10 = vpop.eup %4279  ;;  %v758_v11 = vmul.f32 1.442695, %v739_v62  ;;  %v660_v12 = vmax.f32 %v612_v63, %v628_v55  ;;  %v469_v57 = vmax.f32 %v421_v0, %v437_v1  ;;  %v1120_v24 = vadd.f32 %v1088_v51, %v1072_v16 }
 0x153   :  { %v322_v15 = vpop.f32.mrf.mxu3  ;;  %v802_v19 = vrot.slane %v4700_v10, 1  ;;  %v977_v25 = vadd.f32 %v945_v61, %v929_v17  ;;  %v1089_v32 = vrot.slane %v4675_v36, 7  ;;  %v850_v33 = vrot.slane %v4700_v10, 2 }
 0x154   :  { %4281 = vpow2.f32 %v758_v11  ;;  %v708_v20 = vmax.f32 %v660_v12, %v676_v58  ;;  %v517_v21 = vmax.f32 %v469_v57, %v485_v2  ;;  %v4705_v22 = vadd.f32 %v322_v15, %v58_v3  ;;  %v60_v15 = vld [vmem:[%s5855_s1 + $0x40] sm:$0xff] }
 0x155   :  { %v834_v26 = vadd.f32 %v4700_v10, %v802_v19  ;;  %v898_v34 = vrot.slane %v4700_v10, 3  ;;  %4283 = vrcp.f32 %v1120_v24  ;;  %v1025_v42 = vadd.f32 %v993_v9, %v977_v25 }
 0x156   :  { %v724_v27 = vperm.slane %v708_v20, 0  ;;  %v565_v28 = vmax.f32 %v517_v21, %v533_v13  ;;  %v390_v30 = vrot.slane %v4705_v22, 1  ;;  %v438_v39 = vrot.slane %v4705_v22, 2 }
 0x157   :  { %v486_v40 = vrot.slane %v4705_v22, 3  ;;  %v882_v43 = vadd.f32 %v850_v33, %v834_v26  ;;  %v582_v47 = vrot.slane %v4705_v22, 5  ;;  %v1073_v51 = vadd.f32 %v1041_v31, %v1025_v42 }
 0x158   :  { %v740_v35 = vsub.f32 %v4659_v18, %v724_v27  ;;  %v613_v38 = vmax.f32 %v565_v28, %v581_v14  ;;  %v422_v37 = vmax.f32 %v4705_v22, %v390_v30  ;;  %v534_v18 = vrot.slane %v4705_v22, 4 }
 0x159   :  { %v930_v52 = vadd.f32 %v898_v34, %v882_v43  ;;  %v946_v53 = vrot.slane %v4700_v10, 4  ;;  %v630_v56 = vrot.slane %v4705_v22, 6  ;;  %v678_v59 = vrot.slane %v4705_v22, 7 }
 0x15a   :  { %v4722_v44 = vpop.eup %4281  ;;  %v661_v45 = vmax.f32 %v613_v38, %v629_v23  ;;  %v470_v46 = vmax.f32 %v422_v37, %v438_v39  ;;  %v760_v49 = vmul.f32 1.442695, %v740_v35  ;;  %v1121_v60 = vadd.f32 %v1089_v32, %v1073_v51 }
 0x15b   :  { %v325_v50 = vpop.f32.mrf.mxu3  ;;  %v978_v61 = vadd.f32 %v946_v53, %v930_v52  ;;  %v803_v62 = vrot.slane %v4722_v44, 1  ;;  %v994_v2 = vrot.slane %v4700_v10, 5  ;;  %v4284_v3 = vpop.eup %4283  ;;  %v1042_v4 = vrot.slane %v4700_v10, 6  ;;  %v61_v52 = vld [vmem:[%s5855_s1 + $0x48] sm:$0xff] }
 0x15c   :  { %v709_v54 = vmax.f32 %v661_v45, %v677_v29  ;;  %v518_v55 = vmax.f32 %v470_v46, %v486_v40  ;;  %v4728_v58 = vadd.f32 %v325_v50, %v59_v41  ;;  %4285 = vpow2.f32 %v760_v49 }
 0x15d   :  { %v1090_v5 = vrot.slane %v4700_v10, 7  ;;  %v851_v9 = vrot.slane %v4722_v44, 2  ;;  %v1152_v14 = vperm.slane %v4284_v3, 0  ;;  %4287 = vrcp.f32 %v1121_v60 }
 0x15e   :  { %v725_v63 = vperm.slane %v709_v54, 0  ;;  %v566_v0 = vmax.f32 %v518_v55, %v534_v18  ;;  %v391_v1 = vrot.slane %v4728_v58, 1  ;;  %v439_v13 = vrot.slane %v4728_v58, 2 }
 0x15f   :  { %v1026_v16 = vadd.f32 %v994_v2, %v978_v61  ;;  %v835_v17 = vadd.f32 %v4722_v44, %v803_v62  ;;  %v487_v23 = vrot.slane %v4728_v58, 3  ;;  %v899_v27 = vrot.slane %v4722_v44, 3 }
 0x160   :  { %v741_v11 = vsub.f32 %v4681_v48, %v725_v63  ;;  %v614_v12 = vmax.f32 %v566_v0, %v582_v47  ;;  %v423_v57 = vmax.f32 %v4728_v58, %v391_v1  ;;  %v1168_v48 = vmul.f32 %v4654_v8, %v1152_v14 }
 0x161   :  { %v1074_v25 = vadd.f32 %v1042_v4, %v1026_v16  ;;  %v883_v26 = vadd.f32 %v851_v9, %v835_v17  ;;  %v535_v30 = vrot.slane %v4728_v58, 4  ;;  %v583_v33 = vrot.slane %v4728_v58, 5 }
 0x162   :  { %v762_v19 = vmul.f32 1.442695, %v741_v11  ;;  %v662_v20 = vmax.f32 %v614_v12, %v630_v56  ;;  %v471_v21 = vmax.f32 %v423_v57, %v439_v13  ;;  %v4750_v32 = vpop.eup %4285  ;;  %v631_v34 = vrot.slane %v4728_v58, 6  ;;  %4067 = vmatmul.msk.f32.vlgmr.msra.gmra.mxu0 %vm1184_vm1, %v1168_v48 }
 0x163   :  { %v328_v24 = vpop.f32.mrf.mxu3  ;;  %v1122_v8 = vadd.f32 %v1090_v5, %v1074_v25  ;;  %v931_v35 = vadd.f32 %v899_v27, %v883_v26  ;;  %v679_v39 = vrot.slane %v4728_v58, 7  ;;  %v4288_v41 = vpop.eup %4287  ;;  %v947_v42 = vrot.slane %v4722_v44, 4  ;;  %v62_v26 = vld [vmem:[%s5855_s1 + $0x50] sm:$0xff] }
 0x164   :  { %v710_v28 = vmax.f32 %v662_v20, %v678_v59  ;;  %v519_v29 = vmax.f32 %v471_v21, %v487_v23  ;;  %v4748_v31 = vadd.f32 %v328_v24, %v60_v15  ;;  %4289 = vpow2.f32 %v762_v19 }
 0x165   :  { %v995_v43 = vrot.slane %v4722_v44, 5  ;;  %v1043_v45 = vrot.slane %v4722_v44, 6  ;;  %v1153_v51 = vperm.slane %v4288_v41, 0  ;;  %4291 = vrcp.f32 %v1122_v8 }
 0x166   :  { %v726_v38 = vperm.slane %v710_v28, 0  ;;  %v567_v37 = vmax.f32 %v519_v29, %v535_v30  ;;  %v392_v40 = vrot.slane %v4748_v31, 1  ;;  %v440_v49 = vrot.slane %v4748_v31, 2 }
 0x167   :  { %v488_v50 = vrot.slane %v4748_v31, 3  ;;  %v979_v53 = vadd.f32 %v947_v42, %v931_v35  ;;  %v536_v56 = vrot.slane %v4748_v31, 4  ;;  %v584_v60 = vrot.slane %v4748_v31, 5 }
 0x168   :  { %v742_v46 = vsub.f32 %v4705_v22, %v726_v38  ;;  %v615_v18 = vmax.f32 %v567_v37, %v583_v33  ;;  %v424_v47 = vmax.f32 %v4748_v31, %v392_v40  ;;  %v804_v22 = vrot.slane %v4750_v32, 1 }
 0x169   :  { %v1169_v61 = vmul.f32 %v4675_v36, %v1153_v51  ;;  %v1027_v63 = vadd.f32 %v995_v43, %v979_v53  ;;  %v632_v2 = vrot.slane %v4748_v31, 6  ;;  %v680_v5 = vrot.slane %v4748_v31, 7 }
 0x16a   :  { %v663_v54 = vmax.f32 %v615_v18, %v631_v34  ;;  %v472_v55 = vmax.f32 %v424_v47, %v440_v49  ;;  %v764_v59 = vmul.f32 1.442695, %v742_v46  ;;  %v4774_v4 = vpop.eup %4289  ;;  %v1091_v11 = vrot.slane %v4722_v44, 7 }
 0x16b   :  { %v331_v62 = vpop.f32.mrf.mxu3  ;;  %4068 = vmatmul.msk.f32.gmra.mxu0 %vm1184_vm1, %v1169_v61  ;;  %v1075_v9 = vadd.f32 %v1043_v45, %v1027_v63  ;;  %v836_v12 = vadd.f32 %v4750_v32, %v804_v22  ;;  %v852_v14 = vrot.slane %v4750_v32, 2  ;;  %v4292_v15 = vpop.eup %4291  ;;  %v900_v16 = vrot.slane %v4750_v32, 3 }
 0x16c   :  { %v711_v0 = vmax.f32 %v663_v54, %v679_v39  ;;  %v520_v1 = vmax.f32 %v472_v55, %v488_v50  ;;  %v4772_v3 = vadd.f32 %v331_v62, %v61_v52  ;;  %4293 = vpow2.f32 %v764_v59 }
 0x16d   :  { %v948_v17 = vrot.slane %v4750_v32, 4  ;;  %v996_v19 = vrot.slane %v4750_v32, 5  ;;  %v1154_v25 = vperm.slane %v4292_v15, 0  ;;  %v1123_v27 = vadd.f32 %v1091_v11, %v1075_v9 }
 0x16e   :  { %v727_v36 = vperm.slane %v711_v0, 0  ;;  %v568_v57 = vmax.f32 %v520_v1, %v536_v56  ;;  %v393_v13 = vrot.slane %v4772_v3, 1  ;;  %v441_v48 = vrot.slane %v4772_v3, 2 }
 0x16f   :  { %v489_v24 = vrot.slane %v4772_v3, 3  ;;  %v884_v28 = vadd.f32 %v852_v14, %v836_v12  ;;  %v537_v34 = vrot.slane %v4772_v3, 4  ;;  %4295 = vrcp.f32 %v1123_v27 }
 0x170   :  { %v743_v20 = vsub.f32 %v4728_v58, %v727_v36  ;;  %v616_v21 = vmax.f32 %v568_v57, %v584_v60  ;;  %v425_v23 = vmax.f32 %v4772_v3, %v393_v13  ;;  %v1170_v58 = vmul.f32 %v4700_v10, %v1154_v25 }
 0x171   :  { %v932_v35 = vadd.f32 %v900_v16, %v884_v28  ;;  %v805_v38 = vrot.slane %v4774_v4, 1  ;;  %v585_v40 = vrot.slane %v4772_v3, 5  ;;  %v633_v43 = vrot.slane %v4772_v3, 6 }
 0x172   :  { %v766_v29 = vmul.f32 1.442695, %v743_v20  ;;  %v664_v30 = vmax.f32 %v616_v21, %v632_v2  ;;  %v473_v33 = vmax.f32 %v425_v23, %v441_v48  ;;  %v4798_v42 = vpop.eup %4293  ;;  %v681_v45 = vrot.slane %v4772_v3, 7 }
 0x173   :  { %v334_v8 = vpop.f32.mrf.mxu3  ;;  %4069 = vmatmul.msk.f32.gmra.mxu0 %vm1184_vm1, %v1170_v58  ;;  %v980_v10 = vadd.f32 %v948_v17, %v932_v35  ;;  %v837_v46 = vadd.f32 %v4774_v4, %v805_v38  ;;  %v1044_v50 = vrot.slane %v4750_v32, 6  ;;  %v1092_v51 = vrot.slane %v4750_v32, 7  ;;  %v64_v35 = vld [vmem:[%s5855_s1 + $0x60] sm:$0xff] }
 0x174   :  { %v712_v37 = vmax.f32 %v664_v30, %v680_v5  ;;  %v521_v39 = vmax.f32 %v473_v33, %v489_v24  ;;  %v4796_v41 = vadd.f32 %v334_v8, %v62_v26  ;;  %4297 = vpow2.f32 %v766_v29 }
 0x175   :  { %v853_v52 = vrot.slane %v4774_v4, 2  ;;  %v901_v53 = vrot.slane %v4774_v4, 3  ;;  %v4296_v59 = vpop.eup %4295  ;;  %v1028_v62 = vadd.f32 %v996_v19, %v980_v10  ;;  %v949_v57 = vrot.slane %v4774_v4, 4 }
 0x176   :  { %v728_v18 = vperm.slane %v712_v37, 0  ;;  %v569_v47 = vmax.f32 %v521_v39, %v537_v34  ;;  %v394_v49 = vrot.slane %v4796_v41, 1  ;;  %v442_v22 = vrot.slane %v4796_v41, 2 }
 0x177   :  { %v490_v60 = vrot.slane %v4796_v41, 3  ;;  %v538_v61 = vrot.slane %v4796_v41, 4  ;;  %v885_v63 = vadd.f32 %v853_v52, %v837_v46  ;;  %v586_v2 = vrot.slane %v4796_v41, 5 }
 0x178   :  { %v744_v54 = vsub.f32 %v4748_v31, %v728_v18  ;;  %v617_v55 = vmax.f32 %v569_v47, %v585_v40  ;;  %v426_v56 = vmax.f32 %v4796_v41, %v394_v49  ;;  %v1155_v5 = vperm.slane %v4296_v59, 0  ;;  %v63_v31 = vld [vmem:[%s5855_s1 + $0x58] sm:$0xff] }
 0x179   :  { %v1076_v12 = vadd.f32 %v1044_v50, %v1028_v62  ;;  %v933_v36 = vadd.f32 %v901_v53, %v885_v63  ;;  %v634_v15 = vrot.slane %v4796_v41, 6  ;;  %v682_v19 = vrot.slane %v4796_v41, 7 }
 0x17a   :  { %v665_v0 = vmax.f32 %v617_v55, %v633_v43  ;;  %v474_v1 = vmax.f32 %v426_v56, %v442_v22  ;;  %v768_v9 = vmul.f32 1.442695, %v744_v54  ;;  %v1171_v16 = vmul.f32 %v4722_v44, %v1155_v5  ;;  %v4821_v17 = vpop.eup %4297 }
 0x17b   :  { %v337_v11 = vpop.f32.mrf.mxu3  ;;  %v1124_v21 = vadd.f32 %v1092_v51, %v1076_v12  ;;  %v981_v23 = vadd.f32 %v949_v57, %v933_v36  ;;  %v997_v25 = vrot.slane %v4774_v4, 5  ;;  %v806_v26 = vrot.slane %v4798_v42, 1  ;;  %v65_v12 = vld [vmem:[%s5855_s1 + $0x68] sm:$0xff] }
 0x17c   :  { %v713_v13 = vmax.f32 %v665_v0, %v681_v45  ;;  %v522_v14 = vmax.f32 %v474_v1, %v490_v60  ;;  %v4824_v20 = vadd.f32 %v337_v11, %v63_v31  ;;  %4070 = vmatmul.msk.f32.gmra.mxu0 %vm1184_vm1, %v1171_v16  ;;  %4299 = vpow2.f32 %v768_v9 }
 0x17d   :  { %v1045_v44 = vrot.slane %v4774_v4, 6  ;;  %v1093_v28 = vrot.slane %v4774_v4, 7  ;;  %v854_v33 = vrot.slane %v4798_v42, 2  ;;  %v902_v34 = vrot.slane %v4798_v42, 3 }
 0x17e   :  { %v729_v48 = vperm.slane %v713_v13, 0  ;;  %v570_v24 = vmax.f32 %v522_v14, %v538_v61  ;;  %v395_v27 = vrot.slane %v4824_v20, 1  ;;  %v443_v8 = vrot.slane %v4824_v20, 2 }
 0x17f   :  { %4301 = vrcp.f32 %v1124_v21  ;;  %v1029_v38 = vadd.f32 %v997_v25, %v981_v23  ;;  %v491_v39 = vrot.slane %v4824_v20, 3  ;;  %v838_v40 = vadd.f32 %v4798_v42, %v806_v26 }
 0x180   :  { %v745_v29 = vsub.f32 %v4772_v3, %v729_v48  ;;  %v618_v30 = vmax.f32 %v570_v24, %v586_v2  ;;  %v427_v58 = vmax.f32 %v4824_v20, %v395_v27  ;;  %v539_v3 = vrot.slane %v4824_v20, 4 }
 0x181   :  { %v587_v10 = vrot.slane %v4824_v20, 5  ;;  %v1077_v18 = vadd.f32 %v1045_v44, %v1029_v38  ;;  %v635_v49 = vrot.slane %v4824_v20, 6  ;;  %v683_v50 = vrot.slane %v4824_v20, 7 }
 0x182   :  { %v666_v37 = vmax.f32 %v618_v30, %v634_v15  ;;  %v770_v43 = vmul.f32 1.442695, %v745_v29  ;;  %v475_v45 = vmax.f32 %v427_v58, %v443_v8  ;;  %v4848_v52 = vpop.eup %4299  ;;  %v886_v55 = vadd.f32 %v854_v33, %v838_v40 }
 0x183   :  { %v340_v46 = vpop.f32.mrf.mxu3  ;;  %v1125_v54 = vadd.f32 %v1093_v28, %v1077_v18  ;;  %v807_v56 = vrot.slane %v4821_v17, 1  ;;  %v950_v60 = vrot.slane %v4798_v42, 4  ;;  %v998_v61 = vrot.slane %v4798_v42, 5 }
 0x184   :  { %v714_v47 = vmax.f32 %v666_v37, %v682_v19  ;;  %v4846_v51 = vadd.f32 %v340_v46, %v64_v35  ;;  %v523_v53 = vmax.f32 %v475_v45, %v491_v39  ;;  %4303 = vpow2.f32 %v770_v43 }
 0x185   :  { %v4302_v62 = vpop.eup %4301  ;;  %v1046_v0 = vrot.slane %v4798_v42, 6  ;;  %v1094_v1 = vrot.slane %v4798_v42, 7  ;;  %4305 = vrcp.f32 %v1125_v54  ;;  %v934_v36 = vadd.f32 %v902_v34, %v886_v55 }
 0x186   :  { %v730_v22 = vperm.slane %v714_v47, 0  ;;  %v396_v59 = vrot.slane %v4846_v51, 1  ;;  %v571_v63 = vmax.f32 %v523_v53, %v539_v3  ;;  %v1156_v5 = vperm.slane %v4302_v62, 0  ;;  %v66_v47 = vld [vmem:[%s5855_s1 + $0x70] sm:$0xff] }
 0x187   :  { %v444_v9 = vrot.slane %v4846_v51, 2  ;;  %v839_v57 = vadd.f32 %v4821_v17, %v807_v56  ;;  %v492_v15 = vrot.slane %v4846_v51, 3  ;;  %v982_v23 = vadd.f32 %v950_v60, %v934_v36 }
 0x188   :  { %v746_v2 = vsub.f32 %v4796_v41, %v730_v22  ;;  %v428_v31 = vmax.f32 %v4846_v51, %v396_v59  ;;  %v619_v11 = vmax.f32 %v571_v63, %v587_v10  ;;  %v1172_v13 = vmul.f32 %v4750_v32, %v1156_v5 }
 0x189   :  { %v540_v41 = vrot.slane %v4846_v51, 4  ;;  %v855_v48 = vrot.slane %v4821_v17, 2  ;;  %v588_v25 = vrot.slane %v4846_v51, 5  ;;  %v636_v26 = vrot.slane %v4846_v51, 6 }
 0x18a   :  { %v476_v14 = vmax.f32 %v428_v31, %v444_v9  ;;  %v772_v16 = vmul.f32 1.442695, %v746_v2  ;;  %v667_v19 = vmax.f32 %v619_v11, %v635_v49  ;;  %4071 = vmatmul.msk.f32.gmra.mxu0 %vm1184_vm1, %v1172_v13  ;;  %v4872_v32 = vpop.eup %4303  ;;  %v684_v28 = vrot.slane %v4846_v51, 7 }
 0x18b   :  { %v343_v21 = vpop.f32.mrf.mxu3  ;;  %v1030_v29 = vadd.f32 %v998_v61, %v982_v23  ;;  %v887_v30 = vadd.f32 %v855_v48, %v839_v57  ;;  %v903_v58 = vrot.slane %v4821_v17, 3  ;;  %v951_v8 = vrot.slane %v4821_v17, 4  ;;  %v4306_v35 = vpop.eup %4305  ;;  %v67_v48 = vld [vmem:[%s5855_s1 + $0x78] sm:$0xff] }
 0x18c   :  { %v524_v24 = vmax.f32 %v476_v14, %v492_v15  ;;  %v4870_v27 = vadd.f32 %v343_v21, %v65_v12  ;;  %v715_v44 = vmax.f32 %v667_v19, %v683_v50  ;;  %4307 = vpow2.f32 %v772_v16 }
 0x18d   :  { %v999_v37 = vrot.slane %v4821_v17, 5  ;;  %v1047_v39 = vrot.slane %v4821_v17, 6  ;;  %v1157_v40 = vperm.slane %v4306_v35, 0  ;;  %v1078_v18 = vadd.f32 %v1046_v0, %v1030_v29 }
 0x18e   :  { %v572_v33 = vmax.f32 %v524_v24, %v540_v41  ;;  %v397_v34 = vrot.slane %v4870_v27, 1  ;;  %v731_v38 = vperm.slane %v715_v44, 0  ;;  %v445_v45 = vrot.slane %v4870_v27, 2 }
 0x18f   :  { %v493_v46 = vrot.slane %v4870_v27, 3  ;;  %v935_v49 = vadd.f32 %v903_v58, %v887_v30  ;;  %v1173_v53 = vmul.f32 %v4774_v4, %v1157_v40  ;;  %v808_v55 = vrot.slane %v4848_v52, 1 }
 0x190   :  { %v620_v3 = vmax.f32 %v572_v33, %v588_v25  ;;  %v429_v43 = vmax.f32 %v4870_v27, %v397_v34  ;;  %v747_v10 = vsub.f32 %v4824_v20, %v731_v38  ;;  %v541_v22 = vrot.slane %v4870_v27, 4 }
 0x191   :  { %v1126_v59 = vadd.f32 %v1094_v1, %v1078_v18  ;;  %v983_v20 = vadd.f32 %v951_v8, %v935_v49  ;;  %v589_v63 = vrot.slane %v4870_v27, 5  ;;  %v637_v4 = vrot.slane %v4870_v27, 6 }
 0x192   :  { %v668_v50 = vmax.f32 %v620_v3, %v636_v26  ;;  %v477_v54 = vmax.f32 %v429_v43, %v445_v45  ;;  %v774_v56 = vmul.f32 1.442695, %v747_v10  ;;  %4072 = vmatmul.msk.f32.gmra.mxu0 %vm1184_vm1, %v1173_v53  ;;  %v4894_v2 = vpop.eup %4307  ;;  %v685_v5 = vrot.slane %v4870_v27, 7 }
 0x193   :  { %v346_v60 = vpop.f32.mrf.mxu3  ;;  %v1031_v31 = vadd.f32 %v999_v37, %v983_v20  ;;  %v840_v9 = vadd.f32 %v4848_v52, %v808_v55  ;;  %4309 = vrcp.f32 %v1126_v59  ;;  %v1095_v36 = vrot.slane %v4821_v17, 7 }
 0x194   :  { %v716_v61 = vmax.f32 %v668_v50, %v684_v28  ;;  %v525_v62 = vmax.f32 %v477_v54, %v493_v46  ;;  %v4892_v0 = vadd.f32 %v346_v60, %v66_v47  ;;  %4311 = vpow2.f32 %v774_v56 }
 0x195   :  { %v856_v57 = vrot.slane %v4848_v52, 2  ;;  %v904_v13 = vrot.slane %v4848_v52, 3  ;;  %v952_v16 = vrot.slane %v4848_v52, 4  ;;  %v1079_v23 = vadd.f32 %v1047_v39, %v1031_v31 }
 0x196   :  { %v732_v1 = vperm.slane %v716_v61, 0  ;;  %v573_v11 = vmax.f32 %v525_v62, %v541_v22  ;;  %v398_v12 = vrot.slane %v4892_v0, 1  ;;  %v446_v41 = vrot.slane %v4892_v0, 2 }
 0x197   :  { %v494_v21 = vrot.slane %v4892_v0, 3  ;;  %v888_v24 = vadd.f32 %v856_v57, %v840_v9  ;;  %v542_v44 = vrot.slane %v4892_v0, 4  ;;  %v590_v28 = vrot.slane %v4892_v0, 5 }
 0x198   :  { %v621_v14 = vmax.f32 %v573_v11, %v589_v63  ;;  %v430_v15 = vmax.f32 %v4892_v0, %v398_v12  ;;  %v748_v19 = vsub.f32 %v4846_v51, %v732_v1  ;;  %v638_v29 = vrot.slane %v4892_v0, 6 }
 0x199   :  { %v1127_v30 = vadd.f32 %v1095_v36, %v1079_v23  ;;  %v936_v34 = vadd.f32 %v904_v13, %v888_v24  ;;  %v809_v51 = vrot.slane %v4872_v32, 1  ;;  %v4310_v58 = vpop.eup %4309  ;;  %v686_v38 = vrot.slane %v4892_v0, 7 }
 0x19a   :  { %v669_v25 = vmax.f32 %v621_v14, %v637_v4  ;;  %v478_v26 = vmax.f32 %v430_v15, %v446_v41  ;;  %v4918_v39 = vpop.eup %4311  ;;  %v776_v3 = vmul.f32 1.442695, %v748_v19  ;;  %v1158_v40 = vperm.slane %v4310_v58, 0 }
 0x19b   :  { %v349_v33 = vpop.f32.mrf.mxu3  ;;  %4313 = vrcp.f32 %v1127_v30  ;;  %v984_v43 = vadd.f32 %v952_v16, %v936_v34  ;;  %v1000_v18 = vrot.slane %v4848_v52, 5  ;;  %v1048_v49 = vrot.slane %v4848_v52, 6 }
 0x19c   :  { %v717_v8 = vmax.f32 %v669_v25, %v685_v5  ;;  %v526_v35 = vmax.f32 %v478_v26, %v494_v21  ;;  %v4916_v37 = vadd.f32 %v349_v33, %v67_v48  ;;  %v1174_v47 = vmul.f32 %v4798_v42, %v1158_v40 }
 0x19d   :  { %v1096_v50 = vrot.slane %v4848_v52, 7  ;;  %v841_v53 = vadd.f32 %v4872_v32, %v809_v51  ;;  %4315 = vpow2.f32 %v776_v3  ;;  %v1032_v60 = vadd.f32 %v1000_v18, %v984_v43 }
 0x19e   :  { %v733_v45 = vperm.slane %v717_v8, 0  ;;  %v574_v10 = vmax.f32 %v526_v35, %v542_v44  ;;  %v399_v46 = vrot.slane %v4916_v37, 1  ;;  %v447_v22 = vrot.slane %v4916_v37, 2  ;;  %4073 = vmatmul.msk.f32.gmra.mxu0 %vm1184_vm1, %v1174_v47 }
 0x19f   :  { %v495_v59 = vrot.slane %v4916_v37, 3  ;;  %v857_v42 = vrot.slane %v4872_v32, 2  ;;  %v543_v62 = vrot.slane %v4916_v37, 4  ;;  %v591_v63 = vrot.slane %v4916_v37, 5 }
 0x1a0   :  { %v749_v54 = vsub.f32 %v4870_v27, %v733_v45  ;;  %v622_v55 = vmax.f32 %v574_v10, %v590_v28  ;;  %v431_v56 = vmax.f32 %v4916_v37, %v399_v46  ;;  %v639_v4 = vrot.slane %v4916_v37, 6 }
 0x1a1   :  { %v4314_v27 = vpop.eup %4313  ;;  %v1080_v5 = vadd.f32 %v1048_v49, %v1032_v60  ;;  %v889_v31 = vadd.f32 %v857_v42, %v841_v53  ;;  %v905_v9 = vrot.slane %v4872_v32, 3  ;;  %v953_v14 = vrot.slane %v4872_v32, 4 }
 0x1a2   :  { %v670_v20 = vmax.f32 %v622_v55, %v638_v29  ;;  %v479_v61 = vmax.f32 %v431_v56, %v447_v22  ;;  %v778_v1 = vmul.f32 1.442695, %v749_v54  ;;  %v1159_v12 = vperm.slane %v4314_v27, 0 }
 0x1a3   :  { %v1128_v57 = vadd.f32 %v1096_v50, %v1080_v5  ;;  %v937_v13 = vadd.f32 %v905_v9, %v889_v31  ;;  %v810_v15 = vrot.slane %v4894_v2, 1  ;;  %v1001_v21 = vrot.slane %v4872_v32, 5  ;;  %v4940_v23 = vpop.eup %4315 }
 0x1a4   :  { %v718_v11 = vmax.f32 %v670_v20, %v686_v38  ;;  %v527_v36 = vmax.f32 %v479_v61, %v495_v59  ;;  %v1175_v16 = vmul.f32 %v4821_v17, %v1159_v12  ;;  %v858_v25 = vrot.slane %v4894_v2, 2 }
 0x1a5   :  { %4317 = vrcp.f32 %v1128_v57  ;;  %v985_v48 = vadd.f32 %v953_v14, %v937_v13  ;;  %v842_v24 = vadd.f32 %v4894_v2, %v810_v15  ;;  %v687_v28 = vrot.slane %v4916_v37, 7 }
 0x1a6   :  { %v734_v41 = vperm.slane %v718_v11, 0  ;;  %v575_v19 = vmax.f32 %v527_v36, %v543_v62  ;;  %v1049_v29 = vrot.slane %v4872_v32, 6  ;;  %4319 = vpow2.f32 %v778_v1  ;;  %4074 = vmatmul.msk.f32.gmra.mxu0 %vm1184_vm1, %v1175_v16 }
 0x1a7   :  { %v1033_v17 = vadd.f32 %v1001_v21, %v985_v48  ;;  %v890_v30 = vadd.f32 %v858_v25, %v842_v24  ;;  %v906_v33 = vrot.slane %v4894_v2, 3  ;;  %v1097_v58 = vrot.slane %v4872_v32, 7 }
 0x1a8   :  { %v750_v26 = vsub.f32 %v4892_v0, %v734_v41  ;;  %v623_v44 = vmax.f32 %v575_v19, %v591_v63  ;;  %v811_v8 = vrot.slane %v4918_v39, 1  ;;  %v954_v38 = vrot.slane %v4894_v2, 4 }
 0x1a9   :  { %v1081_v35 = vadd.f32 %v1049_v29, %v1033_v17  ;;  %v938_v0 = vadd.f32 %v906_v33, %v890_v30  ;;  %v1002_v3 = vrot.slane %v4894_v2, 5  ;;  %v1050_v43 = vrot.slane %v4894_v2, 6 }
 0x1aa   :  { %v780_v34 = vmul.f32 1.442695, %v750_v26  ;;  %v671_v51 = vmax.f32 %v623_v44, %v639_v4  ;;  %v843_v45 = vadd.f32 %v4918_v39, %v811_v8  ;;  %v859_v10 = vrot.slane %v4918_v39, 2 }
 0x1ab   :  { %v4318_v46 = vpop.eup %4317  ;;  %v1129_v18 = vadd.f32 %v1097_v58, %v1081_v35  ;;  %v986_v47 = vadd.f32 %v954_v38, %v938_v0  ;;  %v907_v49 = vrot.slane %v4918_v39, 3  ;;  %v812_v55 = vrot.slane %v4940_v23, 1 }
 0x1ac   :  { %v719_v40 = vmax.f32 %v671_v51, %v687_v28  ;;  %4321 = vpow2.f32 %v780_v34  ;;  %v1160_v53 = vperm.slane %v4318_v46, 0  ;;  %v891_v54 = vadd.f32 %v859_v10, %v843_v45  ;;  %v4958_v56 = vpop.eup %4319 }
 0x1ad   :  { %4323 = vrcp.f32 %v1129_v18  ;;  %v1034_v22 = vadd.f32 %v1002_v3, %v986_v47  ;;  %v955_v59 = vrot.slane %v4918_v39, 4  ;;  %v860_v60 = vrot.slane %v4940_v23, 2 }
 0x1ae   :  { %v735_v50 = vperm.slane %v719_v40, 0  ;;  %v1176_v20 = vmul.f32 %v4848_v52, %v1160_v53  ;;  %v939_v61 = vadd.f32 %v907_v49, %v891_v54  ;;  %v844_v62 = vadd.f32 %v4940_v23, %v812_v55 }
 0x1af   :  { %v1082_v63 = vadd.f32 %v1050_v43, %v1034_v22  ;;  %v1098_v27 = vrot.slane %v4894_v2, 7  ;;  %v1003_v4 = vrot.slane %v4918_v39, 5  ;;  %v908_v1 = vrot.slane %v4940_v23, 3 }
 0x1b0   :  { %v751_v42 = vsub.f32 %v4916_v37, %v735_v50  ;;  %4075 = vmatmul.msk.f32.gmra.mxu0 %vm1184_vm1, %v1176_v20  ;;  %v987_v31 = vadd.f32 %v955_v59, %v939_v61  ;;  %v892_v9 = vadd.f32 %v860_v60, %v844_v62  ;;  %v1051_v52 = vrot.slane %v4918_v39, 6 }
 0x1b1   :  { %v1130_v37 = vadd.f32 %v1098_v27, %v1082_v63  ;;  %v813_v12 = vrot.slane %v4958_v56, 1  ;;  %v956_v13 = vrot.slane %v4940_v23, 4  ;;  %v1099_v15 = vrot.slane %v4918_v39, 7 }
 0x1b2   :  { %v782_v5 = vmul.f32 1.442695, %v751_v42  ;;  %v4969_v11 = vpop.eup %4321  ;;  %v1035_v36 = vadd.f32 %v1003_v4, %v987_v31  ;;  %v940_v57 = vadd.f32 %v908_v1, %v892_v9  ;;  %v861_v16 = vrot.slane %v4958_v56, 2 }
 0x1b3   :  { %v4324_v14 = vpop.eup %4323  ;;  %v845_v41 = vadd.f32 %v4958_v56, %v813_v12  ;;  %v1004_v24 = vrot.slane %v4940_v23, 5  ;;  %v909_v26 = vrot.slane %v4958_v56, 3  ;;  %v814_v44 = vrot.slane %v4969_v11, 1 }
 0x1b4   :  { %4325 = vpow2.f32 %v782_v5  ;;  %v1161_v19 = vperm.slane %v4324_v14, 0  ;;  %v1083_v21 = vadd.f32 %v1051_v52, %v1035_v36  ;;  %v988_v48 = vadd.f32 %v956_v13, %v940_v57 }
 0x1b5   :  { %4327 = vrcp.f32 %v1130_v37  ;;  %v893_v25 = vadd.f32 %v861_v16, %v845_v41  ;;  %v1052_v30 = vrot.slane %v4940_v23, 6  ;;  %v957_v34 = vrot.slane %v4958_v56, 4 }
 0x1b6   :  { %v1177_v28 = vmul.f32 %v4872_v32, %v1161_v19  ;;  %v1131_v29 = vadd.f32 %v1099_v15, %v1083_v21  ;;  %v1036_v17 = vadd.f32 %v1004_v24, %v988_v48  ;;  %v846_v51 = vadd.f32 %v4969_v11, %v814_v44 }
 0x1b7   :  { %v941_v33 = vadd.f32 %v909_v26, %v893_v25  ;;  %v862_v58 = vrot.slane %v4969_v11, 2  ;;  %v1100_v0 = vrot.slane %v4940_v23, 7  ;;  %v1005_v32 = vrot.slane %v4958_v56, 5 }
 0x1b8   :  { %4076 = vmatmul.msk.f32.gmra.mxu0 %vm1184_vm1, %v1177_v28  ;;  %4329 = vrcp.f32 %v1131_v29  ;;  %v1084_v35 = vadd.f32 %v1052_v30, %v1036_v17  ;;  %v910_v43 = vrot.slane %v4969_v11, 3  ;;  %v1053_v53 = vrot.slane %v4958_v56, 6 }
 0x1b9   :  { %v989_v3 = vadd.f32 %v957_v34, %v941_v33  ;;  %v894_v40 = vadd.f32 %v862_v58, %v846_v51  ;;  %v958_v54 = vrot.slane %v4969_v11, 4  ;;  %v1101_v61 = vrot.slane %v4958_v56, 7 }
 0x1ba   :  { %v4985_v8 = vpop.eup %4325  ;;  %v1132_v46 = vadd.f32 %v1100_v0, %v1084_v35  ;;  %v1006_v62 = vrot.slane %v4969_v11, 5  ;;  %v1054_v9 = vrot.slane %v4969_v11, 6  ;;  %v1102_v36 = vrot.slane %v4969_v11, 7 }
 0x1bb   :  { %v4328_v38 = vpop.eup %4327  ;;  %v815_v45 = vrot.slane %v4985_v8, 1  ;;  %v1037_v18 = vadd.f32 %v1005_v32, %v989_v3  ;;  %v942_v47 = vadd.f32 %v910_v43, %v894_v40  ;;  %v863_v55 = vrot.slane %v4985_v8, 2 }
 0x1bc   :  { %v1162_v10 = vperm.slane %v4328_v38, 0  ;;  %4331 = vrcp.f32 %v1132_v46  ;;  %v959_v1 = vrot.slane %v4985_v8, 4  ;;  %v1007_v57 = vrot.slane %v4985_v8, 5 }
 0x1bd   :  { %v847_v49 = vadd.f32 %v4985_v8, %v815_v45  ;;  %v1085_v59 = vadd.f32 %v1053_v53, %v1037_v18  ;;  %v990_v60 = vadd.f32 %v958_v54, %v942_v47  ;;  %v1055_v41 = vrot.slane %v4985_v8, 6 }
 0x1be   :  { %v1178_v50 = vmul.f32 %v4894_v2, %v1162_v10  ;;  %v4330_v22 = vpop.eup %4329  ;;  %v911_v2 = vrot.slane %v4985_v8, 3  ;;  %v1103_v21 = vrot.slane %v4985_v8, 7 }
 0x1bf   :  { %v895_v42 = vadd.f32 %v863_v55, %v847_v49  ;;  %v1163_v20 = vperm.slane %v4330_v22, 0  ;;  %v1133_v63 = vadd.f32 %v1101_v61, %v1085_v59  ;;  %v1038_v27 = vadd.f32 %v1006_v62, %v990_v60 }
 0x1c0   :  { %4077 = vmatmul.msk.f32.gmra.mxu0 %vm1184_vm1, %v1178_v50 }
 0x1c1   :  { %v943_v4 = vadd.f32 %v911_v2, %v895_v42  ;;  %v1179_v5 = vmul.f32 %v4918_v39, %v1163_v20  ;;  %4333 = vrcp.f32 %v1133_v63  ;;  %v1086_v37 = vadd.f32 %v1054_v9, %v1038_v27 }
 0x1c2   :  { %v4332_v31 = vpop.eup %4331 }
 0x1c3   :  { %v991_v52 = vadd.f32 %v959_v1, %v943_v4  ;;  %v1164_v12 = vperm.slane %v4332_v31, 0  ;;  %v1134_v13 = vadd.f32 %v1102_v36, %v1086_v37 }
 0x1c5   :  { %v1039_v14 = vadd.f32 %v1007_v57, %v991_v52  ;;  %v1180_v15 = vmul.f32 %v4940_v23, %v1164_v12  ;;  %4335 = vrcp.f32 %v1134_v13  ;;  %v5016_v23 = vld [vmem:[%s5862_s8] sm:$0xff] }
 0x1c6   :  { %v148_v44 = vperm.slane %v5016_v23, 2 }
 0x1c7   :  { %v4334_v39 = vpop.eup %4333  ;;  %v1087_v16 = vadd.f32 %v1055_v41, %v1039_v14 }
 0x1c8   :  { %4078 = vmatmul.msk.f32.gmra.mxu0 %vm1184_vm1, %v1179_v5  ;;  %v1165_v19 = vperm.slane %v4334_v39, 0  ;;  %v5023_v17 = vadd.f32 %v4626_v6, %v148_v44 }
 0x1c9   :  { %v1135_v48 = vadd.f32 %v1103_v21, %v1087_v16 }
 0x1ca   :  { %v1181_v24 = vmul.f32 %v4958_v56, %v1165_v19 }
 0x1cb   :  { %v4336_v25 = vpop.eup %4335  ;;  %4337 = vrcp.f32 %v1135_v48 }
 0x1cc   :  { %v1166_v26 = vperm.slane %v4336_v25, 0 }
 0x1ce   :  { %v1182_v28 = vmul.f32 %v4969_v11, %v1166_v26 }
 0x1d0   :  { %4079 = vmatmul.msk.f32.gmra.mxu0 %vm1184_vm1, %v1180_v15 }
 0x1d1   :  { %v4338_v29 = vpop.eup %4337 }
 0x1d2   :  { %v1167_v56 = vperm.slane %v4338_v29, 0 }
 0x1d4   :  { %v1183_v51 = vmul.f32 %v4985_v8, %v1167_v56 }
 0x1d8   :  { %4080 = vmatmul.msk.f32.gmra.mxu0 %vm1184_vm1, %v1181_v24 }
 0x1df   :  { %v1250_v30 = vpop.f32.mrf.mxu0 }
 0x1e0   :  { %4081 = vmatmul.msk.f32.gmra.mxu0 %vm1184_vm1, %v1182_v28  ;;  %v1298_v33 = vmul.f32 %v1250_v30, %v5023_v17 }
 0x1e2   :  { %v1330_v34 = vrot.slane %v1298_v33, 1  ;;  %v1378_v35 = vrot.slane %v1298_v33, 2  ;;  %v1426_v11 = vrot.slane %v1298_v33, 3  ;;  %v1474_v40 = vrot.slane %v1298_v33, 4 }
 0x1e3   :  { %v1522_v49 = vrot.slane %v1298_v33, 5  ;;  %v1570_v60 = vrot.slane %v1298_v33, 6  ;;  %v1618_v5 = vrot.slane %v1298_v33, 7 }
 0x1e4   :  { %v1362_v58 = vadd.f32 %v1330_v34, %v1298_v33 }
 0x1e6   :  { %v1410_v0 = vadd.f32 %v1378_v35, %v1362_v58 }
 0x1e8   :  { %4082 = vmatmul.msk.f32.gmra.mxu0 %vm1184_vm1, %v1183_v51  ;;  %v1253_v32 = vpop.f32.mrf.mxu0  ;;  %v1458_v6 = vadd.f32 %v1426_v11, %v1410_v0 }
 0x1e9   :  { %v1299_v38 = vmul.f32 %v1253_v32, %v5023_v17 }
 0x1ea   :  { %v1506_v10 = vadd.f32 %v1474_v40, %v1458_v6 }
 0x1eb   :  { %v1331_v3 = vrot.slane %v1299_v38, 1  ;;  %v1379_v45 = vrot.slane %v1299_v38, 2  ;;  %v1427_v46 = vrot.slane %v1299_v38, 3  ;;  %v1475_v53 = vrot.slane %v1299_v38, 4 }
 0x1ec   :  { %v1554_v54 = vadd.f32 %v1522_v49, %v1506_v10  ;;  %v1523_v59 = vrot.slane %v1299_v38, 5  ;;  %v1571_v62 = vrot.slane %v1299_v38, 6  ;;  %v1619_v31 = vrot.slane %v1299_v38, 7 }
 0x1ed   :  { %v1363_v43 = vadd.f32 %v1331_v3, %v1299_v38 }
 0x1ee   :  { %v1602_v2 = vadd.f32 %v1570_v60, %v1554_v54 }
 0x1ef   :  { %v1411_v18 = vadd.f32 %v1379_v45, %v1363_v43 }
 0x1f0   :  { %v1256_v47 = vpop.f32.mrf.mxu0  ;;  %v1650_v12 = vadd.f32 %v1618_v5, %v1602_v2 }
 0x1f1   :  { %v1300_v8 = vmul.f32 %v1256_v47, %v5023_v17  ;;  %v1459_v50 = vadd.f32 %v1427_v46, %v1411_v18 }
 0x1f2   :  { %v1666_v19 = vpack.c.bf16 %v1650_v12, %v1650_v12 }
 0x1f3   :  { %v1332_v55 = vrot.slane %v1300_v8, 1  ;;  %v1507_v22 = vadd.f32 %v1475_v53, %v1459_v50  ;;  %v1380_v20 = vrot.slane %v1300_v8, 2  ;;  %v1428_v27 = vrot.slane %v1300_v8, 3 }
 0x1f4   :  { %v1476_v37 = vrot.slane %v1300_v8, 4  ;;  %v1524_v13 = vrot.slane %v1300_v8, 5  ;;  %v1572_v39 = vrot.slane %v1300_v8, 6  ;;  %v1620_v24 = vrot.slane %v1300_v8, 7 }
 0x1f5   :  { %v1364_v42 = vadd.f32 %v1332_v55, %v1300_v8  ;;  %v1555_v61 = vadd.f32 %v1523_v59, %v1507_v22  ;;  %v1703_v33 = vunpack.c.l.b16 %v1666_v19 }
 0x1f7   :  { %v1412_v63 = vadd.f32 %v1380_v20, %v1364_v42  ;;  %v1603_v4 = vadd.f32 %v1571_v62, %v1555_v61 }
 0x1f9   :  { %v1259_v9 = vpop.f32.mrf.mxu0  ;;  %v1460_v1 = vadd.f32 %v1428_v27, %v1412_v63  ;;  %v1651_v36 = vadd.f32 %v1619_v31, %v1603_v4 }
 0x1fa   :  { %v1301_v52 = vmul.f32 %v1259_v9, %v5023_v17 }
 0x1fb   :  { %v1508_v57 = vadd.f32 %v1476_v37, %v1460_v1  ;;  %v1667_v21 = vpack.c.bf16 %v1651_v36, %v1651_v36 }
 0x1fc   :  { %v1333_v14 = vrot.slane %v1301_v52, 1  ;;  %v1381_v16 = vrot.slane %v1301_v52, 2  ;;  %v1429_v26 = vrot.slane %v1301_v52, 3  ;;  %v1477_v30 = vrot.slane %v1301_v52, 4 }
 0x1fd   :  { %v1556_v15 = vadd.f32 %v1524_v13, %v1508_v57  ;;  %v1704_v28 = vunpack.c.l.b16 %v1667_v21  ;;  %v1525_v35 = vrot.slane %v1301_v52, 5  ;;  %v1573_v38 = vrot.slane %v1301_v52, 6 }
 0x1fe   :  { %v1365_v41 = vadd.f32 %v1333_v14, %v1301_v52  ;;  %v1621_v45 = vrot.slane %v1301_v52, 7 }
 0x1ff   :  { %v1604_v48 = vadd.f32 %v1572_v39, %v1556_v15  ;;  %v1719_v34 = vrot.slane %v1704_v28, 7 }
 0x200   :  { %v1413_v25 = vadd.f32 %v1381_v16, %v1365_v41 }
 0x201   :  { %v1652_v29 = vadd.f32 %v1620_v24, %v1604_v48  ;;  %v1721_v0 = vsel %vm1720_vm2, %v1719_v34, %v1703_v33 }
 0x202   :  { %v1461_v56 = vadd.f32 %v1429_v26, %v1413_v25 }
 0x203   :  { %v1668_v51 = vpack.c.bf16 %v1652_v29, %v1652_v29 }
 0x204   :  { %v1509_v58 = vadd.f32 %v1477_v30, %v1461_v56 }
 0x205   :  { %v1705_v11 = vunpack.c.l.b16 %v1668_v51 }
 0x206   :  { %v1557_v32 = vadd.f32 %v1525_v35, %v1509_v58 }
 0x207   :  { %v1262_v6 = vpop.f32.mrf.mxu0  ;;  %v1722_v3 = vrot.slane %v1705_v11, 6 }
 0x208   :  { %v1302_v40 = vmul.f32 %v1262_v6, %v5023_v17  ;;  %v1605_v43 = vadd.f32 %v1573_v38, %v1557_v32 }
 0x209   :  { %v1724_v10 = vsel %vm1723_vm3, %v1722_v3, %v1721_v0 }
 0x20a   :  { %v1334_v46 = vrot.slane %v1302_v40, 1  ;;  %v1653_v18 = vadd.f32 %v1621_v45, %v1605_v43  ;;  %v1382_v49 = vrot.slane %v1302_v40, 2  ;;  %v1430_v53 = vrot.slane %v1302_v40, 3 }
 0x20b   :  { %v1478_v60 = vrot.slane %v1302_v40, 4  ;;  %v1526_v62 = vrot.slane %v1302_v40, 5  ;;  %v1574_v5 = vrot.slane %v1302_v40, 6  ;;  %v1622_v37 = vrot.slane %v1302_v40, 7 }
 0x20c   :  { %v1366_v47 = vadd.f32 %v1334_v46, %v1302_v40  ;;  %v1669_v8 = vpack.c.bf16 %v1653_v18, %v1653_v18 }
 0x20e   :  { %v1414_v50 = vadd.f32 %v1382_v49, %v1366_v47  ;;  %v1706_v55 = vunpack.c.l.b16 %v1669_v8 }
 0x20f   :  { %v1265_v54 = vpop.f32.mrf.mxu0 }
 0x210   :  { %v1303_v22 = vmul.f32 %v1265_v54, %v5023_v17  ;;  %v1462_v59 = vadd.f32 %v1430_v53, %v1414_v50  ;;  %v1725_v42 = vrot.slane %v1706_v55, 5 }
 0x212   :  { %v1335_v20 = vrot.slane %v1303_v22, 1  ;;  %v1510_v61 = vadd.f32 %v1478_v60, %v1462_v59  ;;  %v1383_v63 = vrot.slane %v1303_v22, 2  ;;  %v1727_v27 = vsel %vm1726_vm4, %v1725_v42, %v1724_v10 }
 0x213   :  { %v1431_v9 = vrot.slane %v1303_v22, 3  ;;  %v1479_v12 = vrot.slane %v1303_v22, 4  ;;  %v1527_v13 = vrot.slane %v1303_v22, 5  ;;  %v1575_v41 = vrot.slane %v1303_v22, 6 }
 0x214   :  { %v1367_v2 = vadd.f32 %v1335_v20, %v1303_v22  ;;  %v1558_v4 = vadd.f32 %v1526_v62, %v1510_v61  ;;  %v1623_v48 = vrot.slane %v1303_v22, 7 }
 0x216   :  { %v1415_v31 = vadd.f32 %v1383_v63, %v1367_v2  ;;  %v1606_v1 = vadd.f32 %v1574_v5, %v1558_v4 }
 0x218   :  { %v1463_v52 = vadd.f32 %v1431_v9, %v1415_v31  ;;  %v1654_v36 = vadd.f32 %v1622_v37, %v1606_v1 }
 0x21a   :  { %v1511_v57 = vadd.f32 %v1479_v12, %v1463_v52  ;;  %v1670_v14 = vpack.c.bf16 %v1654_v36, %v1654_v36  ;;  %v5048_v52 = vadd.f32 %v4629_v7, %v148_v44  ;;  %v4249_v36 = vld [vmem:[%s5859_s5 + $0x8] sm:$0xff] }
 0x21b   :  { %v1268_v15 = vpop.f32.mrf.mxu0  ;;  %1776 = vmatpush.bf16.msra.mxu1 %v4249_v36 }
 0x21c   :  { %v1559_v39 = vadd.f32 %v1527_v13, %v1511_v57  ;;  %v1304_v16 = vmul.f32 %v1268_v15, %v5023_v17  ;;  %v1707_v19 = vunpack.c.l.b16 %v1670_v14  ;;  %v4248_v13 = vld [vmem:[%s5859_s5] sm:$0xff] }
 0x21e   :  { %v1607_v21 = vadd.f32 %v1575_v41, %v1559_v39  ;;  %v1336_v24 = vrot.slane %v1304_v16, 1  ;;  %v1384_v28 = vrot.slane %v1304_v16, 2  ;;  %v1728_v29 = vrot.slane %v1707_v19, 4 }
 0x21f   :  { %v1432_v33 = vrot.slane %v1304_v16, 3  ;;  %v1480_v11 = vrot.slane %v1304_v16, 4  ;;  %v1528_v3 = vrot.slane %v1304_v16, 5  ;;  %v1576_v46 = vrot.slane %v1304_v16, 6  ;;  %1777 = vmatpush.bf16.msra.mxu1 %v4248_v13 }
 0x220   :  { %v1655_v25 = vadd.f32 %v1623_v48, %v1607_v21  ;;  %v1368_v26 = vadd.f32 %v1336_v24, %v1304_v16  ;;  %v1730_v34 = vsel %vm1729_vm5, %v1728_v29, %v1727_v27  ;;  %v1624_v8 = vrot.slane %v1304_v16, 7 }
 0x222   :  { %v1671_v56 = vpack.c.bf16 %v1655_v25, %v1655_v25  ;;  %v1416_v30 = vadd.f32 %v1384_v28, %v1368_v26 }
 0x223   :  { %v1271_v51 = vpop.f32.mrf.mxu0 }
 0x224   :  { %v1708_v58 = vunpack.c.l.b16 %v1671_v56  ;;  %v1305_v35 = vmul.f32 %v1271_v51, %v5023_v17  ;;  %v1464_v0 = vadd.f32 %v1432_v33, %v1416_v30 }
 0x226   :  { %v1731_v32 = vrot.slane %v1708_v58, 3  ;;  %v1337_v38 = vrot.slane %v1305_v35, 1  ;;  %v1512_v6 = vadd.f32 %v1480_v11, %v1464_v0  ;;  %v1385_v43 = vrot.slane %v1305_v35, 2 }
 0x227   :  { %v1433_v47 = vrot.slane %v1305_v35, 3  ;;  %v1481_v17 = vrot.slane %v1305_v35, 4  ;;  %v1529_v22 = vrot.slane %v1305_v35, 5  ;;  %v1577_v60 = vrot.slane %v1305_v35, 6 }
 0x228   :  { %v1369_v40 = vadd.f32 %v1337_v38, %v1305_v35  ;;  %v1733_v45 = vsel %vm1732_vm6, %v1731_v32, %v1730_v34  ;;  %v1560_v10 = vadd.f32 %v1528_v3, %v1512_v6  ;;  %v1625_v61 = vrot.slane %v1305_v35, 7 }
 0x22a   :  { %v1417_v18 = vadd.f32 %v1385_v43, %v1369_v40  ;;  %v1608_v49 = vadd.f32 %v1576_v46, %v1560_v10 }
 0x22c   :  { %v1465_v53 = vadd.f32 %v1433_v47, %v1417_v18  ;;  %v1656_v54 = vadd.f32 %v1624_v8, %v1608_v49 }
 0x22d   :  { %v1274_v50 = vpop.f32.mrf.mxu0 }
 0x22e   :  { %v1513_v55 = vadd.f32 %v1481_v17, %v1465_v53  ;;  %v1672_v42 = vpack.c.bf16 %v1656_v54, %v1656_v54  ;;  %v5063_v15 = vmul.f32 %v1274_v50, %v5048_v52 }
 0x230   :  { %v1561_v59 = vadd.f32 %v1529_v22, %v1513_v55  ;;  %v1709_v62 = vunpack.c.l.b16 %v1672_v42  ;;  %v1338_v16 = vrot.slane %v5063_v15, 1  ;;  %v1386_v34 = vrot.slane %v5063_v15, 2 }
 0x231   :  { %v1482_v42 = vrot.slane %v5063_v15, 4 }
 0x232   :  { %v1609_v20 = vadd.f32 %v1577_v60, %v1561_v59  ;;  %v1734_v27 = vrot.slane %v1709_v62, 2  ;;  %v1370_v28 = vadd.f32 %v1338_v16, %v5063_v15 }
 0x234   :  { %v1657_v63 = vadd.f32 %v1625_v61, %v1609_v20  ;;  %v1736_v31 = vsel %vm1735_vm7, %v1734_v27, %v1733_v45  ;;  %v1418_v38 = vadd.f32 %v1386_v34, %v1370_v28  ;;  %v1434_v45 = vrot.slane %v5063_v15, 3 }
 0x235   :  { %v1277_v2 = vpop.f32.mrf.mxu0 }
 0x236   :  { %v1673_v4 = vpack.c.bf16 %v1657_v63, %v1657_v63  ;;  %v5054_v57 = vmul.f32 %v1277_v2, %v5048_v52  ;;  %v1466_v53 = vadd.f32 %v1434_v45, %v1418_v38 }
 0x238   :  { %v1710_v5 = vunpack.c.l.b16 %v1673_v4  ;;  %v1339_v44 = vrot.slane %v5054_v57, 1  ;;  %v1387_v25 = vrot.slane %v5054_v57, 2  ;;  %v1435_v58 = vrot.slane %v5054_v57, 3 }
 0x239   :  { %v1483_v49 = vrot.slane %v5054_v57, 4  ;;  %v1531_v63 = vrot.slane %v5054_v57, 5 }
 0x23a   :  { %v1737_v9 = vrot.slane %v1710_v5, 1  ;;  %v1371_v48 = vadd.f32 %v1339_v44, %v5054_v57  ;;  %v1514_v5 = vadd.f32 %v1482_v42, %v1466_v53  ;;  %v1530_v44 = vrot.slane %v5063_v15, 5 }
 0x23c   :  { %v5043_v37 = vsel %vm1738_vm8, %v1737_v9, %v1736_v31  ;;  %v1419_v33 = vadd.f32 %v1387_v25, %v1371_v48  ;;  %v1579_v48 = vrot.slane %v5054_v57, 6 }
 0x23d   :  { %v1280_v1 = vpop.f32.mrf.mxu0 }
 0x23e   :  { %v5060_v14 = vmul.f32 %v1280_v1, %v5048_v52  ;;  %v1467_v43 = vadd.f32 %v1435_v58, %v1419_v33 }
 0x240   :  { %v1340_v39 = vrot.slane %v5060_v14, 1  ;;  %v1388_v56 = vrot.slane %v5060_v14, 2  ;;  %v1436_v40 = vrot.slane %v5060_v14, 3  ;;  %v1484_v55 = vrot.slane %v5060_v14, 4 }
 0x241   :  { %v1515_v22 = vadd.f32 %v1483_v49, %v1467_v43  ;;  %v1628_v49 = vrot.slane %v5060_v14, 7 }
 0x242   :  { %v1372_v26 = vadd.f32 %v1340_v39, %v5060_v14 }
 0x243   :  { %v1563_v36 = vadd.f32 %v1531_v63, %v1515_v22 }
 0x244   :  { %v1420_v11 = vadd.f32 %v1388_v56, %v1372_v26 }
 0x245   :  { %v1283_v12 = vpop.f32.mrf.mxu0  ;;  %v1611_v33 = vadd.f32 %v1579_v48, %v1563_v36 }
 0x246   :  { %v5066_v7 = vmul.f32 %v1283_v12, %v5048_v52  ;;  %v1468_v47 = vadd.f32 %v1436_v40, %v1420_v11  ;;  %v1532_v12 = vrot.slane %v5060_v14, 5  ;;  %v1578_v11 = vrot.slane %v5063_v15, 6 }
 0x248   :  { %v1341_v19 = vrot.slane %v5066_v7, 1  ;;  %v1389_v51 = vrot.slane %v5066_v7, 2  ;;  %v1437_v46 = vrot.slane %v5066_v7, 3  ;;  %v1485_v20 = vrot.slane %v5066_v7, 4 }
 0x249   :  { %v1516_v2 = vadd.f32 %v1484_v55, %v1468_v47  ;;  %v1533_v39 = vrot.slane %v5066_v7, 5  ;;  %v1629_v53 = vrot.slane %v5066_v7, 7 }
 0x24a   :  { %v1373_v29 = vadd.f32 %v1341_v19, %v5066_v7 }
 0x24b   :  { %v1564_v19 = vadd.f32 %v1532_v12, %v1516_v2 }
 0x24c   :  { %v1421_v6 = vadd.f32 %v1389_v51, %v1373_v29  ;;  %v1562_v29 = vadd.f32 %v1530_v44, %v1514_v5 }
 0x24d   :  { %v1286_v41 = vpop.f32.mrf.mxu0 }
 0x24e   :  { %v5073_v21 = vmul.f32 %v1286_v41, %v5048_v52  ;;  %v1469_v17 = vadd.f32 %v1437_v46, %v1421_v6 }
 0x250   :  { %v1342_v24 = vrot.slane %v5073_v21, 1  ;;  %v1390_v0 = vrot.slane %v5073_v21, 2  ;;  %v1438_v18 = vrot.slane %v5073_v21, 3  ;;  %v1486_v62 = vrot.slane %v5073_v21, 4 }
 0x251   :  { %v1517_v31 = vadd.f32 %v1485_v20, %v1469_v17  ;;  %v1534_v16 = vrot.slane %v5073_v21, 5  ;;  %v1582_v38 = vrot.slane %v5073_v21, 6 }
 0x252   :  { %v1374_v30 = vadd.f32 %v1342_v24, %v5073_v21 }
 0x253   :  { %v1565_v28 = vadd.f32 %v1533_v39, %v1517_v31 }
 0x254   :  { %v1422_v3 = vadd.f32 %v1390_v0, %v1374_v30  ;;  %v1580_v30 = vrot.slane %v5060_v14, 6  ;;  %v1626_v14 = vrot.slane %v5063_v15, 7 }
 0x255   :  { %v1289_v35 = vpop.f32.mrf.mxu0 }
 0x256   :  { %v5088_v32 = vmul.f32 %v1289_v35, %v5048_v52  ;;  %v1470_v54 = vadd.f32 %v1438_v18, %v1422_v3  ;;  %v1581_v35 = vrot.slane %v5066_v7, 6  ;;  %v1612_v6 = vadd.f32 %v1580_v30, %v1564_v19 }
 0x257   :  { %v1627_v3 = vrot.slane %v5054_v57, 7  ;;  %v1610_v18 = vadd.f32 %v1578_v11, %v1562_v29 }
 0x258   :  { %v1343_v10 = vrot.slane %v5088_v32, 1  ;;  %v1391_v50 = vrot.slane %v5088_v32, 2  ;;  %v1439_v60 = vrot.slane %v5088_v32, 3  ;;  %v1487_v9 = vrot.slane %v5088_v32, 4 }
 0x259   :  { %v1518_v1 = vadd.f32 %v1486_v62, %v1470_v54  ;;  %v1535_v26 = vrot.slane %v5088_v32, 5  ;;  %v1583_v45 = vrot.slane %v5088_v32, 6  ;;  %v1659_v17 = vadd.f32 %v1627_v3, %v1611_v33 }
 0x25a   :  { %v1375_v8 = vadd.f32 %v1343_v10, %v5088_v32  ;;  %v1613_v10 = vadd.f32 %v1581_v35, %v1565_v28  ;;  %v1660_v55 = vadd.f32 %v1628_v49, %v1612_v6  ;;  %v1658_v12 = vadd.f32 %v1626_v14, %v1610_v18 }
 0x25b   :  { %v1566_v56 = vadd.f32 %v1534_v16, %v1518_v1 }
 0x25c   :  { %v1423_v59 = vadd.f32 %v1391_v50, %v1375_v8  ;;  %v1661_v42 = vadd.f32 %v1629_v53, %v1613_v10 }
 0x25d   :  { %v1292_v61 = vpop.f32.mrf.mxu0  ;;  %v1614_v47 = vadd.f32 %v1582_v38, %v1566_v56 }
 0x25e   :  { %v5105_v27 = vmul.f32 %v1292_v61, %v5048_v52  ;;  %v1471_v4 = vadd.f32 %v1439_v60, %v1423_v59  ;;  %v1631_v60 = vrot.slane %v5088_v32, 7  ;;  %v1677_v36 = vpack.c.bf16 %v1661_v42, %v1661_v42 }
 0x260   :  { %v1344_v13 = vrot.slane %v5105_v27, 1  ;;  %v1519_v41 = vadd.f32 %v1487_v9, %v1471_v4  ;;  %v1392_v25 = vrot.slane %v5105_v27, 2  ;;  %v1440_v51 = vrot.slane %v5105_v27, 3 }
 0x261   :  { %v1488_v46 = vrot.slane %v5105_v27, 4  ;;  %v1536_v57 = vrot.slane %v5105_v27, 5  ;;  %v1584_v61 = vrot.slane %v5105_v27, 6  ;;  %v1675_v4 = vpack.c.bf16 %v1659_v17, %v1659_v17 }
 0x262   :  { %v1376_v24 = vadd.f32 %v1344_v13, %v5105_v27  ;;  %v1567_v58 = vadd.f32 %v1535_v26, %v1519_v41  ;;  %v1632_v31 = vrot.slane %v5105_v27, 7  ;;  %v1714_v26 = vunpack.c.l.b16 %v1677_v36 }
 0x263   :  { %v1712_v16 = vunpack.c.l.b16 %v1675_v4 }
 0x264   :  { %v1424_v34 = vadd.f32 %v1392_v25, %v1376_v24  ;;  %v1615_v50 = vadd.f32 %v1583_v45, %v1567_v58  ;;  %v1674_v25 = vpack.c.bf16 %v1658_v12, %v1658_v12  ;;  %v1744_v35 = vrot.slane %v1714_v26, 5 }
 0x265   :  { %v1295_v0 = vpop.f32.mrf.mxu0  ;;  %v1740_v30 = vrot.slane %v1712_v16, 7 }
 0x266   :  { %v1313_v40 = vmul.f32 %v1295_v0, %v5048_v52  ;;  %v1472_v43 = vadd.f32 %v1440_v51, %v1424_v34  ;;  %v1630_v52 = vrot.slane %v5073_v21, 7  ;;  %v1663_v63 = vadd.f32 %v1631_v60, %v1615_v50 }
 0x267   :  { %v1676_v21 = vpack.c.bf16 %v1660_v55, %v1660_v55  ;;  %v1711_v58 = vunpack.c.l.b16 %v1674_v25  ;;  %v1686_v50 = vperm.slane %v5016_v23, 3 }
 0x268   :  { %v1345_v8 = vrot.slane %v1313_v40, 1  ;;  %v1520_v54 = vadd.f32 %v1488_v46, %v1472_v43  ;;  %v1393_v59 = vrot.slane %v1313_v40, 2  ;;  %v1662_v62 = vadd.f32 %v1630_v52, %v1614_v47 }
 0x269   :  { %v1441_v7 = vrot.slane %v1313_v40, 3  ;;  %v1489_v1 = vrot.slane %v1313_v40, 4  ;;  %v1537_v39 = vrot.slane %v1313_v40, 5  ;;  %v1679_v41 = vpack.c.bf16 %v1663_v63, %v1663_v63 }
 0x26a   :  { %v1377_v22 = vadd.f32 %v1345_v8, %v1313_v40  ;;  %v1568_v20 = vadd.f32 %v1536_v57, %v1520_v54  ;;  %v1678_v13 = vpack.c.bf16 %v1662_v62, %v1662_v62  ;;  %v1713_v19 = vunpack.c.l.b16 %v1676_v21  ;;  %v4438_v54 = vld [vmem:[#allocation2] sm:$0xff] }
 0x26b   :  { %v1585_v24 = vrot.slane %v1313_v40, 6  ;;  %v1633_v27 = vrot.slane %v1313_v40, 7  ;;  %v1716_v56 = vunpack.c.l.b16 %v1679_v41  ;;  %v1741_v38 = vsel %vm1720_vm2, %v1740_v30, %v1711_v58  ;;  %v4250_v41 = vld [vmem:[%s5860_s6] sm:$0xff] }
 0x26c   :  { %v1425_v2 = vadd.f32 %v1393_v59, %v1377_v22  ;;  %v1616_v5 = vadd.f32 %v1584_v61, %v1568_v20  ;;  %v1715_v28 = vunpack.c.l.b16 %v1678_v13  ;;  %v1742_v34 = vrot.slane %v1713_v19, 6  ;;  %v4439_v59 = vld [vmem:[#allocation2 + $0x8] sm:$0xff] }
 0x26d   :  { %v1748_v6 = vrot.slane %v1716_v56, 3  ;;  %v4517_v20 = vmov 32.0   ;;  %v4251_v13 = vld [vmem:[%s5860_s6 + $0x8] sm:$0xff] }
 0x26e   :  { %v1473_v9 = vadd.f32 %v1441_v7, %v1425_v2  ;;  %v1664_v32 = vadd.f32 %v1632_v31, %v1616_v5  ;;  %v1746_v0 = vrot.slane %v1715_v28, 4  ;;  %v1743_v3 = vsel %vm1723_vm3, %v1742_v34, %v1741_v38  ;;  %1870 = vmatpush.bf16.msra.mxu2 %v4251_v13 }
 0x26f   :  { %v1745_v10 = vsel %vm1726_vm4, %v1744_v35, %v1743_v3  ;;  %4339 = vrcp.f32 %v4517_v20 }
 0x270   :  { %v1521_v44 = vadd.f32 %v1489_v1, %v1473_v9  ;;  %v1680_v15 = vpack.c.bf16 %v1664_v32, %v1664_v32  ;;  %v1747_v40 = vsel %vm1729_vm5, %v1746_v0, %v1745_v10  ;;  %v1837_v0 = vperm.slane %v5016_v23, 4 }
 0x271   :  { %v1749_v46 = vsel %vm1732_vm6, %v1748_v6, %v1747_v40 }
 0x272   :  { %v1569_v48 = vadd.f32 %v1537_v39, %v1521_v44  ;;  %v1717_v33 = vunpack.c.l.b16 %v1680_v15  ;;  %1871 = vmatpush.bf16.msra.mxu2 %v4250_v41 }
 0x274   :  { %v1617_v29 = vadd.f32 %v1585_v24, %v1569_v48  ;;  %v1750_v43 = vrot.slane %v1717_v33, 2 }
 0x276   :  { %v1665_v51 = vadd.f32 %v1633_v27, %v1617_v29  ;;  %v1751_v47 = vsel %vm1735_vm7, %v1750_v43, %v1749_v46  ;;  %v1840_v43 = vperm.slane %v5016_v23, 5 }
 0x278   :  { %v1681_v11 = vpack.c.bf16 %v1665_v51, %v1665_v51 }
 0x27a   :  { %v1718_v45 = vunpack.c.l.b16 %v1681_v11 }
 0x27c   :  { %v1752_v18 = vrot.slane %v1718_v45, 1 }
 0x27e   :  { %v1753_v49 = vsel %vm1738_vm8, %v1752_v18, %v1751_v47  ;;  %v1848_v18 = vperm.slane %v5016_v23, 6 }
 0x27f   :  { %v1754_v8 = vpack.c.b16 %v1753_v49, %v5043_v37  ;;  %v4340_v37 = vpop.eup %4339 }
 0x280   :  { %v1793_v61 = vmul.f32 32.0, %v4340_v37  ;;  %vm1797_vm9 = vweird.f32 %v4340_v37 }
 0x281   :  { %4091 = vmatmul.msk.bf16.vlgmr.msra.gmra.mxu1 %vm93_vm0, %v1754_v8 }
 0x282   :  { %v1794_v14 = vsub.f32 1.0, %v1793_v61 }
 0x284   :  { %v1795_v62 = vmul.f32 %v4340_v37, %v1794_v14 }
 0x286   :  { %v1796_v2 = vadd.f32 %v4340_v37, %v1795_v62 }
 0x288   :  { %v5146_v7 = vsel %vm1797_vm9, %v4340_v37, %v1796_v2  ;;  %v4255_v37 = vld [vmem:[%s5861_s7 + $0x18] sm:$0xff]  ;;  %v4254_v2 = vld [vmem:[%s5861_s7 + $0x10] sm:$0xff] }
 0x289   :  { %1978 = vmatpush.bf16.msrb.mxu1 %v4255_v37 }
 0x28d   :  { %1979 = vmatpush.bf16.msrb.mxu1 %v4254_v2 }
 0x2fe   :  { %v1779_v53 = vpop.f32.mrf.mxu1 }
 0x2ff   :  { %v1780_v17 = vadd.f32 %v1779_v53, %v1686_v50 }
 0x301   :  { %v1784_v57 = vadd.f32 %v4438_v54, %v1780_v17 }
 0x303   :  { %v1786_v52 = vsel %vm93_vm0, %v1784_v57, 0.0 }
 0x304   :  { %1787 = vadd.xlane.f32.xlu0 %v1786_v52 }
 0x306   :  { %v1781_v55 = vpop.f32.mrf.mxu1 }
 0x307   :  { %v1782_v22 = vadd.f32 %v1781_v55, %v1686_v50 }
 0x309   :  { %v1785_v60 = vadd.f32 %v4439_v59, %v1782_v22 }
 0x30b   :  { %v1789_v42 = vsel %vm93_vm0, %v1785_v60, 0.0 }
 0x30c   :  { %1790 = vadd.xlane.f32.xlu0 %v1789_v42 }
 0x377   :  { %v1788_v63 = vpop.xlane.xlu0 %1787 }
 0x378   :  { %v1799_v4 = vmul.f32 %v5146_v7, %v1788_v63 }
 0x37a   :  { %v1801_v5 = vsub.f32 %v1784_v57, %v1799_v4 }
 0x37c   :  { %v1803_v31 = vmul.f32 %v1801_v5, %v1801_v5 }
 0x37e   :  { %v1805_v21 = vsel %vm93_vm0, %v1803_v31, 0.0 }
 0x37f   :  { %1806 = vadd.xlane.f32.xlu1 %v1805_v21  ;;  %v1791_v9 = vpop.xlane.xlu0 %1790 }
 0x380   :  { %v1800_v1 = vmul.f32 %v5146_v7, %v1791_v9 }
 0x382   :  { %v1802_v12 = vsub.f32 %v1785_v60, %v1800_v1  ;;  %v4253_v1 = vld [vmem:[%s5861_s7 + $0x8] sm:$0xff] }
 0x383   :  { %1980 = vmatpush.bf16.msrb.mxu1 %v4253_v1  ;;  %v4258_v1 = vld [vmem:[%s5858_s4 + $0x40] sm:$0xff] }
 0x384   :  { %v1804_v36 = vmul.f32 %v1802_v12, %v1802_v12 }
 0x386   :  { %v1808_v32 = vsel %vm93_vm0, %v1804_v36, 0.0 }
 0x387   :  { %1809 = vadd.xlane.f32.xlu1 %v1808_v32  ;;  %v4252_v32 = vld [vmem:[%s5861_s7] sm:$0xff] }
 0x388   :  { %1981 = vmatpush.bf16.msrb.mxu1 %v4252_v32  ;;  %v4261_v32 = vld [vmem:[%s5858_s4 + $0x58] sm:$0xff] }
 0x3f2   :  { %v1807_v44 = vpop.xlane.xlu1 %1806 }
 0x3f3   :  { %v1811_v39 = vmul.f32 %v1807_v44, %v5146_v7 }
 0x3f5   :  { %v1813_v16 = vadd.f32 1e-12, %v1811_v39 }
 0x3f7   :  { %4341 = vrsqrt.f32 %v1813_v16  ;;  %vm1821_vm11 = vweird.f32 %v1813_v16 }
 0x3fa   :  { %v1810_v15 = vpop.xlane.xlu1 %1809 }
 0x3fb   :  { %v1812_v19 = vmul.f32 %v1810_v15, %v5146_v7 }
 0x3fd   :  { %v4342_v48 = vpop.eup %4341  ;;  %v1814_v24 = vadd.f32 1e-12, %v1812_v19 }
 0x3fe   :  { %v1816_v25 = vmul.f32 %v4342_v48, %v1813_v16  ;;  %vm1822_vm10 = vweird.f32 %v4342_v48 }
 0x3ff   :  { %4343 = vrsqrt.f32 %v1814_v24  ;;  %vm1823_vm12 = vmor %vm1821_vm11, %vm1822_vm10  ;;  %vm1831_vm14 = vweird.f32 %v1814_v24  ;;  %vm1970_vm11 = vcmask 523264  }
 0x400   :  { %v1817_v26 = vmul.f32 %v4342_v48, %v1816_v25 }
 0x402   :  { %v1818_v28 = vmul.f32 0.5, %v1817_v26 }
 0x404   :  { %v1819_v29 = vsub.f32 1.5, %v1818_v28 }
 0x405   :  { %v4344_v27 = vpop.eup %4343 }
 0x406   :  { %v1820_v56 = vmul.f32 %v4342_v48, %v1819_v29  ;;  %v1826_v30 = vmul.f32 %v4344_v27, %v1814_v24  ;;  %vm1832_vm13 = vweird.f32 %v4344_v27 }
 0x407   :  { %vm1833_vm15 = vmor %vm1831_vm14, %vm1832_vm13 }
 0x408   :  { %v1827_v33 = vmul.f32 %v4344_v27, %v1826_v30  ;;  %v1824_v34 = vsel %vm1823_vm12, %v4342_v48, %v1820_v56 }
 0x409   :  { %v1835_v35 = vmul.f32 %v1824_v34, %v1801_v5 }
 0x40a   :  { %v1828_v51 = vmul.f32 0.5, %v1827_v33 }
 0x40b   :  { %v1838_v3 = vmul.f32 %v1837_v0, %v1835_v35 }
 0x40c   :  { %v1829_v58 = vsub.f32 1.5, %v1828_v51 }
 0x40d   :  { %v5162_v10 = vadd.f32 %v1840_v43, %v1838_v3 }
 0x40e   :  { %v1830_v11 = vmul.f32 %v4344_v27, %v1829_v58 }
 0x410   :  { %v1834_v38 = vsel %vm1833_vm15, %v4344_v27, %v1830_v11 }
 0x411   :  { %v1836_v6 = vmul.f32 %v1834_v38, %v1802_v12 }
 0x413   :  { %v1839_v45 = vmul.f32 %v1837_v0, %v1836_v6 }
 0x415   :  { %v5164_v40 = vadd.f32 %v1840_v43, %v1839_v45 }
 0x417   :  { %v1843_v46 = vpack.c.bf16 %v5164_v40, %v5162_v10 }
 0x419   :  { %4100 = vmatmul.msk.bf16.vlgmr.msra.gmra.mxu2 %vm93_vm0, %v1843_v46 }
 0x49c   :  { %v1873_v47 = vpop.f32.mrf.mxu2 }
 0x49d   :  { %v5170_v49 = vadd.f32 %v1873_v47, %v1848_v18 }
 0x49f   :  { %v5173_v8 = vmul.f32 0.70710677, %v5170_v49 }
 0x4a1   :  { %v1880_v50 = vand.u32 2147483647, %v5173_v8  ;;  %vm1924_vm9 = vcmp.ge.f32.partialorder %v5173_v8, 0.0 }
 0x4a3   :  { %v1882_v53 = vmul.f32 0.3275911, %v1880_v50  ;;  %v1912_v14 = vsub.f32 0.0, %v1880_v50 }
 0x4a4   :  { %v1875_v17 = vpop.f32.mrf.mxu2 }
 0x4a5   :  { %v1884_v54 = vadd.f32 1.0, %v1882_v53  ;;  %v5176_v57 = vadd.f32 %v1875_v17, %v1848_v18  ;;  %v1914_v31 = vmul.f32 %v1912_v14, %v1880_v50  ;;  %v1930_v18 = vmul.f32 0.5, %v5170_v49 }
 0x4a7   :  { %4345 = vrcp.f32 %v1884_v54  ;;  %v1879_v52 = vmul.f32 0.70710677, %v5176_v57  ;;  %v1916_v13 = vmul.f32 1.442695, %v1914_v31  ;;  %v1931_v47 = vmul.f32 0.5, %v5176_v57 }
 0x4a9   :  { %v1881_v55 = vand.u32 2147483647, %v1879_v52  ;;  %vm1925_vm10 = vcmp.ge.f32.partialorder %v1879_v52, 0.0 }
 0x4ab   :  { %v1883_v22 = vmul.f32 0.3275911, %v1881_v55  ;;  %v1913_v44 = vsub.f32 0.0, %v1881_v55 }
 0x4ad   :  { %v4346_v59 = vpop.eup %4345  ;;  %v1885_v60 = vadd.f32 1.0, %v1883_v22  ;;  %v1915_v19 = vmul.f32 %v1913_v44, %v1881_v55  ;;  %v1945_v55 = vperm.slane %v5016_v23, 7  ;;  %v4441_v44 = vld [vmem:[%s5856_s2 + $0x10] sm:$0xff] }
 0x4ae   :  { %v1888_v42 = vmul.f32 %v4346_v59, %v1884_v54 }
 0x4af   :  { %4347 = vrcp.f32 %v1885_v60  ;;  %v1918_v28 = vmul.f32 1.442695, %v1915_v19 }
 0x4b0   :  { %v1890_v20 = vsub.f32 2.0, %v1888_v42  ;;  %4349 = vpow2.f32 %v1916_v13 }
 0x4b1   :  { %4351 = vpow2.f32 %v1918_v28 }
 0x4b2   :  { %v1892_v61 = vmul.f32 %v4346_v59, %v1890_v20 }
 0x4b4   :  { %v1894_v62 = vmul.f32 1.0614054, %v1892_v61 }
 0x4b5   :  { %v4348_v63 = vpop.eup %4347 }
 0x4b6   :  { %v1896_v4 = vadd.f32 -1.4531521, %v1894_v62  ;;  %v1889_v5 = vmul.f32 %v4348_v63, %v1885_v60  ;;  %v4350_v56 = vpop.eup %4349 }
 0x4b7   :  { %v4352_v11 = vpop.eup %4351 }
 0x4b8   :  { %v1898_v21 = vmul.f32 %v1896_v4, %v1892_v61  ;;  %v1891_v9 = vsub.f32 2.0, %v1889_v5  ;;  %v4259_v5 = vld [vmem:[%s5858_s4 + $0x48] sm:$0xff] }
 0x4b9   :  { %2103 = vmatpush.bf16.msra.mxu1 %v4259_v5 }
 0x4ba   :  { %v1900_v12 = vadd.f32 1.4214138, %v1898_v21  ;;  %v1893_v36 = vmul.f32 %v4348_v63, %v1891_v9  ;;  %v4256_v9 = vld [vmem:[%s5858_s4 + $0x30] sm:$0xff] }
 0x4bc   :  { %v1902_v39 = vmul.f32 %v1900_v12, %v1892_v61  ;;  %v1895_v41 = vmul.f32 1.0614054, %v1893_v36 }
 0x4bd   :  { %2104 = vmatpush.bf16.msra.mxu1 %v4258_v1 }
 0x4be   :  { %v1904_v16 = vadd.f32 -0.28449672, %v1902_v39  ;;  %v1897_v15 = vadd.f32 -1.4531521, %v1895_v41  ;;  %v4260_v41 = vld [vmem:[%s5858_s4 + $0x50] sm:$0xff] }
 0x4c0   :  { %v1906_v48 = vmul.f32 %v1904_v16, %v1892_v61  ;;  %v1899_v24 = vmul.f32 %v1897_v15, %v1893_v36  ;;  %v4442_v16 = vld [vmem:[%s5856_s2 + $0x8] sm:$0xff] }
 0x4c2   :  { %v1908_v25 = vadd.f32 0.2548296, %v1906_v48  ;;  %v1901_v26 = vadd.f32 1.4214138, %v1899_v24  ;;  %v4443_v24 = vld [vmem:[%s5856_s2] sm:$0xff] }
 0x4c4   :  { %v1910_v29 = vmul.f32 %v1908_v25, %v1892_v61  ;;  %v1903_v27 = vmul.f32 %v1901_v26, %v1893_v36 }
 0x4c6   :  { %v1920_v30 = vmul.f32 %v4350_v56, %v1910_v29  ;;  %v1905_v33 = vadd.f32 -0.28449672, %v1903_v27 }
 0x4c8   :  { %v1922_v34 = vsub.f32 1.0, %v1920_v30  ;;  %v1907_v51 = vmul.f32 %v1905_v33, %v1893_v36 }
 0x4ca   :  { %v1909_v58 = vadd.f32 0.2548296, %v1907_v51  ;;  %v1926_v35 = vsub.f32 0.0, %v1922_v34  ;;  %v74_v51 = vld [vmem:[%s5862_s8 + $0x8] sm:$0xff] }
 0x4cc   :  { %v1911_v0 = vmul.f32 %v1909_v58, %v1893_v36  ;;  %v1928_v6 = vsel %vm1924_vm9, %v1922_v34, %v1926_v35  ;;  %v4440_v36 = vld [vmem:[%s5856_s2 + $0x18] sm:$0xff] }
 0x4cd   :  { %v1932_v45 = vadd.f32 1.0, %v1928_v6 }
 0x4ce   :  { %v1921_v38 = vmul.f32 %v4352_v11, %v1911_v0  ;;  %v2034_v0 = vperm.slane %v74_v51, 0 }
 0x4cf   :  { %v1934_v53 = vmul.f32 %v1932_v45, %v1930_v18 }
 0x4d0   :  { %v1923_v3 = vsub.f32 1.0, %v1921_v38 }
 0x4d2   :  { %v1927_v43 = vsub.f32 0.0, %v1923_v3 }
 0x4d4   :  { %v1929_v46 = vsel %vm1925_vm10, %v1923_v3, %v1927_v43  ;;  %v2037_v43 = vperm.slane %v74_v51, 1 }
 0x4d5   :  { %v1933_v50 = vadd.f32 1.0, %v1929_v46 }
 0x4d7   :  { %v1935_v17 = vmul.f32 %v1933_v50, %v1931_v47  ;;  %v4444_v50 = vld [vmem:[%s5857_s3] sm:$0xff] }
 0x4d9   :  { %v1936_v54 = vpack.c.bf16 %v1935_v17, %v1934_v53  ;;  %v4118_v53 = vld [vmem:[%s5862_s8 + $0x10] sm:$0xff] }
 0x4db   :  { %4117 = vmatmul.msk.bf16.vlgmr.msrb.gmra.mxu1 %vm1970_vm11, %v1936_v54  ;;  %v2049_v54 = vperm.slane %v4118_v53, 0 }
 0x4dc   :  { %2267 = vmatpush.msrb.mxu1 %v4440_v36 }
 0x4de   :  { %2268 = vmatpush.msrb.mxu1 %v4441_v44 }
 0x4e0   :  { %2269 = vmatpush.msrb.mxu1 %v4442_v16 }
 0x4e2   :  { %2270 = vmatpush.msrb.mxu1 %v4443_v24 }
 0x558   :  { %v1983_v8 = vpop.f32.mrf.mxu1 }
 0x559   :  { %v1984_v22 = vadd.f32 %v1983_v8, %v1945_v55 }
 0x55b   :  { %v1988_v59 = vadd.f32 %v1984_v22, %v5162_v10 }
 0x55d   :  { %v1990_v52 = vsel %vm93_vm0, %v1988_v59, 0.0 }
 0x55e   :  { %1991 = vadd.xlane.f32.xlu2 %v1990_v52 }
 0x560   :  { %v1985_v60 = vpop.f32.mrf.mxu1 }
 0x561   :  { %v1986_v49 = vadd.f32 %v1985_v60, %v1945_v55  ;;  %v2084_v55 = vperm.slane %v4118_v53, 1 }
 0x563   :  { %v1989_v57 = vadd.f32 %v1986_v49, %v5164_v40  ;;  %v4257_v40 = vld [vmem:[%s5858_s4 + $0x38] sm:$0xff] }
 0x564   :  { %2071 = vmatpush.bf16.msrb.mxu2 %v4257_v40 }
 0x565   :  { %v1993_v42 = vsel %vm93_vm0, %v1989_v57, 0.0 }
 0x566   :  { %1994 = vadd.xlane.f32.xlu2 %v1993_v42 }
 0x568   :  { %2072 = vmatpush.bf16.msrb.mxu2 %v4256_v9 }
 0x56c   :  { %2135 = vmatpush.bf16.msra.mxu2 %v4261_v32 }
 0x570   :  { %2136 = vmatpush.bf16.msra.mxu2 %v4260_v41 }
 0x5d1   :  { %v1992_v20 = vpop.xlane.xlu2 %1991 }
 0x5d2   :  { %v1996_v37 = vmul.f32 %v1992_v20, %v5146_v7 }
 0x5d4   :  { %v1998_v61 = vsub.f32 %v1988_v59, %v1996_v37 }
 0x5d6   :  { %v2000_v14 = vmul.f32 %v1998_v61, %v1998_v61 }
 0x5d8   :  { %v2002_v23 = vsel %vm93_vm0, %v2000_v14, 0.0 }
 0x5d9   :  { %2003 = vadd.xlane.f32.xlu0 %v2002_v23  ;;  %v1995_v62 = vpop.xlane.xlu2 %1994 }
 0x5da   :  { %v1997_v10 = vmul.f32 %v1995_v62, %v5146_v7 }
 0x5dc   :  { %v1999_v2 = vsub.f32 %v1989_v57, %v1997_v10 }
 0x5de   :  { %v2001_v63 = vmul.f32 %v1999_v2, %v1999_v2 }
 0x5e0   :  { %v2005_v4 = vsel %vm93_vm0, %v2001_v63, 0.0 }
 0x5e1   :  { %2006 = vadd.xlane.f32.xlu1 %v2005_v4 }
 0x64c   :  { %v2004_v31 = vpop.xlane.xlu0 %2003 }
 0x64d   :  { %v2008_v21 = vmul.f32 %v2004_v31, %v5146_v7 }
 0x64f   :  { %v2010_v12 = vadd.f32 1e-12, %v2008_v21 }
 0x651   :  { %4353 = vrsqrt.f32 %v2010_v12  ;;  %vm2018_vm13 = vweird.f32 %v2010_v12 }
 0x654   :  { %v2007_v13 = vpop.xlane.xlu1 %2006 }
 0x655   :  { %v2009_v39 = vmul.f32 %v2007_v13, %v5146_v7 }
 0x657   :  { %v4354_v15 = vpop.eup %4353  ;;  %v2011_v19 = vadd.f32 1e-12, %v2009_v39 }
 0x658   :  { %v2013_v48 = vmul.f32 %v4354_v15, %v2010_v12  ;;  %vm2019_vm12 = vweird.f32 %v4354_v15 }
 0x659   :  { %4355 = vrsqrt.f32 %v2011_v19  ;;  %vm2020_vm14 = vmor %vm2018_vm13, %vm2019_vm12  ;;  %vm2028_vm9 = vweird.f32 %v2011_v19 }
 0x65a   :  { %v2014_v25 = vmul.f32 %v4354_v15, %v2013_v48 }
 0x65c   :  { %v2015_v26 = vmul.f32 0.5, %v2014_v25 }
 0x65e   :  { %v2016_v28 = vsub.f32 1.5, %v2015_v26 }
 0x65f   :  { %v4356_v29 = vpop.eup %4355 }
 0x660   :  { %v2017_v27 = vmul.f32 %v4354_v15, %v2016_v28  ;;  %v2023_v56 = vmul.f32 %v4356_v29, %v2011_v19  ;;  %vm2029_vm15 = vweird.f32 %v4356_v29 }
 0x661   :  { %vm2030_vm10 = vmor %vm2028_vm9, %vm2029_vm15 }
 0x662   :  { %v2024_v30 = vmul.f32 %v4356_v29, %v2023_v56  ;;  %v2021_v33 = vsel %vm2020_vm14, %v4354_v15, %v2017_v27 }
 0x663   :  { %v2032_v35 = vmul.f32 %v2021_v33, %v1998_v61 }
 0x664   :  { %v2025_v34 = vmul.f32 0.5, %v2024_v30 }
 0x665   :  { %v2035_v3 = vmul.f32 %v2034_v0, %v2032_v35 }
 0x666   :  { %v2026_v58 = vsub.f32 1.5, %v2025_v34 }
 0x667   :  { %v5239_v46 = vadd.f32 %v2037_v43, %v2035_v3 }
 0x668   :  { %v2027_v11 = vmul.f32 %v4356_v29, %v2026_v58 }
 0x66a   :  { %v2031_v38 = vsel %vm2030_vm10, %v4356_v29, %v2027_v11 }
 0x66b   :  { %v2033_v6 = vmul.f32 %v2031_v38, %v1999_v2 }
 0x66d   :  { %v2036_v45 = vmul.f32 %v2034_v0, %v2033_v6 }
 0x66f   :  { %v5241_v18 = vadd.f32 %v2037_v43, %v2036_v45  ;;  %v4445_v45 = vld [vmem:[%s5855_s1] sm:$0xff] }
 0x671   :  { %v2043_v47 = vpack.c.bf16 %v5241_v18, %v5239_v46 }
 0x673   :  { %4132 = vmatmul.msk.bf16.vlgmr.msrb.gmra.mxu2 %vm93_vm0, %v2043_v47  ;;  %4145 = vmatmul.msk.bf16.vlgmr.msra.gmra.mxu1 %vm93_vm0, %v2043_v47 }
 0x674   :  { %3215 = vmatpush.msrb.mxu2 %v4444_v50 }
 0x683   :  { %4158 = vmatmul.msk.bf16.vlgmr.msra.gmra.mxu2 %vm93_vm0, %v2043_v47 }
 0x6f0   :  { %v2106_v17 = vpop.f32.mrf.mxu1 }
 0x6f1   :  { %v2107_v59 = vadd.f32 %v2106_v17, %v2084_v55 }
 0x6f6   :  { %v2074_v8 = vpop.f32.mrf.mxu2 }
 0x6f7   :  { %v2075_v22 = vadd.f32 %v2074_v8, %v2049_v54 }
 0x6f8   :  { %v2108_v42 = vpop.f32.mrf.mxu1 }
 0x6f9   :  { %v2159_v52 = vperm.slane %v2075_v22, 0  ;;  %v2145_v60 = vrot.slane %v2075_v22, 1  ;;  %v2109_v61 = vadd.f32 %v2108_v42, %v2084_v55  ;;  %v2146_v23 = vrot.slane %v2075_v22, 2 }
 0x6fa   :  { %v2147_v28 = vrot.slane %v2075_v22, 3  ;;  %v2148_v56 = vrot.slane %v2075_v22, 4  ;;  %v2149_v34 = vrot.slane %v2075_v22, 5  ;;  %v2150_v35 = vrot.slane %v2075_v22, 6 }
 0x6fb   :  { %v2191_v49 = vmul.f32 %v2159_v52, %v2107_v59  ;;  %v2160_v57 = vperm.slane %v2145_v60, 0  ;;  %v2161_v25 = vperm.slane %v2146_v23, 0  ;;  %v2151_v38 = vrot.slane %v2075_v22, 7  ;;  %v4446_v52 = vld [vmem:[%s5855_s1 + $0x8] sm:$0xff] }
 0x6fc   :  { %v2162_v29 = vperm.slane %v2147_v28, 0  ;;  %v2163_v30 = vperm.slane %v2148_v56, 0  ;;  %v2164_v51 = vperm.slane %v2149_v34, 0  ;;  %v2165_v0 = vperm.slane %v2150_v35, 0 }
 0x6fd   :  { %4159 = vmatmul.msk.f32.vlgmr.msrb.gmra.mxu1 %vm93_vm0, %v2191_v49  ;;  %v2192_v14 = vmul.f32 %v2160_v57, %v2107_v59  ;;  %v2193_v26 = vmul.f32 %v2161_v25, %v2107_v59  ;;  %v2166_v6 = vperm.slane %v2151_v38, 0 }
 0x6fe   :  { %v2076_v20 = vpop.f32.mrf.mxu2  ;;  %v2194_v27 = vmul.f32 %v2162_v29, %v2107_v59  ;;  %v2195_v33 = vmul.f32 %v2163_v30, %v2107_v59  ;;  %v2196_v58 = vmul.f32 %v2164_v51, %v2107_v59  ;;  %v2197_v11 = vmul.f32 %v2165_v0, %v2107_v59 }
 0x6ff   :  { %v2077_v37 = vadd.f32 %v2076_v20, %v2049_v54  ;;  %v2198_v3 = vmul.f32 %v2166_v6, %v2107_v59 }
 0x701   :  { %v2167_v62 = vperm.slane %v2077_v37, 0  ;;  %v2152_v10 = vrot.slane %v2077_v37, 1  ;;  %v2153_v2 = vrot.slane %v2077_v37, 2  ;;  %v2154_v63 = vrot.slane %v2077_v37, 3 }
 0x702   :  { %v2155_v4 = vrot.slane %v2077_v37, 4  ;;  %v2156_v40 = vrot.slane %v2077_v37, 5  ;;  %v2157_v5 = vrot.slane %v2077_v37, 6  ;;  %v2158_v31 = vrot.slane %v2077_v37, 7 }
 0x703   :  { %v2199_v21 = vmul.f32 %v2167_v62, %v2109_v61  ;;  %v2168_v9 = vperm.slane %v2152_v10, 0  ;;  %v2169_v1 = vperm.slane %v2153_v2, 0  ;;  %v2170_v12 = vperm.slane %v2154_v63, 0 }
 0x704   :  { %v2171_v36 = vperm.slane %v2155_v4, 0  ;;  %v2172_v32 = vperm.slane %v2156_v40, 0  ;;  %v2173_v13 = vperm.slane %v2157_v5, 0  ;;  %v2174_v44 = vperm.slane %v2158_v31, 0  ;;  %v4447_v31 = vld [vmem:[%s5855_s1 + $0x10] sm:$0xff] }
 0x705   :  { %4160 = vmatmul.msk.f32.gmra.mxu1 %vm93_vm0, %v2192_v14  ;;  %v2200_v39 = vmul.f32 %v2168_v9, %v2109_v61  ;;  %v2201_v41 = vmul.f32 %v2169_v1, %v2109_v61  ;;  %v2202_v16 = vmul.f32 %v2170_v12, %v2109_v61 }
 0x706   :  { %v2203_v15 = vmul.f32 %v2171_v36, %v2109_v61  ;;  %v2204_v19 = vmul.f32 %v2172_v32, %v2109_v61  ;;  %v2205_v48 = vmul.f32 %v2173_v13, %v2109_v61  ;;  %v2206_v24 = vmul.f32 %v2174_v44, %v2109_v61 }
 0x70d   :  { %4161 = vmatmul.msk.f32.gmra.mxu1 %vm93_vm0, %v2193_v26 }
 0x715   :  { %4162 = vmatmul.msk.f32.gmra.mxu1 %vm93_vm0, %v2194_v27  ;;  %v4448_v27 = vld [vmem:[%s5855_s1 + $0x18] sm:$0xff] }
 0x71d   :  { %4163 = vmatmul.msk.f32.gmra.mxu1 %vm93_vm0, %v2195_v33 }
 0x725   :  { %4164 = vmatmul.msk.f32.gmra.mxu1 %vm93_vm0, %v2196_v58 }
 0x72d   :  { %4165 = vmatmul.msk.f32.gmra.mxu1 %vm93_vm0, %v2197_v11 }
 0x735   :  { %4166 = vmatmul.msk.f32.gmra.mxu1 %vm93_vm0, %v2198_v3 }
 0x73d   :  { %4167 = vmatmul.msk.f32.gmra.mxu1 %vm93_vm0, %v2199_v21 }
 0x745   :  { %4168 = vmatmul.msk.f32.gmra.mxu1 %vm93_vm0, %v2200_v39 }
 0x74d   :  { %4169 = vmatmul.msk.f32.gmra.mxu1 %vm93_vm0, %v2201_v41 }
 0x755   :  { %4170 = vmatmul.msk.f32.gmra.mxu1 %vm93_vm0, %v2202_v16 }
 0x75d   :  { %4171 = vmatmul.msk.f32.gmra.mxu1 %vm93_vm0, %v2203_v15 }
 0x765   :  { %4172 = vmatmul.msk.f32.gmra.mxu1 %vm93_vm0, %v2204_v19 }
 0x76d   :  { %4173 = vmatmul.msk.f32.gmra.mxu1 %vm93_vm0, %v2205_v48 }
 0x775   :  { %4174 = vmatmul.msk.f32.gmra.mxu1 %vm93_vm0, %v2206_v24 }
 0x77a   :  { %v2272_v43 = vpop.f32.mrf.mxu1 }
 0x77b   :  { %v2320_v47 = vadd.f32 %v4445_v45, %v2272_v43 }
 0x77d   :  { %v2352_v50 = vrot.slane %v2320_v47, 1  ;;  %v2400_v17 = vrot.slane %v2320_v47, 2  ;;  %v2448_v55 = vrot.slane %v2320_v47, 3  ;;  %v2496_v59 = vrot.slane %v2320_v47, 4 }
 0x77e   :  { %v2544_v57 = vrot.slane %v2320_v47, 5  ;;  %v2592_v37 = vrot.slane %v2320_v47, 6  ;;  %v2640_v62 = vrot.slane %v2320_v47, 7 }
 0x77f   :  { %v2384_v53 = vmax.f32 %v2320_v47, %v2352_v50 }
 0x781   :  { %v2432_v54 = vmax.f32 %v2384_v53, %v2400_v17 }
 0x782   :  { %v2275_v8 = vpop.f32.mrf.mxu1 }
 0x783   :  { %v2480_v22 = vmax.f32 %v2432_v54, %v2448_v55  ;;  %v2321_v60 = vadd.f32 %v4446_v52, %v2275_v8 }
 0x785   :  { %v2528_v49 = vmax.f32 %v2480_v22, %v2496_v59  ;;  %v2353_v42 = vrot.slane %v2321_v60, 1  ;;  %v2401_v14 = vrot.slane %v2321_v60, 2  ;;  %v2449_v2 = vrot.slane %v2321_v60, 3  ;;  %v4449_v22 = vld [vmem:[%s5855_s1 + $0x20] sm:$0xff] }
 0x786   :  { %v2497_v5 = vrot.slane %v2321_v60, 4  ;;  %v2545_v12 = vrot.slane %v2321_v60, 5  ;;  %v2593_v32 = vrot.slane %v2321_v60, 6  ;;  %v2641_v16 = vrot.slane %v2321_v60, 7 }
 0x787   :  { %v2576_v20 = vmax.f32 %v2528_v49, %v2544_v57  ;;  %v2385_v61 = vmax.f32 %v2321_v60, %v2353_v42 }
 0x789   :  { %v2624_v23 = vmax.f32 %v2576_v20, %v2592_v37  ;;  %v2433_v10 = vmax.f32 %v2385_v61, %v2401_v14 }
 0x78a   :  { %v2278_v63 = vpop.f32.mrf.mxu1 }
 0x78b   :  { %v2672_v4 = vmax.f32 %v2624_v23, %v2640_v62  ;;  %v2481_v40 = vmax.f32 %v2433_v10, %v2449_v2  ;;  %v2322_v21 = vadd.f32 %v4447_v31, %v2278_v63 }
 0x78d   :  { %v2688_v9 = vperm.slane %v2672_v4, 0  ;;  %v2529_v1 = vmax.f32 %v2481_v40, %v2497_v5  ;;  %v2354_v36 = vrot.slane %v2322_v21, 1  ;;  %v2402_v41 = vrot.slane %v2322_v21, 2 }
 0x78e   :  { %v2450_v24 = vrot.slane %v2322_v21, 3  ;;  %v2498_v25 = vrot.slane %v2322_v21, 4  ;;  %v2546_v34 = vrot.slane %v2322_v21, 5  ;;  %v2594_v58 = vrot.slane %v2322_v21, 6 }
 0x78f   :  { %v2704_v13 = vsub.f32 %v2320_v47, %v2688_v9  ;;  %v2577_v44 = vmax.f32 %v2529_v1, %v2545_v12  ;;  %v2386_v39 = vmax.f32 %v2322_v21, %v2354_v36  ;;  %v2642_v6 = vrot.slane %v2322_v21, 7 }
 0x791   :  { %v2720_v15 = vmul.f32 1.442695, %v2704_v13  ;;  %v2625_v19 = vmax.f32 %v2577_v44, %v2593_v32  ;;  %v2434_v48 = vmax.f32 %v2386_v39, %v2402_v41 }
 0x792   :  { %v2281_v26 = vpop.f32.mrf.mxu1 }
 0x793   :  { %4357 = vpow2.f32 %v2720_v15  ;;  %v2673_v28 = vmax.f32 %v2625_v19, %v2641_v16  ;;  %v2482_v29 = vmax.f32 %v2434_v48, %v2450_v24  ;;  %v5282_v56 = vadd.f32 %v4448_v27, %v2281_v26  ;;  %v4450_v16 = vld [vmem:[%s5855_s1 + $0x28] sm:$0xff] }
 0x795   :  { %v2689_v30 = vperm.slane %v2673_v28, 0  ;;  %v2530_v33 = vmax.f32 %v2482_v29, %v2498_v25  ;;  %v2355_v51 = vrot.slane %v5282_v56, 1  ;;  %v2403_v38 = vrot.slane %v5282_v56, 2 }
 0x796   :  { %v2451_v50 = vrot.slane %v5282_v56, 3  ;;  %v2499_v53 = vrot.slane %v5282_v56, 4  ;;  %v2547_v57 = vrot.slane %v5282_v56, 5  ;;  %v2595_v20 = vrot.slane %v5282_v56, 6 }
 0x797   :  { %v2705_v35 = vsub.f32 %v2321_v60, %v2689_v30  ;;  %v2578_v0 = vmax.f32 %v2530_v33, %v2546_v34  ;;  %v2387_v11 = vmax.f32 %v5282_v56, %v2355_v51  ;;  %v2643_v37 = vrot.slane %v5282_v56, 7 }
 0x799   :  { %v5287_v3 = vpop.eup %4357  ;;  %v2722_v43 = vmul.f32 1.442695, %v2705_v35  ;;  %v2626_v45 = vmax.f32 %v2578_v0, %v2594_v58  ;;  %v2435_v47 = vmax.f32 %v2387_v11, %v2403_v38 }
 0x79a   :  { %v2284_v17 = vpop.f32.mrf.mxu1  ;;  %v2768_v54 = vrot.slane %v5287_v3, 1  ;;  %v2816_v61 = vrot.slane %v5287_v3, 2  ;;  %v2864_v63 = vrot.slane %v5287_v3, 3  ;;  %v2912_v4 = vrot.slane %v5287_v3, 4 }
 0x79b   :  { %4359 = vpow2.f32 %v2722_v43  ;;  %v2674_v55 = vmax.f32 %v2626_v45, %v2642_v6  ;;  %v2483_v8 = vmax.f32 %v2435_v47, %v2451_v50  ;;  %v5295_v59 = vadd.f32 %v4449_v22, %v2284_v17 }
 0x79c   :  { %v2800_v52 = vadd.f32 %v5287_v3, %v2768_v54  ;;  %v2960_v40 = vrot.slane %v5287_v3, 5  ;;  %v3008_v13 = vrot.slane %v5287_v3, 6  ;;  %v3056_v24 = vrot.slane %v5287_v3, 7 }
 0x79d   :  { %v2690_v60 = vperm.slane %v2674_v55, 0  ;;  %v2531_v49 = vmax.f32 %v2483_v8, %v2499_v53  ;;  %v2356_v42 = vrot.slane %v5295_v59, 1  ;;  %v2404_v10 = vrot.slane %v5295_v59, 2 }
 0x79e   :  { %v2848_v2 = vadd.f32 %v2816_v61, %v2800_v52  ;;  %v2452_v12 = vrot.slane %v5295_v59, 3  ;;  %v2548_v19 = vrot.slane %v5295_v59, 5  ;;  %v2596_v29 = vrot.slane %v5295_v59, 6 }
 0x79f   :  { %v2706_v14 = vsub.f32 %v2322_v21, %v2690_v60  ;;  %v2579_v23 = vmax.f32 %v2531_v49, %v2547_v57  ;;  %v2388_v62 = vmax.f32 %v5295_v59, %v2356_v42  ;;  %v2500_v21 = vrot.slane %v5295_v59, 4  ;;  %v4451_v57 = vld [vmem:[%s5855_s1 + $0x30] sm:$0xff] }
 0x7a0   :  { %v2896_v32 = vadd.f32 %v2864_v63, %v2848_v2  ;;  %v2644_v30 = vrot.slane %v5295_v59, 7 }
 0x7a1   :  { %v5308_v5 = vpop.eup %4359  ;;  %v2724_v31 = vmul.f32 1.442695, %v2706_v14  ;;  %v2627_v9 = vmax.f32 %v2579_v23, %v2595_v20  ;;  %v2436_v1 = vmax.f32 %v2388_v62, %v2404_v10 }
 0x7a2   :  { %v2287_v36 = vpop.f32.mrf.mxu1  ;;  %v2769_v44 = vrot.slane %v5308_v5, 1  ;;  %v2944_v48 = vadd.f32 %v2912_v4, %v2896_v32  ;;  %v2817_v33 = vrot.slane %v5308_v5, 2  ;;  %v2865_v34 = vrot.slane %v5308_v5, 3 }
 0x7a3   :  { %4361 = vpow2.f32 %v2724_v31  ;;  %v2675_v39 = vmax.f32 %v2627_v9, %v2643_v37  ;;  %v2484_v41 = vmax.f32 %v2436_v1, %v2452_v12  ;;  %v5317_v15 = vadd.f32 %v4450_v16, %v2287_v36 }
 0x7a4   :  { %v2801_v25 = vadd.f32 %v5308_v5, %v2769_v44  ;;  %v2913_v51 = vrot.slane %v5308_v5, 4  ;;  %v2992_v6 = vadd.f32 %v2960_v40, %v2944_v48  ;;  %v2961_v45 = vrot.slane %v5308_v5, 5 }
 0x7a5   :  { %v2691_v26 = vperm.slane %v2675_v39, 0  ;;  %v2532_v28 = vmax.f32 %v2484_v41, %v2500_v21  ;;  %v2357_v27 = vrot.slane %v5317_v15, 1  ;;  %v2405_v11 = vrot.slane %v5317_v15, 2 }
 0x7a6   :  { %v2453_v38 = vrot.slane %v5317_v15, 3  ;;  %v2849_v43 = vadd.f32 %v2817_v33, %v2801_v25  ;;  %v2501_v54 = vrot.slane %v5317_v15, 4  ;;  %v3040_v8 = vadd.f32 %v3008_v13, %v2992_v6 }
 0x7a7   :  { %v2707_v58 = vsub.f32 %v5282_v56, %v2691_v26  ;;  %v2580_v35 = vmax.f32 %v2532_v28, %v2548_v19  ;;  %v2389_v0 = vmax.f32 %v5317_v15, %v2357_v27  ;;  %v2549_v56 = vrot.slane %v5317_v15, 5 }
 0x7a8   :  { %v2897_v22 = vadd.f32 %v2865_v34, %v2849_v43  ;;  %v2597_v20 = vrot.slane %v5317_v15, 6  ;;  %v3088_v37 = vadd.f32 %v3056_v24, %v3040_v8  ;;  %v2645_v10 = vrot.slane %v5317_v15, 7 }
 0x7a9   :  { %v5333_v47 = vpop.eup %4361  ;;  %v2726_v50 = vmul.f32 1.442695, %v2707_v58  ;;  %v2628_v53 = vmax.f32 %v2580_v35, %v2596_v29  ;;  %v2437_v17 = vmax.f32 %v2389_v0, %v2405_v11  ;;  %v3009_v63 = vrot.slane %v5308_v5, 6 }
 0x7aa   :  { %v2290_v55 = vpop.f32.mrf.mxu1  ;;  %v2770_v52 = vrot.slane %v5333_v47, 1  ;;  %v2945_v61 = vadd.f32 %v2913_v51, %v2897_v22  ;;  %v3057_v4 = vrot.slane %v5308_v5, 7  ;;  %v2818_v40 = vrot.slane %v5333_v47, 2 }
 0x7ab   :  { %4363 = vpow2.f32 %v2726_v50  ;;  %v2676_v60 = vmax.f32 %v2628_v53, %v2644_v30  ;;  %v2485_v49 = vmax.f32 %v2437_v17, %v2453_v38  ;;  %v5341_v42 = vadd.f32 %v4451_v57, %v2290_v55  ;;  %v4452_v30 = vld [vmem:[%s5855_s1 + $0x38] sm:$0xff] }
 0x7ac   :  { %v2802_v14 = vadd.f32 %v5333_v47, %v2770_v52  ;;  %v2866_v31 = vrot.slane %v5333_v47, 3  ;;  %4365 = vrcp.f32 %v3088_v37  ;;  %v2993_v32 = vadd.f32 %v2961_v45, %v2945_v61 }
 0x7ad   :  { %v2692_v23 = vperm.slane %v2676_v60, 0  ;;  %v2533_v62 = vmax.f32 %v2485_v49, %v2501_v54  ;;  %v2358_v2 = vrot.slane %v5341_v42, 1  ;;  %v2406_v21 = vrot.slane %v5341_v42, 2 }
 0x7ae   :  { %v2454_v36 = vrot.slane %v5341_v42, 3  ;;  %v2850_v13 = vadd.f32 %v2818_v40, %v2802_v14  ;;  %v2502_v16 = vrot.slane %v5341_v42, 4  ;;  %v2550_v19 = vrot.slane %v5341_v42, 5 }
 0x7af   :  { %v2708_v9 = vsub.f32 %v5295_v59, %v2692_v23  ;;  %v2581_v1 = vmax.f32 %v2533_v62, %v2549_v56  ;;  %v2390_v12 = vmax.f32 %v5341_v42, %v2358_v2  ;;  %v3041_v24 = vadd.f32 %v3009_v63, %v2993_v32  ;;  %v4453_v63 = vld [vmem:[%s5855_s1 + $0x40] sm:$0xff] }
 0x7b0   :  { %v2898_v25 = vadd.f32 %v2866_v31, %v2850_v13  ;;  %v2914_v26 = vrot.slane %v5333_v47, 4  ;;  %v2598_v27 = vrot.slane %v5341_v42, 6  ;;  %v2646_v34 = vrot.slane %v5341_v42, 7 }
 0x7b1   :  { %v5355_v44 = vpop.eup %4363  ;;  %v2629_v39 = vmax.f32 %v2581_v1, %v2597_v20  ;;  %v2438_v41 = vmax.f32 %v2390_v12, %v2406_v21  ;;  %v2728_v48 = vmul.f32 1.442695, %v2708_v9  ;;  %v3089_v51 = vadd.f32 %v3057_v4, %v3041_v24 }
 0x7b2   :  { %v2293_v59 = vpop.f32.mrf.mxu1  ;;  %v2946_v58 = vadd.f32 %v2914_v26, %v2898_v25  ;;  %v2771_v35 = vrot.slane %v5355_v44, 1  ;;  %v2962_v6 = vrot.slane %v5333_v47, 5  ;;  %v4366_v43 = vpop.eup %4365  ;;  %v3010_v45 = vrot.slane %v5333_v47, 6 }
 0x7b3   :  { %v2677_v28 = vmax.f32 %v2629_v39, %v2645_v10  ;;  %v2486_v29 = vmax.f32 %v2438_v41, %v2454_v36  ;;  %v5364_v33 = vadd.f32 %v4452_v30, %v2293_v59  ;;  %4367 = vpow2.f32 %v2728_v48 }
 0x7b4   :  { %v3058_v50 = vrot.slane %v5333_v47, 7  ;;  %v2819_v53 = vrot.slane %v5355_v44, 2  ;;  %v3120_v8 = vperm.slane %v4366_v43, 0  ;;  %4369 = vrcp.f32 %v3089_v51  ;;  %v4454_v43 = vld [vmem:[%s5855_s1 + $0x48] sm:$0xff] }
 0x7b5   :  { %v2693_v0 = vperm.slane %v2677_v28, 0  ;;  %v2534_v11 = vmax.f32 %v2486_v29, %v2502_v16  ;;  %v2359_v38 = vrot.slane %v5364_v33, 1  ;;  %v2407_v55 = vrot.slane %v5364_v33, 2 }
 0x7b6   :  { %v2994_v22 = vadd.f32 %v2962_v6, %v2946_v58  ;;  %v2803_v52 = vadd.f32 %v5355_v44, %v2771_v35  ;;  %v2455_v20 = vrot.slane %v5364_v33, 3  ;;  %v3136_v37 = vmul.f32 %v5287_v3, %v3120_v8 }
 0x7b7   :  { %v2709_v17 = vsub.f32 %v5317_v15, %v2693_v0  ;;  %v2582_v54 = vmax.f32 %v2534_v11, %v2550_v19  ;;  %v2391_v56 = vmax.f32 %v5364_v33, %v2359_v38  ;;  %v2867_v23 = vrot.slane %v5355_v44, 3 }
 0x7b8   :  { %v3042_v14 = vadd.f32 %v3010_v45, %v2994_v22  ;;  %v2851_v15 = vadd.f32 %v2819_v53, %v2803_v52  ;;  %v2503_v2 = vrot.slane %v5364_v33, 4  ;;  %v2551_v31 = vrot.slane %v5364_v33, 5  ;;  %4175 = vmatmul.msk.f32.vlgmr.msrb.gmra.mxu2 %vm1184_vm1, %v3136_v37 }
 0x7b9   :  { %v2730_v60 = vmul.f32 1.442695, %v2709_v17  ;;  %v2630_v49 = vmax.f32 %v2582_v54, %v2598_v27  ;;  %v2439_v57 = vmax.f32 %v2391_v56, %v2407_v55  ;;  %v5386_v40 = vpop.eup %4367  ;;  %v2599_v3 = vrot.slane %v5364_v33, 6 }
 0x7ba   :  { %v2296_v61 = vpop.f32.mrf.mxu1  ;;  %v3090_v9 = vadd.f32 %v3058_v50, %v3042_v14  ;;  %v2899_v1 = vadd.f32 %v2867_v23, %v2851_v15  ;;  %v2647_v36 = vrot.slane %v5364_v33, 7  ;;  %v4370_v13 = vpop.eup %4369  ;;  %v2915_v39 = vrot.slane %v5355_v44, 4 }
 0x7bb   :  { %v2678_v62 = vmax.f32 %v2630_v49, %v2646_v34  ;;  %v2487_v10 = vmax.f32 %v2439_v57, %v2455_v20  ;;  %v5384_v4 = vadd.f32 %v4453_v63, %v2296_v61  ;;  %4371 = vpow2.f32 %v2730_v60 }
 0x7bc   :  { %v2963_v41 = vrot.slane %v5355_v44, 5  ;;  %v3011_v16 = vrot.slane %v5355_v44, 6  ;;  %v3121_v26 = vperm.slane %v4370_v13, 0  ;;  %4373 = vrcp.f32 %v3090_v9  ;;  %v4455_v13 = vld [vmem:[%s5855_s1 + $0x50] sm:$0xff] }
 0x7bd   :  { %v2694_v12 = vperm.slane %v2678_v62, 0  ;;  %v2535_v21 = vmax.f32 %v2487_v10, %v2503_v2  ;;  %v2360_v32 = vrot.slane %v5384_v4, 1  ;;  %v2408_v24 = vrot.slane %v5384_v4, 2 }
 0x7be   :  { %v2456_v25 = vrot.slane %v5384_v4, 3  ;;  %v2947_v28 = vadd.f32 %v2915_v39, %v2899_v1  ;;  %v2504_v30 = vrot.slane %v5384_v4, 4  ;;  %v2772_v34 = vrot.slane %v5386_v40, 1 }
 0x7bf   :  { %v2710_v19 = vsub.f32 %v5341_v42, %v2694_v12  ;;  %v2583_v48 = vmax.f32 %v2535_v21, %v2551_v31  ;;  %v2392_v59 = vmax.f32 %v5384_v4, %v2360_v32  ;;  %v2552_v58 = vrot.slane %v5384_v4, 5 }
 0x7c0   :  { %v3137_v42 = vmul.f32 %v5308_v5, %v3121_v26  ;;  %v2995_v0 = vadd.f32 %v2963_v41, %v2947_v28  ;;  %v2600_v6 = vrot.slane %v5384_v4, 6  ;;  %v2648_v53 = vrot.slane %v5384_v4, 7 }
 0x7c1   :  { %v2631_v29 = vmax.f32 %v2583_v48, %v2599_v3  ;;  %v2440_v27 = vmax.f32 %v2392_v59, %v2408_v24  ;;  %v2732_v51 = vmul.f32 1.442695, %v2710_v19  ;;  %v5410_v50 = vpop.eup %4371  ;;  %v3059_v5 = vrot.slane %v5355_v44, 7 }
 0x7c2   :  { %v2299_v35 = vpop.f32.mrf.mxu1  ;;  %4176 = vmatmul.msk.f32.gmra.mxu2 %vm1184_vm1, %v3137_v42  ;;  %v3043_v17 = vadd.f32 %v3011_v16, %v2995_v0  ;;  %v2804_v54 = vadd.f32 %v5386_v40, %v2772_v34  ;;  %v2820_v22 = vrot.slane %v5386_v40, 2  ;;  %v4374_v52 = vpop.eup %4373  ;;  %v2868_v60 = vrot.slane %v5386_v40, 3 }
 0x7c3   :  { %v2679_v11 = vmax.f32 %v2631_v29, %v2647_v36  ;;  %v2488_v38 = vmax.f32 %v2440_v27, %v2456_v25  ;;  %v5408_v45 = vadd.f32 %v4454_v43, %v2299_v35  ;;  %4375 = vpow2.f32 %v2732_v51 }
 0x7c4   :  { %v2916_v49 = vrot.slane %v5386_v40, 4  ;;  %v2964_v57 = vrot.slane %v5386_v40, 5  ;;  %v3122_v23 = vperm.slane %v4374_v52, 0  ;;  %v3091_v62 = vadd.f32 %v3059_v5, %v3043_v17 }
 0x7c5   :  { %v2695_v56 = vperm.slane %v2679_v11, 0  ;;  %v2536_v55 = vmax.f32 %v2488_v38, %v2504_v30  ;;  %v2361_v8 = vrot.slane %v5408_v45, 1  ;;  %v2409_v14 = vrot.slane %v5408_v45, 2 }
 0x7c6   :  { %v2457_v15 = vrot.slane %v5408_v45, 3  ;;  %v2852_v10 = vadd.f32 %v2820_v22, %v2804_v54  ;;  %v2505_v3 = vrot.slane %v5408_v45, 4  ;;  %v3138_v9 = vmul.f32 %v5333_v47, %v3122_v23 }
 0x7c7   :  { %v2711_v20 = vsub.f32 %v5364_v33, %v2695_v56  ;;  %v2584_v37 = vmax.f32 %v2536_v55, %v2552_v58  ;;  %v2393_v61 = vmax.f32 %v5408_v45, %v2361_v8  ;;  %4377 = vrcp.f32 %v3091_v62 }
 0x7c8   :  { %v2900_v33 = vadd.f32 %v2868_v60, %v2852_v10  ;;  %v2773_v12 = vrot.slane %v5410_v50, 1  ;;  %v2553_v32 = vrot.slane %v5408_v45, 5  ;;  %v2601_v16 = vrot.slane %v5408_v45, 6 }
 0x7c9   :  { %v2734_v2 = vmul.f32 1.442695, %v2711_v20  ;;  %v2632_v63 = vmax.f32 %v2584_v37, %v2600_v6  ;;  %v2441_v31 = vmax.f32 %v2393_v61, %v2409_v14  ;;  %v5434_v41 = vpop.eup %4375  ;;  %v2649_v47 = vrot.slane %v5408_v45, 7  ;;  %v4456_v20 = vld [vmem:[%s5855_s1 + $0x58] sm:$0xff] }
 0x7ca   :  { %v2302_v1 = vpop.f32.mrf.mxu1  ;;  %4177 = vmatmul.msk.f32.gmra.mxu2 %vm1184_vm1, %v3138_v9  ;;  %v2948_v19 = vadd.f32 %v2916_v49, %v2900_v33  ;;  %v2805_v48 = vadd.f32 %v5410_v50, %v2773_v12  ;;  %v3012_v26 = vrot.slane %v5386_v40, 6  ;;  %v3060_v28 = vrot.slane %v5386_v40, 7 }
 0x7cb   :  { %v2680_v21 = vmax.f32 %v2632_v63, %v2648_v53  ;;  %v2489_v36 = vmax.f32 %v2441_v31, %v2457_v15  ;;  %v5432_v39 = vadd.f32 %v4455_v13, %v2302_v1  ;;  %4379 = vpow2.f32 %v2734_v2 }
 0x7cc   :  { %v2821_v29 = vrot.slane %v5410_v50, 2  ;;  %v2869_v27 = vrot.slane %v5410_v50, 3  ;;  %v2996_v11 = vadd.f32 %v2964_v57, %v2948_v19  ;;  %v2917_v55 = vrot.slane %v5410_v50, 4 }
 0x7cd   :  { %v2696_v59 = vperm.slane %v2680_v21, 0  ;;  %v2537_v24 = vmax.f32 %v2489_v36, %v2505_v3  ;;  %v2362_v25 = vrot.slane %v5432_v39, 1  ;;  %v2410_v58 = vrot.slane %v5432_v39, 2  ;;  %v4378_v42 = vpop.eup %4377 }
 0x7ce   :  { %v2458_v35 = vrot.slane %v5432_v39, 3  ;;  %v2506_v0 = vrot.slane %v5432_v39, 4  ;;  %v2853_v38 = vadd.f32 %v2821_v29, %v2805_v48  ;;  %v2554_v53 = vrot.slane %v5432_v39, 5 }
 0x7cf   :  { %v2712_v30 = vsub.f32 %v5384_v4, %v2696_v59  ;;  %v2585_v34 = vmax.f32 %v2537_v24, %v2553_v32  ;;  %v2394_v51 = vmax.f32 %v5432_v39, %v2362_v25  ;;  %v3123_v17 = vperm.slane %v4378_v42, 0 }
 0x7d0   :  { %v3044_v4 = vadd.f32 %v3012_v26, %v2996_v11  ;;  %v2901_v56 = vadd.f32 %v2869_v27, %v2853_v38  ;;  %v2602_v52 = vrot.slane %v5432_v39, 6  ;;  %v2650_v57 = vrot.slane %v5432_v39, 7 }
 0x7d1   :  { %v2633_v6 = vmax.f32 %v2585_v34, %v2601_v16  ;;  %v2442_v43 = vmax.f32 %v2394_v51, %v2410_v58  ;;  %v2736_v5 = vmul.f32 1.442695, %v2712_v30  ;;  %v3139_v60 = vmul.f32 %v5355_v44, %v3123_v17  ;;  %v5454_v49 = vpop.eup %4379 }
 0x7d2   :  { %v2305_v54 = vpop.f32.mrf.mxu1  ;;  %v3092_v61 = vadd.f32 %v3060_v28, %v3044_v4  ;;  %v2949_v14 = vadd.f32 %v2917_v55, %v2901_v56  ;;  %v2965_v62 = vrot.slane %v5410_v50, 5  ;;  %v2774_v44 = vrot.slane %v5434_v41, 1  ;;  %v4457_v28 = vld [vmem:[%s5855_s1 + $0x60] sm:$0xff] }
 0x7d3   :  { %v2681_v8 = vmax.f32 %v2633_v6, %v2649_v47  ;;  %v2490_v22 = vmax.f32 %v2442_v43, %v2458_v35  ;;  %v5460_v37 = vadd.f32 %v4456_v20, %v2305_v54  ;;  %4178 = vmatmul.msk.f32.gmra.mxu2 %vm1184_vm1, %v3139_v60  ;;  %4381 = vpow2.f32 %v2736_v5 }
 0x7d4   :  { %v3013_v2 = vrot.slane %v5410_v50, 6  ;;  %v3061_v63 = vrot.slane %v5410_v50, 7  ;;  %v2822_v9 = vrot.slane %v5434_v41, 2  ;;  %v2870_v1 = vrot.slane %v5434_v41, 3 }
 0x7d5   :  { %v2697_v15 = vperm.slane %v2681_v8, 0  ;;  %v2538_v23 = vmax.f32 %v2490_v22, %v2506_v0  ;;  %v2363_v10 = vrot.slane %v5460_v37, 1  ;;  %v2411_v12 = vrot.slane %v5460_v37, 2 }
 0x7d6   :  { %4383 = vrcp.f32 %v3092_v61  ;;  %v2997_v21 = vadd.f32 %v2965_v62, %v2949_v14  ;;  %v2459_v32 = vrot.slane %v5460_v37, 3  ;;  %v2507_v13 = vrot.slane %v5460_v37, 4 }
 0x7d7   :  { %v2713_v31 = vsub.f32 %v5408_v45, %v2697_v15  ;;  %v2586_v3 = vmax.f32 %v2538_v23, %v2554_v53  ;;  %v2395_v33 = vmax.f32 %v5460_v37, %v2363_v10  ;;  %v2806_v16 = vadd.f32 %v5434_v41, %v2774_v44 }
 0x7d8   :  { %v2555_v19 = vrot.slane %v5460_v37, 5  ;;  %v3045_v59 = vadd.f32 %v3013_v2, %v2997_v21  ;;  %v2603_v25 = vrot.slane %v5460_v37, 6  ;;  %v2651_v26 = vrot.slane %v5460_v37, 7 }
 0x7d9   :  { %v2634_v36 = vmax.f32 %v2586_v3, %v2602_v52  ;;  %v2738_v47 = vmul.f32 1.442695, %v2713_v31  ;;  %v2443_v45 = vmax.f32 %v2395_v33, %v2411_v12  ;;  %v5484_v27 = vpop.eup %4381  ;;  %v2854_v51 = vadd.f32 %v2822_v9, %v2806_v16 }
 0x7da   :  { %v2308_v48 = vpop.f32.mrf.mxu1  ;;  %v3093_v34 = vadd.f32 %v3061_v63, %v3045_v59  ;;  %v2775_v58 = vrot.slane %v5454_v49, 1  ;;  %v2918_v0 = vrot.slane %v5434_v41, 4  ;;  %v2966_v11 = vrot.slane %v5434_v41, 5 }
 0x7db   :  { %v2682_v24 = vmax.f32 %v2634_v36, %v2650_v57  ;;  %v5482_v29 = vadd.f32 %v4457_v28, %v2308_v48  ;;  %v2491_v30 = vmax.f32 %v2443_v45, %v2459_v32  ;;  %4385 = vpow2.f32 %v2738_v47 }
 0x7dc   :  { %v4384_v38 = vpop.eup %4383  ;;  %v3014_v43 = vrot.slane %v5434_v41, 6  ;;  %v3062_v53 = vrot.slane %v5434_v41, 7  ;;  %4387 = vrcp.f32 %v3093_v34  ;;  %v2902_v55 = vadd.f32 %v2870_v1, %v2854_v51 }
 0x7dd   :  { %v2698_v42 = vperm.slane %v2682_v24, 0  ;;  %v2364_v35 = vrot.slane %v5482_v29, 1  ;;  %v2539_v6 = vmax.f32 %v2491_v30, %v2507_v13  ;;  %v3124_v5 = vperm.slane %v4384_v38, 0 }
 0x7de   :  { %v2412_v4 = vrot.slane %v5482_v29, 2  ;;  %v2807_v8 = vadd.f32 %v5454_v49, %v2775_v58  ;;  %v2460_v60 = vrot.slane %v5482_v29, 3  ;;  %v2508_v57 = vrot.slane %v5482_v29, 4 }
 0x7df   :  { %v2714_v17 = vsub.f32 %v5432_v39, %v2698_v42  ;;  %v2396_v54 = vmax.f32 %v5482_v29, %v2364_v35  ;;  %v2587_v56 = vmax.f32 %v2539_v6, %v2555_v19  ;;  %v3140_v22 = vmul.f32 %v5386_v40, %v3124_v5  ;;  %v4458_v40 = vld [vmem:[%s5855_s1 + $0x68] sm:$0xff] }
 0x7e0   :  { %v2950_v14 = vadd.f32 %v2918_v0, %v2902_v55  ;;  %v2823_v15 = vrot.slane %v5454_v49, 2  ;;  %v2556_v62 = vrot.slane %v5482_v29, 5  ;;  %v2604_v44 = vrot.slane %v5482_v29, 6 }
 0x7e1   :  { %v2444_v52 = vmax.f32 %v2396_v54, %v2412_v4  ;;  %v2740_v20 = vmul.f32 1.442695, %v2714_v17  ;;  %v2635_v61 = vmax.f32 %v2587_v56, %v2603_v25  ;;  %4179 = vmatmul.msk.f32.gmra.mxu2 %vm1184_vm1, %v3140_v22  ;;  %v5508_v2 = vpop.eup %4385  ;;  %v2652_v31 = vrot.slane %v5482_v29, 7 }
 0x7e2   :  { %v2311_v39 = vpop.f32.mrf.mxu1  ;;  %v2998_v3 = vadd.f32 %v2966_v11, %v2950_v14  ;;  %v2855_v9 = vadd.f32 %v2823_v15, %v2807_v8  ;;  %v2871_v12 = vrot.slane %v5454_v49, 3  ;;  %v2919_v21 = vrot.slane %v5454_v49, 4  ;;  %v4388_v36 = vpop.eup %4387 }
 0x7e3   :  { %v2492_v23 = vmax.f32 %v2444_v52, %v2460_v60  ;;  %v5506_v10 = vadd.f32 %v4458_v40, %v2311_v39  ;;  %v2683_v63 = vmax.f32 %v2635_v61, %v2651_v26  ;;  %4389 = vpow2.f32 %v2740_v20 }
 0x7e4   :  { %v2967_v13 = vrot.slane %v5454_v49, 5  ;;  %v3015_v16 = vrot.slane %v5454_v49, 6  ;;  %v3125_v45 = vperm.slane %v4388_v36, 0  ;;  %v3046_v25 = vadd.f32 %v3014_v43, %v2998_v3  ;;  %v4459_v43 = vld [vmem:[%s5855_s1 + $0x70] sm:$0xff] }
 0x7e5   :  { %v2540_v1 = vmax.f32 %v2492_v23, %v2508_v57  ;;  %v2365_v33 = vrot.slane %v5506_v10, 1  ;;  %v2699_v32 = vperm.slane %v2683_v63, 0  ;;  %v2413_v48 = vrot.slane %v5506_v10, 2 }
 0x7e6   :  { %v2461_v24 = vrot.slane %v5506_v10, 3  ;;  %v2903_v26 = vadd.f32 %v2871_v12, %v2855_v9  ;;  %v3141_v30 = vmul.f32 %v5410_v50, %v3125_v45  ;;  %v2776_v51 = vrot.slane %v5484_v27, 1 }
 0x7e7   :  { %v2588_v47 = vmax.f32 %v2540_v1, %v2556_v62  ;;  %v2397_v19 = vmax.f32 %v5506_v10, %v2365_v33  ;;  %v2715_v59 = vsub.f32 %v5460_v37, %v2699_v32  ;;  %v2509_v42 = vrot.slane %v5506_v10, 4 }
 0x7e8   :  { %v3094_v35 = vadd.f32 %v3062_v53, %v3046_v25  ;;  %v2951_v11 = vadd.f32 %v2919_v21, %v2903_v26  ;;  %v2557_v6 = vrot.slane %v5506_v10, 5  ;;  %v2605_v5 = vrot.slane %v5506_v10, 6 }
 0x7e9   :  { %v2636_v28 = vmax.f32 %v2588_v47, %v2604_v44  ;;  %v2445_v34 = vmax.f32 %v2397_v19, %v2413_v48  ;;  %v2742_v58 = vmul.f32 1.442695, %v2715_v59  ;;  %4180 = vmatmul.msk.f32.gmra.mxu2 %vm1184_vm1, %v3141_v30  ;;  %v5530_v17 = vpop.eup %4389  ;;  %v2653_v53 = vrot.slane %v5506_v10, 7 }
 0x7ea   :  { %v2314_v0 = vpop.f32.mrf.mxu1  ;;  %v2999_v54 = vadd.f32 %v2967_v13, %v2951_v11  ;;  %v2808_v4 = vadd.f32 %v5484_v27, %v2776_v51  ;;  %4391 = vrcp.f32 %v3094_v35  ;;  %v3063_v22 = vrot.slane %v5454_v49, 7  ;;  %v4460_v13 = vld [vmem:[%s5855_s1 + $0x78] sm:$0xff] }
 0x7eb   :  { %v2684_v38 = vmax.f32 %v2636_v28, %v2652_v31  ;;  %v2493_v37 = vmax.f32 %v2445_v34, %v2461_v24  ;;  %v5528_v50 = vadd.f32 %v4459_v43, %v2314_v0  ;;  %4393 = vpow2.f32 %v2742_v58 }
 0x7ec   :  { %v2824_v52 = vrot.slane %v5484_v27, 2  ;;  %v2872_v60 = vrot.slane %v5484_v27, 3  ;;  %v2920_v39 = vrot.slane %v5484_v27, 4  ;;  %v3047_v23 = vadd.f32 %v3015_v16, %v2999_v54 }
 0x7ed   :  { %v2700_v56 = vperm.slane %v2684_v38, 0  ;;  %v2541_v55 = vmax.f32 %v2493_v37, %v2509_v42  ;;  %v2366_v8 = vrot.slane %v5528_v50, 1  ;;  %v2414_v61 = vrot.slane %v5528_v50, 2 }
 0x7ee   :  { %v2462_v15 = vrot.slane %v5528_v50, 3  ;;  %v2856_v62 = vadd.f32 %v2824_v52, %v2808_v4  ;;  %v2510_v63 = vrot.slane %v5528_v50, 4  ;;  %v2558_v31 = vrot.slane %v5528_v50, 5 }
 0x7ef   :  { %v2589_v57 = vmax.f32 %v2541_v55, %v2557_v6  ;;  %v2398_v20 = vmax.f32 %v5528_v50, %v2366_v8  ;;  %v2716_v14 = vsub.f32 %v5482_v29, %v2700_v56  ;;  %v2606_v3 = vrot.slane %v5528_v50, 6 }
 0x7f0   :  { %v3095_v9 = vadd.f32 %v3063_v22, %v3047_v23  ;;  %v2904_v33 = vadd.f32 %v2872_v60, %v2856_v62  ;;  %v2777_v12 = vrot.slane %v5508_v2, 1  ;;  %v4392_v21 = vpop.eup %4391  ;;  %v2654_v32 = vrot.slane %v5528_v50, 7 }
 0x7f1   :  { %v2637_v44 = vmax.f32 %v2589_v57, %v2605_v5  ;;  %v2446_v40 = vmax.f32 %v2398_v20, %v2414_v61  ;;  %v5554_v47 = vpop.eup %4393  ;;  %v2744_v45 = vmul.f32 1.442695, %v2716_v14  ;;  %v3126_v19 = vperm.slane %v4392_v21, 0 }
 0x7f2   :  { %v2317_v1 = vpop.f32.mrf.mxu1  ;;  %4395 = vrcp.f32 %v3095_v9  ;;  %v2952_v48 = vadd.f32 %v2920_v39, %v2904_v33  ;;  %v2968_v26 = vrot.slane %v5484_v27, 5  ;;  %v3016_v30 = vrot.slane %v5484_v27, 6 }
 0x7f3   :  { %v2685_v36 = vmax.f32 %v2637_v44, %v2653_v53  ;;  %v2494_v29 = vmax.f32 %v2446_v40, %v2462_v15  ;;  %v5552_v16 = vadd.f32 %v4460_v13, %v2317_v1  ;;  %v3142_v28 = vmul.f32 %v5434_v41, %v3126_v19 }
 0x7f4   :  { %v3064_v34 = vrot.slane %v5484_v27, 7  ;;  %v2809_v51 = vadd.f32 %v5508_v2, %v2777_v12  ;;  %4397 = vpow2.f32 %v2744_v45  ;;  %v3000_v38 = vadd.f32 %v2968_v26, %v2952_v48 }
 0x7f5   :  { %v2701_v59 = vperm.slane %v2685_v36, 0  ;;  %v2542_v24 = vmax.f32 %v2494_v29, %v2510_v63  ;;  %v2367_v25 = vrot.slane %v5552_v16, 1  ;;  %v2415_v0 = vrot.slane %v5552_v16, 2  ;;  %4181 = vmatmul.msk.f32.gmra.mxu2 %vm1184_vm1, %v3142_v28 }
 0x7f6   :  { %v2463_v11 = vrot.slane %v5552_v16, 3  ;;  %v2825_v41 = vrot.slane %v5508_v2, 2  ;;  %v2511_v43 = vrot.slane %v5552_v16, 4  ;;  %v2559_v5 = vrot.slane %v5552_v16, 5 }
 0x7f7   :  { %v2717_v58 = vsub.f32 %v5506_v10, %v2701_v59  ;;  %v2590_v42 = vmax.f32 %v2542_v24, %v2558_v31  ;;  %v2399_v35 = vmax.f32 %v5552_v16, %v2367_v25  ;;  %v2607_v53 = vrot.slane %v5552_v16, 6 }
 0x7f8   :  { %v4396_v10 = vpop.eup %4395  ;;  %v3048_v54 = vadd.f32 %v3016_v30, %v3000_v38  ;;  %v2857_v4 = vadd.f32 %v2825_v41, %v2809_v51  ;;  %v2873_v56 = vrot.slane %v5508_v2, 3  ;;  %v2921_v20 = vrot.slane %v5508_v2, 4 }
 0x7f9   :  { %v2638_v37 = vmax.f32 %v2590_v42, %v2606_v3  ;;  %v2447_v6 = vmax.f32 %v2399_v35, %v2415_v0  ;;  %v2746_v55 = vmul.f32 1.442695, %v2717_v58  ;;  %v3127_v22 = vperm.slane %v4396_v10, 0 }
 0x7fa   :  { %v3096_v60 = vadd.f32 %v3064_v34, %v3048_v54  ;;  %v2905_v57 = vadd.f32 %v2873_v56, %v2857_v4  ;;  %v2778_v61 = vrot.slane %v5530_v17, 1  ;;  %v2969_v23 = vrot.slane %v5508_v2, 5  ;;  %v5576_v62 = vpop.eup %4397 }
 0x7fb   :  { %v2686_v8 = vmax.f32 %v2638_v37, %v2654_v32  ;;  %v2495_v52 = vmax.f32 %v2447_v6, %v2463_v11  ;;  %v3143_v14 = vmul.f32 %v5454_v49, %v3127_v22  ;;  %v2826_v63 = vrot.slane %v5530_v17, 2 }
 0x7fc   :  { %4399 = vrcp.f32 %v3096_v60  ;;  %v2953_v44 = vadd.f32 %v2921_v20, %v2905_v57  ;;  %v2810_v40 = vadd.f32 %v5530_v17, %v2778_v61  ;;  %v2655_v9 = vrot.slane %v5552_v16, 7 }
 0x7fd   :  { %v2702_v39 = vperm.slane %v2686_v8, 0  ;;  %v2543_v15 = vmax.f32 %v2495_v52, %v2511_v43  ;;  %v3017_v1 = vrot.slane %v5508_v2, 6  ;;  %4401 = vpow2.f32 %v2746_v55  ;;  %4182 = vmatmul.msk.f32.gmra.mxu2 %vm1184_vm1, %v3143_v14 }
 0x7fe   :  { %v3001_v49 = vadd.f32 %v2969_v23, %v2953_v44  ;;  %v2858_v33 = vadd.f32 %v2826_v63, %v2810_v40  ;;  %v2874_v12 = vrot.slane %v5530_v17, 3  ;;  %v3065_v29 = vrot.slane %v5508_v2, 7 }
 0x7ff   :  { %v2718_v31 = vsub.f32 %v5528_v50, %v2702_v39  ;;  %v2591_v3 = vmax.f32 %v2543_v15, %v2559_v5  ;;  %v2779_v32 = vrot.slane %v5554_v47, 1  ;;  %v2922_v45 = vrot.slane %v5530_v17, 4 }
 0x800   :  { %v3049_v13 = vadd.f32 %v3017_v1, %v3001_v49  ;;  %v2906_v50 = vadd.f32 %v2874_v12, %v2858_v33  ;;  %v2970_v19 = vrot.slane %v5530_v17, 5  ;;  %v3018_v59 = vrot.slane %v5530_v17, 6 }
 0x801   :  { %v2748_v21 = vmul.f32 1.442695, %v2718_v31  ;;  %v2639_v36 = vmax.f32 %v2591_v3, %v2607_v53  ;;  %v2811_v24 = vadd.f32 %v5554_v47, %v2779_v32  ;;  %v2827_v25 = vrot.slane %v5554_v47, 2 }
 0x802   :  { %v4400_v26 = vpop.eup %4399  ;;  %v3097_v28 = vadd.f32 %v3065_v29, %v3049_v13  ;;  %v2954_v30 = vadd.f32 %v2922_v45, %v2906_v50  ;;  %v2875_v34 = vrot.slane %v5554_v47, 3  ;;  %v2780_v35 = vrot.slane %v5576_v62, 1 }
 0x803   :  { %v2687_v48 = vmax.f32 %v2639_v36, %v2655_v9  ;;  %4403 = vpow2.f32 %v2748_v21  ;;  %v3128_v58 = vperm.slane %v4400_v26, 0  ;;  %v2859_v42 = vadd.f32 %v2827_v25, %v2811_v24  ;;  %v5594_v0 = vpop.eup %4401 }
 0x804   :  { %4405 = vrcp.f32 %v3097_v28  ;;  %v3002_v11 = vadd.f32 %v2970_v19, %v2954_v30  ;;  %v2923_v38 = vrot.slane %v5554_v47, 4  ;;  %v2828_v41 = vrot.slane %v5576_v62, 2 }
 0x805   :  { %v2703_v51 = vperm.slane %v2687_v48, 0  ;;  %v3144_v6 = vmul.f32 %v5484_v27, %v3128_v58  ;;  %v2907_v43 = vadd.f32 %v2875_v34, %v2859_v42  ;;  %v2812_v5 = vadd.f32 %v5576_v62, %v2780_v35 }
 0x806   :  { %v3050_v10 = vadd.f32 %v3018_v59, %v3002_v11  ;;  %v3066_v53 = vrot.slane %v5530_v17, 7  ;;  %v2971_v54 = vrot.slane %v5554_v47, 5  ;;  %v2876_v8 = vrot.slane %v5576_v62, 3 }
 0x807   :  { %v2719_v37 = vsub.f32 %v5552_v16, %v2703_v51  ;;  %4183 = vmatmul.msk.f32.gmra.mxu2 %vm1184_vm1, %v3144_v6  ;;  %v2955_v56 = vadd.f32 %v2923_v38, %v2907_v43  ;;  %v2860_v55 = vadd.f32 %v2828_v41, %v2812_v5  ;;  %v3019_v27 = vrot.slane %v5554_v47, 6 }
 0x808   :  { %v3098_v16 = vadd.f32 %v3066_v53, %v3050_v10  ;;  %v2781_v52 = vrot.slane %v5594_v0, 1  ;;  %v2924_v20 = vrot.slane %v5576_v62, 4  ;;  %v3067_v39 = vrot.slane %v5554_v47, 7 }
 0x809   :  { %v2750_v4 = vmul.f32 1.442695, %v2719_v37  ;;  %v5605_v22 = vpop.eup %4403  ;;  %v3003_v60 = vadd.f32 %v2971_v54, %v2955_v56  ;;  %v2908_v57 = vadd.f32 %v2876_v8, %v2860_v55  ;;  %v2829_v15 = vrot.slane %v5594_v0, 2 }
 0x80a   :  { %v4406_v61 = vpop.eup %4405  ;;  %v2813_v14 = vadd.f32 %v5594_v0, %v2781_v52  ;;  %v2972_v63 = vrot.slane %v5576_v62, 5  ;;  %v2877_v3 = vrot.slane %v5594_v0, 3  ;;  %v2782_v9 = vrot.slane %v5605_v22, 1 }
 0x80b   :  { %4407 = vpow2.f32 %v2750_v4  ;;  %v3129_v23 = vperm.slane %v4406_v61, 0  ;;  %v3051_v44 = vadd.f32 %v3019_v27, %v3003_v60  ;;  %v2956_v40 = vadd.f32 %v2924_v20, %v2908_v57 }
 0x80c   :  { %4409 = vrcp.f32 %v3098_v16  ;;  %v2861_v31 = vadd.f32 %v2829_v15, %v2813_v14  ;;  %v3020_v12 = vrot.slane %v5576_v62, 6  ;;  %v2925_v36 = vrot.slane %v5594_v0, 4 }
 0x80d   :  { %v3145_v1 = vmul.f32 %v5508_v2, %v3129_v23  ;;  %v3099_v49 = vadd.f32 %v3067_v39, %v3051_v44  ;;  %v3004_v33 = vadd.f32 %v2972_v63, %v2956_v40  ;;  %v2814_v29 = vadd.f32 %v5605_v22, %v2782_v9 }
 0x80e   :  { %v2909_v21 = vadd.f32 %v2877_v3, %v2861_v31  ;;  %v2830_v32 = vrot.slane %v5605_v22, 2  ;;  %v3068_v45 = vrot.slane %v5576_v62, 7  ;;  %v2973_v2 = vrot.slane %v5594_v0, 5  ;;  %v2138_v31 = vpop.f32.mrf.mxu2 }
 0x80f   :  { %4184 = vmatmul.msk.f32.gmra.mxu2 %vm1184_vm1, %v3145_v1  ;;  %4411 = vrcp.f32 %v3099_v49  ;;  %v3052_v50 = vadd.f32 %v3020_v12, %v3004_v33  ;;  %v2878_v24 = vrot.slane %v5605_v22, 3  ;;  %v3021_v42 = vrot.slane %v5594_v0, 6 }
 0x810   :  { %v2957_v48 = vadd.f32 %v2925_v36, %v2909_v21  ;;  %v2862_v59 = vadd.f32 %v2830_v32, %v2814_v29  ;;  %v2926_v35 = vrot.slane %v5605_v22, 4  ;;  %v3069_v5 = vrot.slane %v5594_v0, 7  ;;  %v5656_v21 = vld [vmem:[%s5862_s8 + $0x10] sm:$0xff]  ;;  %v4263_v36 = vld [vmem:[%s5859_s5 + $0x18] sm:$0xff] }
 0x811   :  { %v5621_v13 = vpop.eup %4407  ;;  %v3100_v28 = vadd.f32 %v3068_v45, %v3052_v50  ;;  %v2974_v10 = vrot.slane %v5605_v22, 5  ;;  %v3022_v8 = vrot.slane %v5605_v22, 6  ;;  %v3070_v57 = vrot.slane %v5605_v22, 7  ;;  %3737 = vmatpush.bf16.msra.mxu3 %v4263_v36 }
 0x812   :  { %v4410_v19 = vpop.eup %4409  ;;  %v2783_v25 = vrot.slane %v5621_v13, 1  ;;  %v3005_v30 = vadd.f32 %v2973_v2, %v2957_v48  ;;  %v2910_v34 = vadd.f32 %v2878_v24, %v2862_v59  ;;  %v2831_v11 = vrot.slane %v5621_v13, 2 }
 0x813   :  { %v3130_v26 = vperm.slane %v4410_v19, 0  ;;  %4413 = vrcp.f32 %v3100_v28  ;;  %v2927_v16 = vrot.slane %v5621_v13, 4  ;;  %v2975_v20 = vrot.slane %v5621_v13, 5 }
 0x814   :  { %v2815_v51 = vadd.f32 %v5621_v13, %v2783_v25  ;;  %v3053_v41 = vadd.f32 %v3021_v42, %v3005_v30  ;;  %v2958_v37 = vadd.f32 %v2926_v35, %v2910_v34  ;;  %v3023_v15 = vrot.slane %v5621_v13, 6 }
 0x815   :  { %v3146_v58 = vmul.f32 %v5530_v17, %v3130_v26  ;;  %v4412_v38 = vpop.eup %4411  ;;  %v2879_v17 = vrot.slane %v5621_v13, 3  ;;  %v3071_v40 = vrot.slane %v5621_v13, 7 }
 0x816   :  { %v2863_v6 = vadd.f32 %v2831_v11, %v2815_v51  ;;  %v3131_v43 = vperm.slane %v4412_v38, 0  ;;  %v3101_v53 = vadd.f32 %v3069_v5, %v3053_v41  ;;  %v3006_v54 = vadd.f32 %v2974_v10, %v2958_v37  ;;  %v5650_v33 = vpop.f32.mrf.mxu2 }
 0x817   :  { %4185 = vmatmul.msk.f32.gmra.mxu2 %vm1184_vm1, %v3146_v58 }
 0x818   :  { %v2911_v4 = vadd.f32 %v2879_v17, %v2863_v6  ;;  %v3147_v56 = vmul.f32 %v5554_v47, %v3131_v43  ;;  %4415 = vrcp.f32 %v3101_v53  ;;  %v3054_v27 = vadd.f32 %v3022_v8, %v3006_v54 }
 0x819   :  { %v4414_v55 = vpop.eup %4413 }
 0x81a   :  { %v2959_v52 = vadd.f32 %v2927_v16, %v2911_v4  ;;  %v3132_v60 = vperm.slane %v4414_v55, 0  ;;  %v3102_v61 = vadd.f32 %v3070_v57, %v3054_v27 }
 0x81c   :  { %v3007_v39 = vadd.f32 %v2975_v20, %v2959_v52  ;;  %v3148_v14 = vmul.f32 %v5576_v62, %v3132_v60  ;;  %4417 = vrcp.f32 %v3102_v61 }
 0x81e   :  { %v4416_v47 = vpop.eup %4415  ;;  %v3055_v23 = vadd.f32 %v3023_v15, %v3007_v39 }
 0x81f   :  { %4186 = vmatmul.msk.f32.gmra.mxu2 %vm1184_vm1, %v3147_v56  ;;  %v3133_v44 = vperm.slane %v4416_v47, 0 }
 0x820   :  { %v3103_v63 = vadd.f32 %v3071_v40, %v3055_v23 }
 0x821   :  { %v3149_v3 = vmul.f32 %v5594_v0, %v3133_v44  ;;  %v2116_v0 = vperm.slane %v5656_v21, 2 }
 0x822   :  { %v4418_v9 = vpop.eup %4417  ;;  %4419 = vrcp.f32 %v3103_v63 }
 0x823   :  { %v3134_v1 = vperm.slane %v4418_v9, 0  ;;  %v5665_v29 = vadd.f32 %v2138_v31, %v2116_v0 }
 0x825   :  { %v3150_v62 = vmul.f32 %v5605_v22, %v3134_v1 }
 0x827   :  { %4187 = vmatmul.msk.f32.gmra.mxu2 %vm1184_vm1, %v3148_v14 }
 0x828   :  { %v4420_v49 = vpop.eup %4419 }
 0x829   :  { %v3135_v12 = vperm.slane %v4420_v49, 0 }
 0x82b   :  { %v3151_v22 = vmul.f32 %v5621_v13, %v3135_v12 }
 0x82f   :  { %4188 = vmatmul.msk.f32.gmra.mxu2 %vm1184_vm1, %v3149_v3 }
 0x837   :  { %4189 = vmatmul.msk.f32.gmra.mxu2 %vm1184_vm1, %v3150_v62 }
 0x83b   :  { %v3217_v32 = vpop.f32.mrf.mxu2 }
 0x83c   :  { %v3265_v50 = vmul.f32 %v3217_v32, %v5665_v29 }
 0x83e   :  { %v3297_v45 = vrot.slane %v3265_v50, 1  ;;  %v3345_v19 = vrot.slane %v3265_v50, 2  ;;  %v3393_v59 = vrot.slane %v3265_v50, 3  ;;  %v3441_v28 = vrot.slane %v3265_v50, 4 }
 0x83f   :  { %4190 = vmatmul.msk.f32.gmra.mxu2 %vm1184_vm1, %v3151_v22  ;;  %v3489_v58 = vrot.slane %v3265_v50, 5  ;;  %v3537_v43 = vrot.slane %v3265_v50, 6  ;;  %v3585_v8 = vrot.slane %v3265_v50, 7 }
 0x840   :  { %v3329_v2 = vadd.f32 %v3297_v45, %v3265_v50 }
 0x842   :  { %v3377_v48 = vadd.f32 %v3345_v19, %v3329_v2 }
 0x844   :  { %v3425_v25 = vadd.f32 %v3393_v59, %v3377_v48 }
 0x845   :  { %v3220_v24 = vpop.f32.mrf.mxu2 }
 0x846   :  { %v3266_v26 = vmul.f32 %v3220_v24, %v5665_v29  ;;  %v3473_v30 = vadd.f32 %v3441_v28, %v3425_v25 }
 0x848   :  { %v3298_v13 = vrot.slane %v3266_v26, 1  ;;  %v3346_v51 = vrot.slane %v3266_v26, 2  ;;  %v3394_v35 = vrot.slane %v3266_v26, 3  ;;  %v3521_v11 = vadd.f32 %v3489_v58, %v3473_v30 }
 0x849   :  { %v3442_v37 = vrot.slane %v3266_v26, 4  ;;  %v3490_v10 = vrot.slane %v3266_v26, 5  ;;  %v3538_v4 = vrot.slane %v3266_v26, 6  ;;  %v3586_v16 = vrot.slane %v3266_v26, 7 }
 0x84a   :  { %v3330_v34 = vadd.f32 %v3298_v13, %v3266_v26  ;;  %v3569_v53 = vadd.f32 %v3537_v43, %v3521_v11 }
 0x84c   :  { %v3378_v42 = vadd.f32 %v3346_v51, %v3330_v34  ;;  %v3617_v57 = vadd.f32 %v3585_v8, %v3569_v53 }
 0x84d   :  { %v3223_v38 = vpop.f32.mrf.mxu2 }
 0x84e   :  { %v3426_v41 = vadd.f32 %v3394_v35, %v3378_v42  ;;  %v3267_v6 = vmul.f32 %v3223_v38, %v5665_v29  ;;  %v3633_v63 = vpack.c.bf16 %v3617_v57, %v3617_v57 }
 0x850   :  { %v3474_v5 = vadd.f32 %v3442_v37, %v3426_v41  ;;  %v3299_v17 = vrot.slane %v3267_v6, 1  ;;  %v3347_v55 = vrot.slane %v3267_v6, 2  ;;  %v3395_v52 = vrot.slane %v3267_v6, 3 }
 0x851   :  { %v3443_v61 = vrot.slane %v3267_v6, 4  ;;  %v3491_v23 = vrot.slane %v3267_v6, 5  ;;  %v3539_v31 = vrot.slane %v3267_v6, 6  ;;  %v3587_v12 = vrot.slane %v3267_v6, 7 }
 0x852   :  { %v3522_v54 = vadd.f32 %v3490_v10, %v3474_v5  ;;  %v3331_v56 = vadd.f32 %v3299_v17, %v3267_v6  ;;  %v3671_v32 = vunpack.c.l.b16 %v3633_v63 }
 0x854   :  { %v3379_v27 = vadd.f32 %v3347_v55, %v3331_v56  ;;  %v3570_v60 = vadd.f32 %v3538_v4, %v3522_v54 }
 0x856   :  { %v3427_v20 = vadd.f32 %v3395_v52, %v3379_v27  ;;  %v3226_v39 = vpop.f32.mrf.mxu2  ;;  %v3618_v14 = vadd.f32 %v3586_v16, %v3570_v60 }
 0x857   :  { %v3268_v47 = vmul.f32 %v3226_v39, %v5665_v29 }
 0x858   :  { %v3475_v15 = vadd.f32 %v3443_v61, %v3427_v20  ;;  %v3634_v44 = vpack.c.bf16 %v3618_v14, %v3618_v14 }
 0x859   :  { %v3300_v40 = vrot.slane %v3268_v47, 1  ;;  %v3348_v1 = vrot.slane %v3268_v47, 2  ;;  %v3396_v22 = vrot.slane %v3268_v47, 3  ;;  %v3444_v19 = vrot.slane %v3268_v47, 4 }
 0x85a   :  { %v3523_v3 = vadd.f32 %v3491_v23, %v3475_v15  ;;  %v3672_v62 = vunpack.c.l.b16 %v3634_v44  ;;  %v3492_v24 = vrot.slane %v3268_v47, 5  ;;  %v3540_v13 = vrot.slane %v3268_v47, 6 }
 0x85b   :  { %v3332_v9 = vadd.f32 %v3300_v40, %v3268_v47  ;;  %v3588_v42 = vrot.slane %v3268_v47, 7 }
 0x85c   :  { %v3571_v49 = vadd.f32 %v3539_v31, %v3523_v3  ;;  %v3687_v50 = vrot.slane %v3672_v62, 7 }
 0x85d   :  { %v3380_v36 = vadd.f32 %v3348_v1, %v3332_v9 }
 0x85e   :  { %v3619_v45 = vadd.f32 %v3587_v12, %v3571_v49  ;;  %v3688_v48 = vsel %vm1720_vm2, %v3687_v50, %v3671_v32 }
 0x85f   :  { %v3428_v2 = vadd.f32 %v3396_v22, %v3380_v36 }
 0x860   :  { %v3635_v59 = vpack.c.bf16 %v3619_v45, %v3619_v45 }
 0x861   :  { %v3476_v25 = vadd.f32 %v3444_v19, %v3428_v2 }
 0x862   :  { %v3673_v26 = vunpack.c.l.b16 %v3635_v59 }
 0x863   :  { %v3524_v28 = vadd.f32 %v3492_v24, %v3476_v25 }
 0x864   :  { %v3229_v30 = vpop.f32.mrf.mxu2  ;;  %v3689_v34 = vrot.slane %v3673_v26, 6 }
 0x865   :  { %v3269_v51 = vmul.f32 %v3229_v30, %v5665_v29  ;;  %v3572_v58 = vadd.f32 %v3540_v13, %v3524_v28 }
 0x866   :  { %v3690_v35 = vsel %vm1723_vm3, %v3689_v34, %v3688_v48 }
 0x867   :  { %v3301_v11 = vrot.slane %v3269_v51, 1  ;;  %v3620_v38 = vadd.f32 %v3588_v42, %v3572_v58  ;;  %v3349_v37 = vrot.slane %v3269_v51, 2  ;;  %v3397_v5 = vrot.slane %v3269_v51, 3  ;;  %v4262_v58 = vld [vmem:[%s5859_s5 + $0x10] sm:$0xff] }
 0x868   :  { %v3445_v4 = vrot.slane %v3269_v51, 4  ;;  %v3493_v16 = vrot.slane %v3269_v51, 5  ;;  %v3541_v20 = vrot.slane %v3269_v51, 6  ;;  %v3589_v47 = vrot.slane %v3269_v51, 7  ;;  %3738 = vmatpush.bf16.msra.mxu3 %v4262_v58 }
 0x869   :  { %v3333_v41 = vadd.f32 %v3301_v11, %v3269_v51  ;;  %v3636_v6 = vpack.c.bf16 %v3620_v38, %v3620_v38 }
 0x86b   :  { %v3381_v43 = vadd.f32 %v3349_v37, %v3333_v41  ;;  %v3674_v17 = vunpack.c.l.b16 %v3636_v6 }
 0x86c   :  { %v3232_v10 = vpop.f32.mrf.mxu2 }
 0x86d   :  { %v3270_v53 = vmul.f32 %v3232_v10, %v5665_v29  ;;  %v3429_v54 = vadd.f32 %v3397_v5, %v3381_v43  ;;  %v3691_v56 = vrot.slane %v3674_v17, 5 }
 0x86f   :  { %v3302_v55 = vrot.slane %v3270_v53, 1  ;;  %v3477_v8 = vadd.f32 %v3445_v4, %v3429_v54  ;;  %v3350_v52 = vrot.slane %v3270_v53, 2  ;;  %v3692_v60 = vsel %vm1726_vm4, %v3691_v56, %v3690_v35 }
 0x870   :  { %v3398_v61 = vrot.slane %v3270_v53, 3  ;;  %v3446_v23 = vrot.slane %v3270_v53, 4  ;;  %v3494_v63 = vrot.slane %v3270_v53, 5  ;;  %v3542_v1 = vrot.slane %v3270_v53, 6 }
 0x871   :  { %v3334_v27 = vadd.f32 %v3302_v55, %v3270_v53  ;;  %v3525_v57 = vadd.f32 %v3493_v16, %v3477_v8  ;;  %v3590_v36 = vrot.slane %v3270_v53, 7 }
 0x873   :  { %v3382_v39 = vadd.f32 %v3350_v52, %v3334_v27  ;;  %v3573_v14 = vadd.f32 %v3541_v20, %v3525_v57 }
 0x875   :  { %v3430_v15 = vadd.f32 %v3398_v61, %v3382_v39  ;;  %v3621_v44 = vadd.f32 %v3589_v47, %v3573_v14 }
 0x877   :  { %v3478_v40 = vadd.f32 %v3446_v23, %v3430_v15  ;;  %v3637_v31 = vpack.c.bf16 %v3621_v44, %v3621_v44 }
 0x878   :  { %v3235_v3 = vpop.f32.mrf.mxu2 }
 0x879   :  { %v3526_v9 = vadd.f32 %v3494_v63, %v3478_v40  ;;  %v3271_v62 = vmul.f32 %v3235_v3, %v5665_v29  ;;  %v3675_v49 = vunpack.c.l.b16 %v3637_v31  ;;  %v5691_v63 = vadd.f32 %v5650_v33, %v2116_v0 }
 0x87b   :  { %v3574_v12 = vadd.f32 %v3542_v1, %v3526_v9  ;;  %v3303_v22 = vrot.slane %v3271_v62, 1  ;;  %v3351_v45 = vrot.slane %v3271_v62, 2  ;;  %v3693_v2 = vrot.slane %v3675_v49, 4 }
 0x87c   :  { %v3399_v59 = vrot.slane %v3271_v62, 3  ;;  %v3447_v30 = vrot.slane %v3271_v62, 4  ;;  %v3495_v35 = vrot.slane %v3271_v62, 5  ;;  %v3543_v6 = vrot.slane %v3271_v62, 6 }
 0x87d   :  { %v3622_v32 = vadd.f32 %v3590_v36, %v3574_v12  ;;  %v3335_v50 = vadd.f32 %v3303_v22, %v3271_v62  ;;  %v3694_v24 = vsel %vm1729_vm5, %v3693_v2, %v3692_v60  ;;  %v3591_v10 = vrot.slane %v3271_v62, 7 }
 0x87f   :  { %v3638_v19 = vpack.c.bf16 %v3622_v32, %v3622_v32  ;;  %v3383_v48 = vadd.f32 %v3351_v45, %v3335_v50 }
 0x880   :  { %v3238_v25 = vpop.f32.mrf.mxu2 }
 0x881   :  { %v3676_v26 = vunpack.c.l.b16 %v3638_v19  ;;  %v3272_v28 = vmul.f32 %v3238_v25, %v5665_v29  ;;  %v3431_v13 = vadd.f32 %v3399_v59, %v3383_v48 }
 0x883   :  { %v3695_v34 = vrot.slane %v3676_v26, 3  ;;  %v3304_v51 = vrot.slane %v3272_v28, 1  ;;  %v3479_v42 = vadd.f32 %v3447_v30, %v3431_v13  ;;  %v3352_v38 = vrot.slane %v3272_v28, 2 }
 0x884   :  { %v3400_v5 = vrot.slane %v3272_v28, 3  ;;  %v3448_v54 = vrot.slane %v3272_v28, 4  ;;  %v3496_v55 = vrot.slane %v3272_v28, 5  ;;  %v3544_v16 = vrot.slane %v3272_v28, 6 }
 0x885   :  { %v3336_v11 = vadd.f32 %v3304_v51, %v3272_v28  ;;  %v3696_v41 = vsel %vm1732_vm6, %v3695_v34, %v3694_v24  ;;  %v3527_v37 = vadd.f32 %v3495_v35, %v3479_v42  ;;  %v3592_v60 = vrot.slane %v3272_v28, 7 }
 0x887   :  { %v3384_v43 = vadd.f32 %v3352_v38, %v3336_v11  ;;  %v3575_v29 = vadd.f32 %v3543_v6, %v3527_v37 }
 0x889   :  { %v3432_v53 = vadd.f32 %v3400_v5, %v3384_v43  ;;  %v3623_v4 = vadd.f32 %v3591_v10, %v3575_v29 }
 0x88a   :  { %v3241_v17 = vpop.f32.mrf.mxu2 }
 0x88b   :  { %v3480_v56 = vadd.f32 %v3448_v54, %v3432_v53  ;;  %v3639_v27 = vpack.c.bf16 %v3623_v4, %v3623_v4  ;;  %v5700_v1 = vmul.f32 %v3241_v17, %v5691_v63 }
 0x88d   :  { %v3528_v8 = vadd.f32 %v3496_v55, %v3480_v56  ;;  %v3677_v57 = vunpack.c.l.b16 %v3639_v27  ;;  %v3305_v33 = vrot.slane %v5700_v1, 1  ;;  %v3353_v26 = vrot.slane %v5700_v1, 2 }
 0x88e   :  { %v3401_v37 = vrot.slane %v5700_v1, 3 }
 0x88f   :  { %v3576_v52 = vadd.f32 %v3544_v16, %v3528_v8  ;;  %v3697_v39 = vrot.slane %v3677_v57, 2  ;;  %v3337_v19 = vadd.f32 %v3305_v33, %v5700_v1  ;;  %v3449_v16 = vrot.slane %v5700_v1, 4 }
 0x891   :  { %v3624_v61 = vadd.f32 %v3592_v60, %v3576_v52  ;;  %v3698_v15 = vsel %vm1735_vm7, %v3697_v39, %v3696_v41  ;;  %v3385_v58 = vadd.f32 %v3353_v26, %v3337_v19 }
 0x892   :  { %v3244_v20 = vpop.f32.mrf.mxu2 }
 0x893   :  { %v3640_v14 = vpack.c.bf16 %v3624_v61, %v3624_v61  ;;  %v5694_v3 = vmul.f32 %v3244_v20, %v5691_v63  ;;  %v3433_v17 = vadd.f32 %v3401_v37, %v3385_v58 }
 0x895   :  { %v3678_v47 = vunpack.c.l.b16 %v3640_v14  ;;  %v3306_v49 = vrot.slane %v5694_v3, 1  ;;  %v3354_v45 = vrot.slane %v5694_v3, 2  ;;  %v3402_v13 = vrot.slane %v5694_v3, 3 }
 0x896   :  { %v3450_v5 = vrot.slane %v5694_v3, 4  ;;  %v3498_v57 = vrot.slane %v5694_v3, 5  ;;  %v3481_v14 = vadd.f32 %v3449_v16, %v3433_v17 }
 0x897   :  { %v3699_v23 = vrot.slane %v3678_v47, 1  ;;  %v3338_v32 = vadd.f32 %v3306_v49, %v5694_v3 }
 0x899   :  { %v5686_v40 = vsel %vm1738_vm8, %v3699_v23, %v3698_v15  ;;  %v3386_v59 = vadd.f32 %v3354_v45, %v3338_v32  ;;  %v3546_v32 = vrot.slane %v5694_v3, 6 }
 0x89a   :  { %v3247_v44 = vpop.f32.mrf.mxu2 }
 0x89b   :  { %v5697_v9 = vmul.f32 %v3247_v44, %v5691_v63  ;;  %v3434_v11 = vadd.f32 %v3402_v13, %v3386_v59 }
 0x89d   :  { %v3307_v12 = vrot.slane %v5697_v9, 1  ;;  %v3355_v24 = vrot.slane %v5697_v9, 2  ;;  %v3403_v38 = vrot.slane %v5697_v9, 3  ;;  %v3482_v56 = vadd.f32 %v3450_v5, %v3434_v11 }
 0x89e   :  { %v3451_v55 = vrot.slane %v5697_v9, 4  ;;  %v3547_v26 = vrot.slane %v5697_v9, 6  ;;  %v3594_v11 = vrot.slane %v5694_v3, 7 }
 0x89f   :  { %v3339_v2 = vadd.f32 %v3307_v12, %v5697_v9  ;;  %v3530_v44 = vadd.f32 %v3498_v57, %v3482_v56 }
 0x8a1   :  { %v3387_v30 = vadd.f32 %v3355_v24, %v3339_v2  ;;  %v3578_v13 = vadd.f32 %v3546_v32, %v3530_v44 }
 0x8a2   :  { %v3250_v31 = vpop.f32.mrf.mxu2 }
 0x8a3   :  { %v5703_v62 = vmul.f32 %v3250_v31, %v5691_v63  ;;  %v3435_v29 = vadd.f32 %v3403_v38, %v3387_v30  ;;  %v3499_v31 = vrot.slane %v5697_v9, 5 }
 0x8a5   :  { %v3308_v0 = vrot.slane %v5703_v62, 1  ;;  %v3356_v28 = vrot.slane %v5703_v62, 2  ;;  %v3404_v6 = vrot.slane %v5703_v62, 3  ;;  %v3452_v27 = vrot.slane %v5703_v62, 4 }
 0x8a6   :  { %v3483_v20 = vadd.f32 %v3451_v55, %v3435_v29  ;;  %v3500_v33 = vrot.slane %v5703_v62, 5  ;;  %v3548_v58 = vrot.slane %v5703_v62, 6  ;;  %v3596_v3 = vrot.slane %v5703_v62, 7 }
 0x8a7   :  { %v3340_v48 = vadd.f32 %v3308_v0, %v5703_v62  ;;  %v3626_v55 = vadd.f32 %v3594_v11, %v3578_v13 }
 0x8a8   :  { %v3531_v2 = vadd.f32 %v3499_v31, %v3483_v20 }
 0x8a9   :  { %v3388_v42 = vadd.f32 %v3356_v28, %v3340_v48  ;;  %v3642_v44 = vpack.c.bf16 %v3626_v55, %v3626_v55 }
 0x8aa   :  { %v3253_v36 = vpop.f32.mrf.mxu2  ;;  %v3579_v37 = vadd.f32 %v3547_v26, %v3531_v2 }
 0x8ab   :  { %v5710_v22 = vmul.f32 %v3253_v36, %v5691_v63  ;;  %v3436_v53 = vadd.f32 %v3404_v6, %v3388_v42  ;;  %v3497_v36 = vrot.slane %v5700_v1, 5  ;;  %v3545_v42 = vrot.slane %v5700_v1, 6 }
 0x8ac   :  { %v3680_v2 = vunpack.c.l.b16 %v3642_v44 }
 0x8ad   :  { %v3309_v50 = vrot.slane %v5710_v22, 1  ;;  %v3357_v34 = vrot.slane %v5710_v22, 2  ;;  %v3405_v10 = vrot.slane %v5710_v22, 3  ;;  %v3453_v61 = vrot.slane %v5710_v22, 4 }
 0x8ae   :  { %v3484_v23 = vadd.f32 %v3452_v27, %v3436_v53  ;;  %v3501_v45 = vrot.slane %v5710_v22, 5 }
 0x8af   :  { %v3341_v25 = vadd.f32 %v3309_v50, %v5710_v22 }
 0x8b0   :  { %v3532_v24 = vadd.f32 %v3500_v33, %v3484_v23 }
 0x8b1   :  { %v3389_v41 = vadd.f32 %v3357_v34, %v3341_v25  ;;  %v3529_v25 = vadd.f32 %v3497_v36, %v3481_v14 }
 0x8b2   :  { %v3256_v51 = vpop.f32.mrf.mxu2  ;;  %v3580_v29 = vadd.f32 %v3548_v58, %v3532_v24 }
 0x8b3   :  { %v5725_v35 = vmul.f32 %v3256_v51, %v5691_v63  ;;  %v3437_v8 = vadd.f32 %v3405_v10, %v3389_v41  ;;  %v3549_v41 = vrot.slane %v5710_v22, 6  ;;  %v3577_v17 = vadd.f32 %v3545_v42, %v3529_v25 }
 0x8b4   :  { %v3628_v20 = vadd.f32 %v3596_v3, %v3580_v29 }
 0x8b5   :  { %v3310_v43 = vrot.slane %v5725_v35, 1  ;;  %v3358_v4 = vrot.slane %v5725_v35, 2  ;;  %v3406_v52 = vrot.slane %v5725_v35, 3  ;;  %v3454_v49 = vrot.slane %v5725_v35, 4 }
 0x8b6   :  { %v3485_v12 = vadd.f32 %v3453_v61, %v3437_v8  ;;  %v3502_v59 = vrot.slane %v5725_v35, 5  ;;  %v3550_v5 = vrot.slane %v5725_v35, 6  ;;  %v3598_v57 = vrot.slane %v5725_v35, 7 }
 0x8b7   :  { %v3342_v54 = vadd.f32 %v3310_v43, %v5725_v35  ;;  %v3593_v61 = vrot.slane %v5700_v1, 7 }
 0x8b8   :  { %v3533_v28 = vadd.f32 %v3501_v45, %v3485_v12 }
 0x8b9   :  { %v3390_v60 = vadd.f32 %v3358_v4, %v3342_v54  ;;  %v3595_v54 = vrot.slane %v5697_v9, 7  ;;  %v3625_v33 = vadd.f32 %v3593_v61, %v3577_v17 }
 0x8ba   :  { %v3259_v39 = vpop.f32.mrf.mxu2  ;;  %v3581_v53 = vadd.f32 %v3549_v41, %v3533_v28 }
 0x8bb   :  { %v5742_v47 = vmul.f32 %v3259_v39, %v5691_v63  ;;  %v3438_v15 = vadd.f32 %v3406_v52, %v3390_v60  ;;  %v3627_v27 = vadd.f32 %v3595_v54, %v3579_v37  ;;  %v3641_v25 = vpack.c.bf16 %v3625_v33, %v3625_v33 }
 0x8bd   :  { %v3311_v0 = vrot.slane %v5742_v47, 1  ;;  %v3486_v50 = vadd.f32 %v3454_v49, %v3438_v15  ;;  %v3359_v48 = vrot.slane %v5742_v47, 2  ;;  %v3407_v34 = vrot.slane %v5742_v47, 3 }
 0x8be   :  { %v3455_v10 = vrot.slane %v5742_v47, 4  ;;  %v3503_v16 = vrot.slane %v5742_v47, 5  ;;  %v3551_v9 = vrot.slane %v5742_v47, 6  ;;  %v3599_v49 = vrot.slane %v5742_v47, 7 }
 0x8bf   :  { %v3343_v19 = vadd.f32 %v3311_v0, %v5742_v47  ;;  %v3534_v51 = vadd.f32 %v3502_v59, %v3486_v50  ;;  %v3644_v0 = vpack.c.bf16 %v3628_v20, %v3628_v20  ;;  %v3679_v11 = vunpack.c.l.b16 %v3641_v25 }
 0x8c1   :  { %v3391_v30 = vadd.f32 %v3359_v48, %v3343_v19  ;;  %v3582_v56 = vadd.f32 %v3550_v5, %v3534_v51  ;;  %v3682_v26 = vunpack.c.l.b16 %v3644_v0 }
 0x8c2   :  { %v3262_v38 = vpop.f32.mrf.mxu2 }
 0x8c3   :  { %v3280_v6 = vmul.f32 %v3262_v38, %v5691_v63  ;;  %v3439_v43 = vadd.f32 %v3407_v34, %v3391_v30  ;;  %v3597_v63 = vrot.slane %v5710_v22, 7  ;;  %v3630_v23 = vadd.f32 %v3598_v57, %v3582_v56 }
 0x8c4   :  { %v3643_v22 = vpack.c.bf16 %v3627_v27, %v3627_v27  ;;  %v3701_v34 = vrot.slane %v3680_v2, 7  ;;  %v3705_v38 = vrot.slane %v3682_v26, 5 }
 0x8c5   :  { %v3312_v4 = vrot.slane %v3280_v6, 1  ;;  %v3487_v8 = vadd.f32 %v3455_v10, %v3439_v43  ;;  %v3360_v60 = vrot.slane %v3280_v6, 2  ;;  %v3629_v14 = vadd.f32 %v3597_v63, %v3581_v53 }
 0x8c6   :  { %v3408_v62 = vrot.slane %v3280_v6, 3  ;;  %v3456_v36 = vrot.slane %v3280_v6, 4  ;;  %v3504_v1 = vrot.slane %v3280_v6, 5  ;;  %v3646_v45 = vpack.c.bf16 %v3630_v23, %v3630_v23 }
 0x8c7   :  { %v3344_v52 = vadd.f32 %v3312_v4, %v3280_v6  ;;  %v3535_v39 = vadd.f32 %v3503_v16, %v3487_v8  ;;  %v3645_v32 = vpack.c.bf16 %v3629_v14, %v3629_v14  ;;  %v3681_v48 = vunpack.c.l.b16 %v3643_v22 }
 0x8c8   :  { %v3552_v24 = vrot.slane %v3280_v6, 6  ;;  %v3600_v47 = vrot.slane %v3280_v6, 7  ;;  %v3684_v30 = vunpack.c.l.b16 %v3646_v45  ;;  %v3702_v43 = vsel %vm1720_vm2, %v3701_v34, %v3679_v11 }
 0x8c9   :  { %v3392_v15 = vadd.f32 %v3360_v60, %v3344_v52  ;;  %v3583_v31 = vadd.f32 %v3551_v9, %v3535_v39  ;;  %v3683_v28 = vunpack.c.l.b16 %v3645_v32  ;;  %v3703_v58 = vrot.slane %v3681_v48, 6  ;;  %v4264_v39 = vld [vmem:[%s5860_s6 + $0x10] sm:$0xff] }
 0x8ca   :  { %v3709_v5 = vrot.slane %v3684_v30, 3  ;;  %v3654_v8 = vperm.slane %v5656_v21, 3 }
 0x8cb   :  { %v3440_v12 = vadd.f32 %v3408_v62, %v3392_v15  ;;  %v3631_v35 = vadd.f32 %v3599_v49, %v3583_v31  ;;  %v3707_v41 = vrot.slane %v3683_v28, 4  ;;  %v3704_v29 = vsel %vm1723_vm3, %v3703_v58, %v3702_v43 }
 0x8cc   :  { %v3706_v53 = vsel %vm1726_vm4, %v3705_v38, %v3704_v29  ;;  %v3803_v43 = vperm.slane %v5656_v21, 6 }
 0x8cd   :  { %v3488_v50 = vadd.f32 %v3456_v36, %v3440_v12  ;;  %v3647_v19 = vpack.c.bf16 %v3631_v35, %v3631_v35  ;;  %v3708_v6 = vsel %vm1729_vm5, %v3707_v41, %v3706_v53 }
 0x8ce   :  { %v3710_v54 = vsel %vm1732_vm6, %v3709_v5, %v3708_v6 }
 0x8cf   :  { %v3536_v59 = vadd.f32 %v3504_v1, %v3488_v50  ;;  %v3685_v51 = vunpack.c.l.b16 %v3647_v19 }
 0x8d1   :  { %v3584_v13 = vadd.f32 %v3552_v24, %v3536_v59  ;;  %v3711_v10 = vrot.slane %v3685_v51, 2  ;;  %v3794_v51 = vperm.slane %v5656_v21, 5 }
 0x8d3   :  { %v3632_v42 = vadd.f32 %v3600_v47, %v3584_v13  ;;  %v3712_v56 = vsel %vm1735_vm7, %v3711_v10, %v3710_v54  ;;  %v3791_v13 = vperm.slane %v5656_v21, 4 }
 0x8d5   :  { %v3648_v37 = vpack.c.bf16 %v3632_v42, %v3632_v42 }
 0x8d7   :  { %v3686_v17 = vunpack.c.l.b16 %v3648_v37 }
 0x8d9   :  { %v3713_v4 = vrot.slane %v3686_v17, 1 }
 0x8db   :  { %v3714_v3 = vsel %vm1738_vm8, %v3713_v4, %v3712_v56 }
 0x8dc   :  { %v3715_v55 = vpack.c.b16 %v3714_v3, %v5686_v40  ;;  %v4265_v40 = vld [vmem:[%s5860_s6 + $0x18] sm:$0xff] }
 0x8dd   :  { %3825 = vmatpush.bf16.msrb.mxu0 %v4265_v40 }
 0x8de   :  { %4203 = vmatmul.msk.bf16.vlgmr.msra.gmra.mxu3 %vm93_vm0, %v3715_v55 }
 0x8e1   :  { %3826 = vmatpush.bf16.msrb.mxu0 %v4264_v39 }
 0x961   :  { %v3740_v16 = vpop.f32.mrf.mxu3 }
 0x962   :  { %v3741_v63 = vadd.f32 %v3740_v16, %v3654_v8 }
 0x964   :  { %v3745_v27 = vadd.f32 %v3741_v63, %v5239_v46 }
 0x966   :  { %v3747_v52 = vsel %vm93_vm0, %v3745_v27, 0.0 }
 0x967   :  { %3748 = vadd.xlane.f32.xlu2 %v3747_v52  ;;  %v4269_v52 = vld [vmem:[%s5861_s7 + $0x38] sm:$0xff] }
 0x968   :  { %3933 = vmatpush.bf16.msrb.mxu3 %v4269_v52 }
 0x969   :  { %v3742_v60 = vpop.f32.mrf.mxu3 }
 0x96a   :  { %v3743_v57 = vadd.f32 %v3742_v60, %v3654_v8 }
 0x96c   :  { %v3746_v20 = vadd.f32 %v3743_v57, %v5241_v18 }
 0x96e   :  { %v3750_v61 = vsel %vm93_vm0, %v3746_v20, 0.0 }
 0x96f   :  { %3751 = vadd.xlane.f32.xlu0 %v3750_v61  ;;  %v4268_v61 = vld [vmem:[%s5861_s7 + $0x30] sm:$0xff] }
 0x970   :  { %3934 = vmatpush.bf16.msrb.mxu3 %v4268_v61 }
 0x9da   :  { %v3749_v46 = vpop.xlane.xlu2 %3748 }
 0x9db   :  { %v3753_v9 = vmul.f32 %v3749_v46, %v5146_v7 }
 0x9dd   :  { %v3755_v14 = vsub.f32 %v3745_v27, %v3753_v9 }
 0x9df   :  { %v3757_v15 = vmul.f32 %v3755_v14, %v3755_v14 }
 0x9e1   :  { %v3759_v18 = vsel %vm93_vm0, %v3757_v15, 0.0 }
 0x9e2   :  { %v3752_v62 = vpop.xlane.xlu0 %3751  ;;  %3760 = vadd.xlane.f32.xlu1 %v3759_v18  ;;  %v4267_v18 = vld [vmem:[%s5861_s7 + $0x28] sm:$0xff] }
 0x9e3   :  { %v3754_v23 = vmul.f32 %v3752_v62, %v5146_v7  ;;  %3935 = vmatpush.bf16.msrb.mxu3 %v4267_v18 }
 0x9e5   :  { %v3756_v44 = vsub.f32 %v3746_v20, %v3754_v23 }
 0x9e7   :  { %v3758_v31 = vmul.f32 %v3756_v44, %v3756_v44 }
 0x9e9   :  { %v3762_v49 = vsel %vm93_vm0, %v3758_v31, 0.0 }
 0x9ea   :  { %3763 = vadd.xlane.f32.xlu2 %v3762_v49 }
 0xa55   :  { %v3761_v22 = vpop.xlane.xlu1 %3760 }
 0xa56   :  { %v3765_v12 = vmul.f32 %v3761_v22, %v5146_v7 }
 0xa58   :  { %v3767_v36 = vadd.f32 1e-12, %v3765_v12 }
 0xa5a   :  { %4421 = vrsqrt.f32 %v3767_v36  ;;  %vm3775_vm2 = vweird.f32 %v3767_v36 }
 0xa5d   :  { %v3764_v33 = vpop.xlane.xlu2 %3763 }
 0xa5e   :  { %v3766_v0 = vmul.f32 %v3764_v33, %v5146_v7 }
 0xa60   :  { %v4422_v35 = vpop.eup %4421  ;;  %v3768_v32 = vadd.f32 1e-12, %v3766_v0 }
 0xa61   :  { %v3770_v50 = vmul.f32 %v4422_v35, %v3767_v36  ;;  %vm3776_vm1 = vweird.f32 %v4422_v35 }
 0xa62   :  { %4423 = vrsqrt.f32 %v3768_v32  ;;  %vm3777_vm3 = vmor %vm3775_vm2, %vm3776_vm1  ;;  %vm3785_vm5 = vweird.f32 %v3768_v32 }
 0xa63   :  { %v3771_v1 = vmul.f32 %v4422_v35, %v3770_v50 }
 0xa65   :  { %v3772_v45 = vmul.f32 0.5, %v3771_v1 }
 0xa67   :  { %v3773_v2 = vsub.f32 1.5, %v3772_v45 }
 0xa68   :  { %v4424_v19 = vpop.eup %4423 }
 0xa69   :  { %v3774_v48 = vmul.f32 %v4422_v35, %v3773_v2  ;;  %v3780_v59 = vmul.f32 %v4424_v19, %v3768_v32  ;;  %vm3786_vm4 = vweird.f32 %v4424_v19 }
 0xa6a   :  { %vm3787_vm6 = vmor %vm3785_vm5, %vm3786_vm4 }
 0xa6b   :  { %v3781_v24 = vmul.f32 %v4424_v19, %v3780_v59  ;;  %v3778_v25 = vsel %vm3777_vm3, %v4422_v35, %v3774_v48 }
 0xa6c   :  { %v3789_v47 = vmul.f32 %v3778_v25, %v3755_v14 }
 0xa6d   :  { %v3782_v26 = vmul.f32 0.5, %v3781_v24 }
 0xa6e   :  { %v3792_v58 = vmul.f32 %v3791_v13, %v3789_v47 }
 0xa6f   :  { %v3783_v28 = vsub.f32 1.5, %v3782_v26 }
 0xa70   :  { %v5799_v38 = vadd.f32 %v3794_v51, %v3792_v58 }
 0xa71   :  { %v3784_v30 = vmul.f32 %v4424_v19, %v3783_v28 }
 0xa73   :  { %v3788_v34 = vsel %vm3787_vm6, %v4424_v19, %v3784_v30 }
 0xa74   :  { %v3790_v42 = vmul.f32 %v3788_v34, %v3756_v44  ;;  %v4266_v44 = vld [vmem:[%s5861_s7 + $0x20] sm:$0xff] }
 0xa75   :  { %3936 = vmatpush.bf16.msrb.mxu3 %v4266_v44 }
 0xa76   :  { %v3793_v11 = vmul.f32 %v3791_v13, %v3790_v42 }
 0xa78   :  { %v5801_v41 = vadd.f32 %v3794_v51, %v3793_v11 }
 0xa7a   :  { %v3797_v37 = vpack.c.bf16 %v5801_v41, %v5799_v38 }
 0xa7c   :  { %4216 = vmatmul.msk.bf16.vlgmr.msrb.gmra.mxu0 %vm93_vm0, %v3797_v37 }
 0xaf9   :  { %v3828_v5 = vpop.f32.mrf.mxu0 }
 0xafa   :  { %v5807_v29 = vadd.f32 %v3828_v5, %v3803_v43 }
 0xafc   :  { %v5810_v10 = vmul.f32 0.70710677, %v5807_v29 }
 0xafe   :  { %v3835_v17 = vand.u32 2147483647, %v5810_v10  ;;  %vm3879_vm7 = vcmp.ge.f32.partialorder %v5810_v10, 0.0 }
 0xb00   :  { %v3837_v53 = vmul.f32 0.3275911, %v3835_v17  ;;  %v3867_v57 = vsub.f32 0.0, %v3835_v17 }
 0xb01   :  { %v3830_v6 = vpop.f32.mrf.mxu0 }
 0xb02   :  { %v3839_v54 = vadd.f32 1.0, %v3837_v53  ;;  %v5813_v4 = vadd.f32 %v3830_v6, %v3803_v43  ;;  %v3869_v9 = vmul.f32 %v3867_v57, %v3835_v17  ;;  %v3885_v43 = vmul.f32 0.5, %v5807_v29 }
 0xb04   :  { %4425 = vrcp.f32 %v3839_v54  ;;  %v3834_v56 = vmul.f32 0.70710677, %v5813_v4  ;;  %v3871_v31 = vmul.f32 1.442695, %v3869_v9  ;;  %v3886_v5 = vmul.f32 0.5, %v5813_v4 }
 0xb06   :  { %v3836_v3 = vand.u32 2147483647, %v3834_v56  ;;  %vm3880_vm8 = vcmp.ge.f32.partialorder %v3834_v56, 0.0 }
 0xb08   :  { %v3838_v55 = vmul.f32 0.3275911, %v3836_v3  ;;  %v3868_v49 = vsub.f32 0.0, %v3836_v3 }
 0xb0a   :  { %v4426_v8 = vpop.eup %4425  ;;  %v3840_v16 = vadd.f32 1.0, %v3838_v55  ;;  %v3870_v0 = vmul.f32 %v3868_v49, %v3836_v3  ;;  %v3901_v3 = vperm.slane %v5656_v21, 7  ;;  %v4119_v49 = vld [vmem:[%s5862_s8 + $0x18] sm:$0xff]  ;;  %s4518_s8 = smov [#allocation5]  }
 0xb0b   :  { %v3843_v63 = vmul.f32 %v4426_v8, %v3839_v54  ;;  %s4001_s13 = sshll.u32 %s4518_s8, 4  ;;  %s4002_s13 = int_to_ptr.vmem [resolvable:$true] %s4001_s13 }
 0xb0c   :  { %4427 = vrcp.f32 %v3840_v16  ;;  %v3873_v45 = vmul.f32 1.442695, %v3870_v0  ;;  %v3989_v0 = vperm.slane %v4119_v49, 0 }
 0xb0d   :  { %v3845_v27 = vsub.f32 2.0, %v3843_v63  ;;  %4429 = vpow2.f32 %v3871_v31 }
 0xb0e   :  { %4431 = vpow2.f32 %v3873_v45 }
 0xb0f   :  { %v3847_v60 = vmul.f32 %v4426_v8, %v3845_v27 }
 0xb11   :  { %v3849_v20 = vmul.f32 1.0614054, %v3847_v60 }
 0xb12   :  { %v4428_v40 = vpop.eup %4427 }
 0xb13   :  { %v3851_v39 = vadd.f32 -1.4531521, %v3849_v20  ;;  %v3844_v46 = vmul.f32 %v4428_v40, %v3840_v16  ;;  %v4430_v48 = vpop.eup %4429 }
 0xb14   :  { %v4432_v30 = vpop.eup %4431 }
 0xb15   :  { %v3853_v14 = vmul.f32 %v3851_v39, %v3847_v60  ;;  %v3846_v15 = vsub.f32 2.0, %v3844_v46 }
 0xb17   :  { %v3855_v62 = vadd.f32 1.4214138, %v3853_v14  ;;  %v3848_v23 = vmul.f32 %v4428_v40, %v3846_v15 }
 0xb19   :  { %v3857_v22 = vmul.f32 %v3855_v62, %v3847_v60  ;;  %v3850_v12 = vmul.f32 1.0614054, %v3848_v23 }
 0xb1b   :  { %v3859_v36 = vadd.f32 -0.28449672, %v3857_v22  ;;  %v3852_v33 = vadd.f32 -1.4531521, %v3850_v12 }
 0xb1d   :  { %v3861_v35 = vmul.f32 %v3859_v36, %v3847_v60  ;;  %v3854_v32 = vmul.f32 %v3852_v33, %v3848_v23 }
 0xb1f   :  { %v3863_v50 = vadd.f32 0.2548296, %v3861_v35  ;;  %v3856_v1 = vadd.f32 1.4214138, %v3854_v32 }
 0xb21   :  { %v3865_v2 = vmul.f32 %v3863_v50, %v3847_v60  ;;  %v3858_v19 = vmul.f32 %v3856_v1, %v3848_v23  ;;  %v3992_v50 = vperm.slane %v4119_v49, 1 }
 0xb23   :  { %v3875_v59 = vmul.f32 %v4430_v48, %v3865_v2  ;;  %v3860_v24 = vadd.f32 -0.28449672, %v3858_v19 }
 0xb25   :  { %v3877_v25 = vsub.f32 1.0, %v3875_v59  ;;  %v3862_v26 = vmul.f32 %v3860_v24, %v3848_v23 }
 0xb27   :  { %v3864_v28 = vadd.f32 0.2548296, %v3862_v26  ;;  %v3881_v13 = vsub.f32 0.0, %v3877_v25 }
 0xb29   :  { %v3866_v47 = vmul.f32 %v3864_v28, %v3848_v23  ;;  %v3883_v51 = vsel %vm3879_vm7, %v3877_v25, %v3881_v13 }
 0xb2a   :  { %v3887_v11 = vadd.f32 1.0, %v3883_v51 }
 0xb2b   :  { %v3876_v34 = vmul.f32 %v4432_v30, %v3866_v47 }
 0xb2c   :  { %v3889_v53 = vmul.f32 %v3887_v11, %v3885_v43 }
 0xb2d   :  { %v3878_v58 = vsub.f32 1.0, %v3876_v34 }
 0xb2f   :  { %v3882_v42 = vsub.f32 0.0, %v3878_v58 }
 0xb31   :  { %v3884_v37 = vsel %vm3880_vm8, %v3878_v58, %v3882_v42 }
 0xb32   :  { %v3888_v17 = vadd.f32 1.0, %v3884_v37 }
 0xb34   :  { %v3890_v6 = vmul.f32 %v3888_v17, %v3886_v5 }
 0xb36   :  { %v3891_v54 = vpack.c.bf16 %v3890_v6, %v3889_v53 }
 0xb38   :  { %4241 = vmatmul.msk.bf16.vlgmr.msrb.gmra.mxu3 %vm1970_vm11, %v3891_v54 }
 0xbbb   :  { %v3938_v55 = vpop.f32.mrf.mxu3 }
 0xbbc   :  { %v3939_v10 = vadd.f32 %v3938_v55, %v3901_v3 }
 0xbbe   :  { %v3943_v8 = vadd.f32 %v3939_v10, %v5799_v38 }
 0xbc0   :  { %v3945_v16 = vsel %vm93_vm0, %v3943_v8, 0.0 }
 0xbc1   :  { %3946 = vadd.xlane.f32.xlu0 %v3945_v16 }
 0xbc3   :  { %v3940_v56 = vpop.f32.mrf.mxu3 }
 0xbc4   :  { %v3941_v63 = vadd.f32 %v3940_v56, %v3901_v3 }
 0xbc6   :  { %v3944_v29 = vadd.f32 %v3941_v63, %v5801_v41 }
 0xbc8   :  { %v3948_v4 = vsel %vm93_vm0, %v3944_v29, 0.0 }
 0xbc9   :  { %3949 = vadd.xlane.f32.xlu1 %v3948_v4 }
 0xc34   :  { %v3947_v27 = vpop.xlane.xlu0 %3946 }
 0xc35   :  { %v3951_v52 = vmul.f32 %v3947_v27, %v5146_v7 }
 0xc37   :  { %v3953_v60 = vsub.f32 %v3943_v8, %v3951_v52 }
 0xc39   :  { %v3955_v57 = vmul.f32 %v3953_v60, %v3953_v60 }
 0xc3b   :  { %v3957_v21 = vsel %vm93_vm0, %v3955_v57, 0.0 }
 0xc3c   :  { %v3950_v20 = vpop.xlane.xlu1 %3949  ;;  %3958 = vadd.xlane.f32.xlu2 %v3957_v21 }
 0xc3d   :  { %v3952_v38 = vmul.f32 %v3950_v20, %v5146_v7 }
 0xc3f   :  { %v3954_v61 = vsub.f32 %v3944_v29, %v3952_v38 }
 0xc41   :  { %v3956_v40 = vmul.f32 %v3954_v61, %v3954_v61 }
 0xc43   :  { %v3960_v39 = vsel %vm93_vm0, %v3956_v40, 0.0 }
 0xc44   :  { %3961 = vadd.xlane.f32.xlu0 %v3960_v39 }
 0xcaf   :  { %v3959_v41 = vpop.xlane.xlu2 %3958 }
 0xcb0   :  { %v3963_v46 = vmul.f32 %v3959_v41, %v5146_v7 }
 0xcb2   :  { %v3965_v9 = vadd.f32 1e-12, %v3963_v46 }
 0xcb4   :  { %4433 = vrsqrt.f32 %v3965_v9  ;;  %vm3973_vm12 = vweird.f32 %v3965_v9 }
 0xcb7   :  { %v3962_v14 = vpop.xlane.xlu0 %3961 }
 0xcb8   :  { %v3964_v15 = vmul.f32 %v3962_v14, %v5146_v7 }
 0xcba   :  { %v4434_v18 = vpop.eup %4433  ;;  %v3966_v62 = vadd.f32 1e-12, %v3964_v15 }
 0xcbb   :  { %v3968_v23 = vmul.f32 %v4434_v18, %v3965_v9  ;;  %vm3974_vm11 = vweird.f32 %v4434_v18 }
 0xcbc   :  { %4435 = vrsqrt.f32 %v3966_v62  ;;  %vm3975_vm13 = vmor %vm3973_vm12, %vm3974_vm11  ;;  %vm3983_vm15 = vweird.f32 %v3966_v62 }
 0xcbd   :  { %v3969_v44 = vmul.f32 %v4434_v18, %v3968_v23 }
 0xcbf   :  { %v3970_v31 = vmul.f32 0.5, %v3969_v44 }
 0xcc1   :  { %v3971_v22 = vsub.f32 1.5, %v3970_v31 }
 0xcc2   :  { %v4436_v12 = vpop.eup %4435 }
 0xcc3   :  { %v3972_v36 = vmul.f32 %v4434_v18, %v3971_v22  ;;  %v3978_v33 = vmul.f32 %v4436_v12, %v3966_v62  ;;  %vm3984_vm14 = vweird.f32 %v4436_v12 }
 0xcc4   :  { %vm3985_vm9 = vmor %vm3983_vm15, %vm3984_vm14 }
 0xcc5   :  { %v3976_v35 = vsel %vm3975_vm13, %v4434_v18, %v3972_v36  ;;  %v3979_v7 = vmul.f32 %v4436_v12, %v3978_v33 }
 0xcc6   :  { %v3987_v32 = vmul.f32 %v3976_v35, %v3953_v60 }
 0xcc7   :  { %v3980_v1 = vmul.f32 0.5, %v3979_v7 }
 0xcc8   :  { %v3990_v45 = vmul.f32 %v3989_v0, %v3987_v32 }
 0xcc9   :  { %v3981_v2 = vsub.f32 1.5, %v3980_v1 }
 0xcca   :  { %v3993_v19 = vadd.f32 %v3992_v50, %v3990_v45 }
 0xccb   :  { %v3982_v48 = vmul.f32 %v4436_v12, %v3981_v2 }
 0xccc   :  { %3995 = vst.msk [vmem:[#allocation5] sm:$0xff] %vm93_vm0, %v3993_v19 }
 0xccd   :  { %v3986_v59 = vsel %vm3985_vm9, %v4436_v12, %v3982_v48 }
 0xcce   :  { %v3988_v24 = vmul.f32 %v3986_v59, %v3954_v61 }
 0xcd0   :  { %v3991_v25 = vmul.f32 %v3989_v0, %v3988_v24 }
 0xcd2   :  { %v3994_v26 = vadd.f32 %v3992_v50, %v3991_v25 }
 0xcd4   :  { %3996 = vst.msk [vmem:[#allocation5 + $0x8] sm:$0xff] %vm93_vm0, %v3994_v26 }
 0xcd5   :  { %4009 = dma.vmem_to_hbm [thread:$0]  %s4002_s13, 256, %s4004_s18, [#allocation4], %s4515_s14, %s4515_s14, %s4516_s15  }
 0xcd6   :  { %4512 = dma.done.wait [#allocation4], 256  }
 0xcd7   :  { %4513 = vsyncadd [#allocation4], 4294967040 }
 0xcd8   :  { %4014 = vsyncpa [#allocation3], 1 }
 0xcd9   :  { %4015 = vsyncpa [#allocation4], 1 }

</bundles_post_ra>
